<compile_context>
chip_gen: v6e
topology: v6e:2x2x1
jax: 0.10.0
libtpu: 0.0.40
codegen_flags: <defaults>
</compile_context>

<pallas_src>
import jax
import jax.numpy as jnp
from jax.experimental import pallas as pl
from jax.experimental.pallas import tpu as pltpu

C_PAD = 128  # lane-dense padded output width (actual classes = 10)


def mlp_kernel(x_ref, w1_ref, b1_ref, w2_ref, b2_ref, w3_ref, b3_ref, o_ref):
    # Cast the x tile to bf16 in-kernel (VPU cast hides under the MXU).
    x_bf = x_ref[...].astype(jnp.bfloat16)
    # fc1 + ReLU  (bf16 matmul inputs, f32 accumulation)
    h1 = jnp.dot(x_bf, w1_ref[...], preferred_element_type=jnp.float32)
    h1 = jnp.maximum(h1 + b1_ref[...], 0.0)
    # fc2 + ReLU
    h2 = jnp.dot(h1.astype(jnp.bfloat16), w2_ref[...],
                 preferred_element_type=jnp.float32)
    h2 = jnp.maximum(h2 + b2_ref[...], 0.0)
    # fc3 (output dim padded to 128 lanes; no activation)
    h3 = jnp.dot(h2.astype(jnp.bfloat16), w3_ref[...],
                 preferred_element_type=jnp.float32)
    o_ref[...] = (h3 + b3_ref[...]).astype(o_ref.dtype)


def prepare_params(w1, b1, w2, b2, w3, b3):
    """One-time weight prep: bf16 matmul operands, f32 biases, pad fc3 to 128 lanes."""
    H = w1.shape[1]
    C = w3.shape[1]
    w3_p = jnp.zeros((H, C_PAD), jnp.bfloat16).at[:, :C].set(w3.astype(jnp.bfloat16))
    b3_p = jnp.zeros((1, C_PAD), jnp.float32).at[:, :C].set(
        b3.reshape(1, -1).astype(jnp.float32))
    return (
        w1.astype(jnp.bfloat16), b1.reshape(1, -1).astype(jnp.float32),
        w2.astype(jnp.bfloat16), b2.reshape(1, -1).astype(jnp.float32),
        w3_p, b3_p,
    )


def _pick_batch_tile(B):
    """Largest tile (multiple of 128, capped at 512 for v5e scoped VMEM) that
    still leaves >= 2 grid steps when possible (keeps both v7x TCs busy)."""
    blocks_128 = pl.cdiv(B, 128)          # number of 128-row blocks
    if blocks_128 <= 1:
        return 128
    tb_blocks = min(4, pl.cdiv(blocks_128, 2))   # cap tile at 512 rows
    return tb_blocks * 128


def mnist_mlp(x, prepared_params, *, num_classes=10, tb=None):
    """Fused MLP forward. x: (B, 784) f32. Returns (B, num_classes) f32 logits."""
    w1_bf, b1_f, w2_bf, b2_f, w3_p, b3_p = prepared_params
    B, D_in = x.shape            # (B, 784)
    H = w1_bf.shape[1]           # 512

    if tb is None:
        tb = _pick_batch_tile(B)
    grid = (pl.cdiv(B, tb),)     # partial last block handled by Pallas (rows independent)

    out = pl.pallas_call(
        mlp_kernel,
        out_shape=jax.ShapeDtypeStruct((B, C_PAD), jnp.float32),
        grid_spec=pltpu.PrefetchScalarGridSpec(
            num_scalar_prefetch=0,
            grid=grid,
            in_specs=[
                pl.BlockSpec((tb, D_in), lambda i: (i, 0)),    # x tile (f32, cast in-kernel)
                pl.BlockSpec((D_in, H), lambda i: (0, 0)),     # w1 (resident)
                pl.BlockSpec((1, H), lambda i: (0, 0)),        # b1
                pl.BlockSpec((H, H), lambda i: (0, 0)),        # w2 (resident)
                pl.BlockSpec((1, H), lambda i: (0, 0)),        # b2
                pl.BlockSpec((H, C_PAD), lambda i: (0, 0)),    # w3 (padded, resident)
                pl.BlockSpec((1, C_PAD), lambda i: (0, 0)),    # b3 (padded)
            ],
            out_specs=pl.BlockSpec((tb, C_PAD), lambda i: (i, 0)),
        ),
        compiler_params=pltpu.CompilerParams(
            dimension_semantics=("parallel",),
        ),
    )(x, w1_bf, b1_f, w2_bf, b2_f, w3_p, b3_p)

    # Drop the lane padding on the logits.
    return out[:, :num_classes]


def init_params(key):
    """Deterministic init matching nn.Linear shapes (stored transposed: (in, out))."""
    k1, k2, k3, k4, k5, k6 = jax.random.split(key, 6)

    def lin(kw, kb, fan_in, fan_out):
        bound = 1.0 / jnp.sqrt(fan_in)
        w = jax.random.uniform(kw, (fan_in, fan_out), jnp.float32, -bound, bound)
        b = jax.random.uniform(kb, (1, fan_out), jnp.float32, -bound, bound)
        return w, b

    w1, b1 = lin(k1, k2, 784, 512)
    w2, b2 = lin(k3, k4, 512, 512)
    w3, b3 = lin(k5, k6, 512, 10)
    return w1, b1, w2, b2, w3, b3


def reference_f32(x, w1, b1, w2, b2, w3, b3):
    h1 = jnp.maximum(x @ w1 + b1, 0.0)
    h2 = jnp.maximum(h1 @ w2 + b2, 0.0)
    return h2 @ w3 + b3


if __name__ == "__main__":
    key = jax.random.PRNGKey(0)
    k_x, k_p = jax.random.split(key)
    params = init_params(k_p)
    # One-time weight prep (hoisted out of the forward path).
    prepared = jax.block_until_ready(prepare_params(*params))

    # Main check: B=256 -> tb=128, two "parallel" grid steps (shards across v7x TCs).
    B = 256
    x = jax.random.normal(k_x, (B, 784), dtype=jnp.float32)
    out = jax.block_until_ready(mnist_mlp(x, prepared))
    ref = reference_f32(x, *params)
    assert out.shape == (B, 10)
    # bf16 matmul inputs w/ f32 accumulation: loose tolerance vs f32 reference.
    assert jnp.allclose(out, ref, atol=3e-2, rtol=3e-2), "mismatch vs f32 reference"

    # Secondary check: non-multiple batch exercises the partial-last-block path.
    B2 = 50
    x2 = x[:B2]
    out2 = jax.block_until_ready(mnist_mlp(x2, prepared))
    ref2 = reference_f32(x2, *params)
    assert out2.shape == (B2, 10)
    assert jnp.allclose(out2, ref2, atol=3e-2, rtol=3e-2), "mismatch on ragged batch"

    # Larger batch exercises the tb=512 tile selection (still >= 2 grid steps).
    B3 = 1024
    x3 = jax.random.normal(jax.random.PRNGKey(1), (B3, 784), dtype=jnp.float32)
    out3 = jax.block_until_ready(mnist_mlp(x3, prepared))
    ref3 = reference_f32(x3, *params)
    assert out3.shape == (B3, 10)
    assert jnp.allclose(out3, ref3, atol=3e-2, rtol=3e-2), "mismatch at large batch"

    print("KERNEL_OK")
</pallas_src>

<mosaic_0001>
module attributes {stable_mosaic.version = 11 : i64} {
  func.func @mlp_kernel(%arg0: i32, %arg1: memref<128x784xf32, #tpu.memory_space<vmem>>, %arg2: memref<784x512xbf16, #tpu.memory_space<vmem>>, %arg3: memref<1x512xf32, #tpu.memory_space<vmem>>, %arg4: memref<512x512xbf16, #tpu.memory_space<vmem>>, %arg5: memref<1x512xf32, #tpu.memory_space<vmem>>, %arg6: memref<512x128xbf16, #tpu.memory_space<vmem>>, %arg7: memref<1x128xf32, #tpu.memory_space<vmem>>, %arg8: memref<128x128xf32, #tpu.memory_space<vmem>>) attributes {dimension_semantics = [#tpu.dimension_semantics<parallel>], iteration_bounds = array<i64: 2>, scalar_prefetch = 0 : i64, scratch_operands = 0 : i64, tpu.core_type = #tpu.core_type<tc>, window_params = [{transform_indices = @transform_0, window_bounds = array<i64: 128, 784>}, {pipeline_mode = #tpu.pipeline_mode<synchronous>, transform_indices = @transform_1, window_bounds = array<i64: 784, 512>}, {pipeline_mode = #tpu.pipeline_mode<synchronous>, transform_indices = @transform_2, window_bounds = array<i64: 1, 512>}, {pipeline_mode = #tpu.pipeline_mode<synchronous>, transform_indices = @transform_3, window_bounds = array<i64: 512, 512>}, {pipeline_mode = #tpu.pipeline_mode<synchronous>, transform_indices = @transform_4, window_bounds = array<i64: 1, 512>}, {pipeline_mode = #tpu.pipeline_mode<synchronous>, transform_indices = @transform_5, window_bounds = array<i64: 512, 128>}, {pipeline_mode = #tpu.pipeline_mode<synchronous>, transform_indices = @transform_6, window_bounds = array<i64: 1, 128>}, {transform_indices = @transform_7, window_bounds = array<i64: 128, 128>}]} {
    %c0 = arith.constant 0 : index
    %c0_0 = arith.constant 0 : index
    %0 = vector.load %arg1[%c0, %c0_0] : memref<128x784xf32, #tpu.memory_space<vmem>>, vector<128x784xf32>
    %1 = arith.truncf %0 : vector<128x784xf32> to vector<128x784xbf16>
    %c0_1 = arith.constant 0 : index
    %c0_2 = arith.constant 0 : index
    %2 = vector.load %arg2[%c0_1, %c0_2] : memref<784x512xbf16, #tpu.memory_space<vmem>>, vector<784x512xbf16>
    %cst = arith.constant dense<0.000000e+00> : vector<128x512xf32>
    %3 = tpu.matmul %1, %2, %cst {dimension_numbers = #tpu.dot_dimension_numbers<[1], [0], [0], [1], [0, 0, 1, 1], [], []>} : vector<128x784xbf16>, vector<784x512xbf16>, vector<128x512xf32> -> vector<128x512xf32>
    %c0_3 = arith.constant 0 : index
    %c0_4 = arith.constant 0 : index
    %4 = vector.load %arg3[%c0_3, %c0_4] : memref<1x512xf32, #tpu.memory_space<vmem>>, vector<1x512xf32>
    %5 = vector.broadcast %4 : vector<1x512xf32> to vector<128x512xf32>
    %6 = arith.addf %3, %5 : vector<128x512xf32>
    %cst_5 = arith.constant 0.000000e+00 : f32
    %7 = vector.broadcast %cst_5 : f32 to vector<128x512xf32>
    %8 = arith.maximumf %6, %7 : vector<128x512xf32>
    %9 = arith.truncf %8 : vector<128x512xf32> to vector<128x512xbf16>
    %c0_6 = arith.constant 0 : index
    %c0_7 = arith.constant 0 : index
    %10 = vector.load %arg4[%c0_6, %c0_7] : memref<512x512xbf16, #tpu.memory_space<vmem>>, vector<512x512xbf16>
    %cst_8 = arith.constant dense<0.000000e+00> : vector<128x512xf32>
    %11 = tpu.matmul %9, %10, %cst_8 {dimension_numbers = #tpu.dot_dimension_numbers<[1], [0], [0], [1], [0, 0, 1, 1], [], []>} : vector<128x512xbf16>, vector<512x512xbf16>, vector<128x512xf32> -> vector<128x512xf32>
    %c0_9 = arith.constant 0 : index
    %c0_10 = arith.constant 0 : index
    %12 = vector.load %arg5[%c0_9, %c0_10] : memref<1x512xf32, #tpu.memory_space<vmem>>, vector<1x512xf32>
    %13 = vector.broadcast %12 : vector<1x512xf32> to vector<128x512xf32>
    %14 = arith.addf %11, %13 : vector<128x512xf32>
    %cst_11 = arith.constant 0.000000e+00 : f32
    %15 = vector.broadcast %cst_11 : f32 to vector<128x512xf32>
    %16 = arith.maximumf %14, %15 : vector<128x512xf32>
    %17 = arith.truncf %16 : vector<128x512xf32> to vector<128x512xbf16>
    %c0_12 = arith.constant 0 : index
    %c0_13 = arith.constant 0 : index
    %18 = vector.load %arg6[%c0_12, %c0_13] : memref<512x128xbf16, #tpu.memory_space<vmem>>, vector<512x128xbf16>
    %cst_14 = arith.constant dense<0.000000e+00> : vector<128x128xf32>
    %19 = tpu.matmul %17, %18, %cst_14 {dimension_numbers = #tpu.dot_dimension_numbers<[1], [0], [0], [1], [0, 0, 1, 1], [], []>} : vector<128x512xbf16>, vector<512x128xbf16>, vector<128x128xf32> -> vector<128x128xf32>
    %c0_15 = arith.constant 0 : index
    %c0_16 = arith.constant 0 : index
    %20 = vector.load %arg7[%c0_15, %c0_16] : memref<1x128xf32, #tpu.memory_space<vmem>>, vector<1x128xf32>
    %21 = vector.broadcast %20 : vector<1x128xf32> to vector<128x128xf32>
    %22 = arith.addf %19, %21 : vector<128x128xf32>
    %c0_17 = arith.constant 0 : index
    %c0_18 = arith.constant 0 : index
    %23 = vector.load %arg8[%c0_17, %c0_18] : memref<128x128xf32, #tpu.memory_space<vmem>>, vector<128x128xf32>
    tpu.vector_store %arg8[%c0_17, %c0_18], %22 {strides = array<i32>} : memref<128x128xf32, #tpu.memory_space<vmem>>, vector<128x128xf32>,
    return
  }
  func.func @transform_0(%arg0: i32) -> (i32, i32) {
    %c0_i32 = arith.constant 0 : i32
    %c0_i32_0 = arith.constant 0 : i32
    return %arg0, %c0_i32 : i32, i32
  }
  func.func @transform_1(%arg0: i32) -> (i32, i32) {
    %c0_i32 = arith.constant 0 : i32
    %c0_i32_0 = arith.constant 0 : i32
    %c0_i32_1 = arith.constant 0 : i32
    return %c0_i32, %c0_i32_0 : i32, i32
  }
  func.func @transform_2(%arg0: i32) -> (i32, i32) {
    %c0_i32 = arith.constant 0 : i32
    %c0_i32_0 = arith.constant 0 : i32
    %c0_i32_1 = arith.constant 0 : i32
    return %c0_i32, %c0_i32_0 : i32, i32
  }
  func.func @transform_3(%arg0: i32) -> (i32, i32) {
    %c0_i32 = arith.constant 0 : i32
    %c0_i32_0 = arith.constant 0 : i32
    %c0_i32_1 = arith.constant 0 : i32
    return %c0_i32, %c0_i32_0 : i32, i32
  }
  func.func @transform_4(%arg0: i32) -> (i32, i32) {
    %c0_i32 = arith.constant 0 : i32
    %c0_i32_0 = arith.constant 0 : i32
    %c0_i32_1 = arith.constant 0 : i32
    return %c0_i32, %c0_i32_0 : i32, i32
  }
  func.func @transform_5(%arg0: i32) -> (i32, i32) {
    %c0_i32 = arith.constant 0 : i32
    %c0_i32_0 = arith.constant 0 : i32
    %c0_i32_1 = arith.constant 0 : i32
    return %c0_i32, %c0_i32_0 : i32, i32
  }
  func.func @transform_6(%arg0: i32) -> (i32, i32) {
    %c0_i32 = arith.constant 0 : i32
    %c0_i32_0 = arith.constant 0 : i32
    %c0_i32_1 = arith.constant 0 : i32
    return %c0_i32, %c0_i32_0 : i32, i32
  }
  func.func @transform_7(%arg0: i32) -> (i32, i32) {
    %c0_i32 = arith.constant 0 : i32
    %c0_i32_0 = arith.constant 0 : i32
    return %arg0, %c0_i32 : i32, i32
  }
}

</mosaic_0001>

<bundles_post_ra>
// kernel: tpu_custom_call.1
= control target key start
LH: loop header
LB: loop body
LE: loop exit
PB: predicated region body
PF: predicated region fallthrough
CT: control target
= control target key end

     0   :  { %12 = vsyncpa [#allocation3], 0  ;;  %s8089_s0 = inlined_call_operand.vmem [shape: f32[256,784], index: 0, kind: input, shape index: {}]   ;;  %s8090_s1 = inlined_call_operand.vmem [shape: bf16[784,512], index: 1, kind: input, shape index: {}]   ;;  %s8091_s2 = inlined_call_operand.vmem [shape: f32[1,512], index: 2, kind: input, shape index: {}]   ;;  %s8092_s3 = inlined_call_operand.vmem [shape: bf16[512,512], index: 3, kind: input, shape index: {}]   ;;  %s8093_s4 = inlined_call_operand.vmem [shape: f32[1,512], index: 4, kind: input, shape index: {}]   ;;  %s8094_s5 = inlined_call_operand.vmem [shape: bf16[512,128], index: 5, kind: input, shape index: {}]   ;;  %s8095_s6 = inlined_call_operand.vmem [shape: f32[1,128], index: 6, kind: input, shape index: {}]   ;;  %s8096_s7 = inlined_call_operand.hbm [shape: f32[256,128], index: 7, kind: output, shape index: {}]  }
   0x1   :  { %14 = vsyncpa [#allocation3 + $0x1], 0  ;;  %s5744_s24 = smov 0   ;;  %s5746_s25 = smov 0  }
   0x2   :  { %s5748_s26 = smov 0   ;;  %s5750_s27 = smov 0  }
   0x3 LB: > { %s5765_s28 = sadd.s32 4294967295, %s5698_s27   ;;  %s4562_s29 = sadd.s32 4294967294, %s5698_s27   ;;  %s5698_s27 = sphi %s5750_s27, %s8157_s27   ;;  %s5694_s26 = sphi %s5748_s26, %s8156_s26   ;;  %s5690_s25 = sphi %s5746_s25, %s8155_s25   ;;  %s5686_s24 = sphi %s5744_s24, %s8154_s24  }
   0x4   : > { %s5769_s30 = sadd.s32 1, %s5698_s27   ;;  %s179_s8 = sadd.s32 1, %s5694_s26 }
   0x5   : > { %s176_s9 = ssub.s32 %s5698_s27, %s5769_s30  ;;  %p189_p0 = scmp.ne.s32.totalorder %s5694_s26, %s5690_s25 }
   0x6   : > { %p177_p1 = scmp.eq.s32.totalorder %s176_s9, 0  ;;  %p190_p2 = scmp.eq.s32.totalorder %s5765_s28, 1 }
   0x7   : > { %p195_p3 = scmp.ne.s32.totalorder %s5690_s25, %s5686_s24  ;;  %p196_p4 = scmp.eq.s32.totalorder %s4562_s29, 1 }
   0x8   : > { %s5780_s10 = scalar_select %p177_p1, %s5694_s26, %s179_s8  }
   0x9   : > { %p5782_p5 = por %p190_p2, %p189_p0  ;;  %p5786_p6 = por %p196_p4, %p195_p3 }
   0xa   : > { %p4565_p7 = scmp.ge.s32.totalorder %s5698_s27, 1  ;;  %p242_p8 = scmp.lt.s32.totalorder %s5698_s27, 3 }
   0xc   : > { %p243_p9 = pnand %p4565_p7, %p242_p8 }
   0xe   : > { %246 = sbr.rel (%p243_p9) target bundleno = 1027 (0x403), region = 48 }
  0x13   : > { %v5119_v0 = vld [vmem:[%s8090_s1 + $0xe4] ss:$16 sps:$4 sm:$0xff]   ;;  %v5123_v2 = vld [vmem:[%s8090_s1 + $0xe0] ss:$16 sps:$4 sm:$0xff]   ;;  %s4567_s15 = sshll.u32 %s5765_s28, 4  ;;  %vm1650_vm0 = vcmask 130048  }
  0x14   : > { %v5121_v1 = vld [vmem:[%s8090_s1 + $0x2e4] ss:$16 sps:$4 sm:$0xff]   ;;  %1675 = vmatprep.subr.bf16.mxu0 %v5119_v0  ;;  %v5124_v3 = vld [vmem:[%s8090_s1 + $0x2e0] ss:$16 sps:$4 sm:$0xff]   ;;  %p276_p10 = scmp.lt.s32.totalorder %s4567_s15, 31  ;;  %s272_s13 = sand.u32 1, %s5690_s25  }
  0x15   : > { %1788 = vmatprep.subr.bf16.mxu1 %v5121_v1  ;;  %v5125_v4 = vld [vmem:[%s8090_s1 + $0xc4] ss:$16 sps:$4 sm:$0xff]   ;;  %1676 = vmatpush1.bf16.msra.mxu0 %v5123_v2  ;;  %v5129_v6 = vld [vmem:[%s8090_s1 + $0xc0] ss:$16 sps:$4 sm:$0xff]   ;;  %s4566_s14 = sshll.u32 %s272_s13, 7  ;;  %s4947_s17 = sshll.u32 %s5765_s28, 11 }
  0x16   : > { %1789 = vmatpush1.bf16.msra.mxu1 %v5124_v3  ;;  %v5127_v5 = vld [vmem:[%s8090_s1 + $0x2c4] ss:$16 sps:$4 sm:$0xff]   ;;  %1677 = vmatprep.subr.bf16.mxu0 %v5125_v4  ;;  %v5130_v7 = vld [vmem:[%s8090_s1 + $0x2c0] ss:$16 sps:$4 sm:$0xff]   ;;  %s8159_s15 = smov (!%p276_p10, %s4567_s15), 31  ;;  %s8005_s16 = scalar_lea.vmem [#allocation2], %s4566_s14 }
  0x17   : > { %1790 = vmatprep.subr.bf16.mxu1 %v5127_v5  ;;  %v5131_v8 = vld [vmem:[%s8090_s1 + $0xa4] ss:$16 sps:$4 sm:$0xff]   ;;  %v5135_v10 = vld [vmem:[%s8090_s1 + $0xa0] ss:$16 sps:$4 sm:$0xff]   ;;  %s5076_s23 = smul.u32 56, %s8159_s15  ;;  %s4500_s18 = sshll.u32 %s8005_s16, 4  ;;  %s8044_s18 = int_to_ptr.vmem [resolvable:$true] %s4500_s18 }
  0x18   : > { %v5133_v9 = vld [vmem:[%s8090_s1 + $0x2a4] ss:$16 sps:$4 sm:$0xff]   ;;  %v5136_v11 = vld [vmem:[%s8090_s1 + $0x2a0] ss:$16 sps:$4 sm:$0xff]   ;;  %s8042_s20 = scalar_lea.hbm %s8096_s7, %s4947_s17  ;;  %s8049_s28 = scalar_lea.sflag [#allocation3], %s272_s13 }
  0x19   : > { %1678 = vmatpush1.bf16.msra.mxu0 %v5129_v6  ;;  %v5137_v12 = vld [vmem:[%s8090_s1 + $0x84] ss:$16 sps:$4 sm:$0xff]   ;;  %v5141_v14 = vld [vmem:[%s8090_s1 + $0x80] ss:$16 sps:$4 sm:$0xff]   ;;  %s5928_s22 = scalar_lea.vmem %s8089_s0, %s5076_s23  ;;  %s5638_s21 = scalar_lea.vmem %s8044_s18, 2048 }
  0x1a   : > { %1791 = vmatpush1.bf16.msra.mxu1 %v5130_v7  ;;  %1679 = vmatprep.subr.bf16.mxu0 %v5131_v8  ;;  %v5139_v13 = vld [vmem:[%s8090_s1 + $0x284] ss:$16 sps:$4 sm:$0xff]   ;;  %v5142_v15 = vld [vmem:[%s8090_s1 + $0x280] ss:$16 sps:$4 sm:$0xff]   ;;  %v285_v46 = vld [vmem:[%s5928_s22 + $0x8] sm:$0xff]  ;;  %p5639_p11 = scmp.ne.s32.totalorder %s8044_s18, %s5638_s21  ;;  %s5701_s29 = smov [#allocation2]  }
  0x1b   : > { %1792 = vmatprep.subr.bf16.mxu1 %v5133_v9  ;;  %v5143_v16 = vld [vmem:[%s8090_s1 + $0x64] ss:$16 sps:$4 sm:$0xff]   ;;  %v5147_v18 = vld [vmem:[%s8090_s1 + $0x60] ss:$16 sps:$4 sm:$0xff]   ;;  %v287_v48 = vld [vmem:[%s5928_s22 + $0x18] sm:$0xff]  ;;  %s5642_s8 = sshll.u32 %s5701_s29, 4  ;;  %s5643_s8 = int_to_ptr.vmem [resolvable:$false] %s5642_s8 }
  0x1c   : > { %v5145_v17 = vld [vmem:[%s8090_s1 + $0x264] ss:$16 sps:$4 sm:$0xff]   ;;  %v5148_v19 = vld [vmem:[%s8090_s1 + $0x260] ss:$16 sps:$4 sm:$0xff]   ;;  %v291_v7 = vld [vmem:[%s5928_s22 + $0x38] sm:$0xff]  ;;  %p5640_p12 = pnand %p5639_p11, %p5782_p5  ;;  %s5644_s9 = scalar_lea.vmem %s5643_s8, 4096 }
  0x1d   : > { %1680 = vmatpush1.bf16.msra.mxu0 %v5135_v10  ;;  %v5149_v20 = vld [vmem:[%s8090_s1 + $0x44] ss:$16 sps:$4 sm:$0xff]   ;;  %v5153_v22 = vld [vmem:[%s8090_s1 + $0x40] ss:$16 sps:$4 sm:$0xff]   ;;  %v293_v9 = vld [vmem:[%s5928_s22 + $0x48] sm:$0xff]  ;;  %p5645_p0 = scmp.lt.s32.totalorder %s8044_s18, %s5643_s8  ;;  %p5646_p1 = scmp.lt.s32.totalorder %s5644_s9, %s5638_s21 }
  0x1e   : > { %1793 = vmatpush1.bf16.msra.mxu1 %v5136_v11  ;;  %1681 = vmatprep.subr.bf16.mxu0 %v5137_v12  ;;  %v5151_v21 = vld [vmem:[%s8090_s1 + $0x244] ss:$16 sps:$4 sm:$0xff]   ;;  %v5154_v23 = vld [vmem:[%s8090_s1 + $0x240] ss:$16 sps:$4 sm:$0xff]   ;;  %p5641_p13 = pneg %p5640_p12 }
  0x1f   : > { %1794 = vmatprep.subr.bf16.mxu1 %v5139_v13  ;;  %v5155_v24 = vld [vmem:[%s8090_s1 + $0x24] ss:$16 sps:$4 sm:$0xff]   ;;  %v5159_v26 = vld [vmem:[%s8090_s1 + $0x20] ss:$16 sps:$4 sm:$0xff]   ;;  %v299_v13 = vld [vmem:[%s5928_s22 + $0x78] sm:$0xff]  ;;  %p5647_p2 = por %p5646_p1, %p5645_p0 }
  0x20   : > { %v5157_v25 = vld [vmem:[%s8090_s1 + $0x224] ss:$16 sps:$4 sm:$0xff]   ;;  %v5160_v27 = vld [vmem:[%s8090_s1 + $0x220] ss:$16 sps:$4 sm:$0xff]  }
  0x21   : > { %1682 = vmatpush1.bf16.msra.mxu0 %v5141_v14  ;;  %v5161_v28 = vld [vmem:[%s8090_s1 + $0x4] ss:$16 sps:$4 sm:$0xff]   ;;  %v5165_v30 = vld [vmem:[%s8090_s1] ss:$16 sps:$4 sm:$0xff]   ;;  %p5648_p3 = pnand %p5647_p2, %p5641_p13 }
  0x22   : > { %1795 = vmatpush1.bf16.msra.mxu1 %v5142_v15  ;;  %1683 = vmatprep.subr.bf16.mxu0 %v5143_v16  ;;  %v5163_v29 = vld [vmem:[%s8090_s1 + $0x204] ss:$16 sps:$4 sm:$0xff]   ;;  %v5166_v31 = vld [vmem:[%s8090_s1 + $0x200] ss:$16 sps:$4 sm:$0xff]  }
  0x23   : > { %1796 = vmatprep.subr.bf16.mxu1 %v5145_v17  ;;  %v5167_v32 = vld [vmem:[%s8090_s1 + $0x1e4] ss:$16 sps:$4 sm:$0xff]   ;;  %v5171_v34 = vld [vmem:[%s8090_s1 + $0x1e0] ss:$16 sps:$4 sm:$0xff]   ;;  %v301_v17 = vld [vmem:[%s5928_s22 + $0x88] sm:$0xff] }
  0x24   : > { %v5169_v33 = vld [vmem:[%s8090_s1 + $0x3e4] ss:$16 sps:$4 sm:$0xff]   ;;  %v5172_v35 = vld [vmem:[%s8090_s1 + $0x3e0] ss:$16 sps:$4 sm:$0xff]  }
  0x25   : > { %1684 = vmatpush1.bf16.msra.mxu0 %v5147_v18  ;;  %v5173_v36 = vld [vmem:[%s8090_s1 + $0x1c4] ss:$16 sps:$4 sm:$0xff]   ;;  %v5177_v38 = vld [vmem:[%s8090_s1 + $0x1c0] ss:$16 sps:$4 sm:$0xff]  }
  0x26   : > { %1797 = vmatpush1.bf16.msra.mxu1 %v5148_v19  ;;  %1685 = vmatprep.subr.bf16.mxu0 %v5149_v20  ;;  %v5175_v37 = vld [vmem:[%s8090_s1 + $0x3c4] ss:$16 sps:$4 sm:$0xff]   ;;  %v5178_v39 = vld [vmem:[%s8090_s1 + $0x3c0] ss:$16 sps:$4 sm:$0xff]  }
  0x27   : > { %1798 = vmatprep.subr.bf16.mxu1 %v5151_v21  ;;  %v5179_v40 = vld [vmem:[%s8090_s1 + $0x1a4] ss:$16 sps:$4 sm:$0xff]   ;;  %v5183_v42 = vld [vmem:[%s8090_s1 + $0x1a0] ss:$16 sps:$4 sm:$0xff]  }
  0x28   : > { %v5181_v41 = vld [vmem:[%s8090_s1 + $0x3a4] ss:$16 sps:$4 sm:$0xff]   ;;  %v5184_v43 = vld [vmem:[%s8090_s1 + $0x3a0] ss:$16 sps:$4 sm:$0xff]  }
  0x29   : > { %1686 = vmatpush1.bf16.msra.mxu0 %v5153_v22  ;;  %v5185_v44 = vld [vmem:[%s8090_s1 + $0x184] ss:$16 sps:$4 sm:$0xff]   ;;  %v5189_v50 = vld [vmem:[%s8090_s1 + $0x180] ss:$16 sps:$4 sm:$0xff]  }
  0x2a   : > { %1799 = vmatpush1.bf16.msra.mxu1 %v5154_v23  ;;  %1687 = vmatprep.subr.bf16.mxu0 %v5155_v24  ;;  %v5187_v45 = vld [vmem:[%s8090_s1 + $0x384] ss:$16 sps:$4 sm:$0xff]   ;;  %v5190_v51 = vld [vmem:[%s8090_s1 + $0x380] ss:$16 sps:$4 sm:$0xff]  }
  0x2b   : > { %1800 = vmatprep.subr.bf16.mxu1 %v5157_v25  ;;  %v292_v47 = vld [vmem:[%s5928_s22 + $0x40] sm:$0xff]  ;;  %v294_v49 = vld [vmem:[%s5928_s22 + $0x50] sm:$0xff]  ;;  %v305_v25 = vld [vmem:[%s5928_s22 + $0xa8] sm:$0xff] }
  0x2c   : > { %v5191_v52 = vld [vmem:[%s8090_s1 + $0x164] ss:$16 sps:$4 sm:$0xff]   ;;  %v5949_v53 = vpack.c.bf16 %v292_v47, %v285_v46  ;;  %v5951_v54 = vpack.c.bf16 %v294_v49, %v287_v48  ;;  %v5195_v56 = vld [vmem:[%s8090_s1 + $0x160] ss:$16 sps:$4 sm:$0xff]   ;;  %v329_v47 = vld [vmem:[%s5928_s22 + $0x168] sm:$0xff] }
  0x2d   : > { %1688 = vmatpush1.bf16.msra.mxu0 %v5159_v26  ;;  %v5193_v55 = vld [vmem:[%s8090_s1 + $0x364] ss:$16 sps:$4 sm:$0xff]   ;;  %v5196_v57 = vld [vmem:[%s8090_s1 + $0x360] ss:$16 sps:$4 sm:$0xff]  }
  0x2e   : > { %1801 = vmatpush1.bf16.msra.mxu1 %v5160_v27  ;;  %1689 = vmatprep.subr.bf16.mxu0 %v5161_v28  ;;  %v5197_v58 = vld [vmem:[%s8090_s1 + $0x144] ss:$16 sps:$4 sm:$0xff]   ;;  %v5201_v60 = vld [vmem:[%s8090_s1 + $0x140] ss:$16 sps:$4 sm:$0xff]   ;;  %v307_v27 = vld [vmem:[%s5928_s22 + $0xb8] sm:$0xff] }
  0x2f   : > { %1802 = vmatprep.subr.bf16.mxu1 %v5163_v29  ;;  %1707 = vmatprep.mubr.bf16.mxu0 %v5949_v53  ;;  %v5199_v59 = vld [vmem:[%s8090_s1 + $0x344] ss:$16 sps:$4 sm:$0xff]   ;;  %v5202_v61 = vld [vmem:[%s8090_s1 + $0x340] ss:$16 sps:$4 sm:$0xff]   ;;  %v313_v29 = vld [vmem:[%s5928_s22 + $0xe8] sm:$0xff] }
  0x30   : > { %1820 = vmatprep.mubr.bf16.mxu1 %v5951_v54  ;;  %v5203_v62 = vld [vmem:[%s8090_s1 + $0x124] ss:$16 sps:$4 sm:$0xff]   ;;  %v5207_v0 = vld [vmem:[%s8090_s1 + $0x120] ss:$16 sps:$4 sm:$0xff]  }
  0x31   : > { %1690 = vmatpush1.bf16.msra.mxu0 %v5165_v30  ;;  %v5205_v63 = vld [vmem:[%s8090_s1 + $0x324] ss:$16 sps:$4 sm:$0xff]   ;;  %v5208_v1 = vld [vmem:[%s8090_s1 + $0x320] ss:$16 sps:$4 sm:$0xff]  }
  0x32   : > { %1803 = vmatpush1.bf16.msra.mxu1 %v5166_v31  ;;  %1691 = vmatprep.subr.bf16.mxu0 %v5167_v32  ;;  %v5209_v2 = vld [vmem:[%s8090_s1 + $0x104] ss:$16 sps:$4 sm:$0xff]   ;;  %v5213_v4 = vld [vmem:[%s8090_s1 + $0x100] ss:$16 sps:$4 sm:$0xff]   ;;  %v315_v31 = vld [vmem:[%s5928_s22 + $0xf8] sm:$0xff] }
  0x33   : > { %1804 = vmatprep.subr.bf16.mxu1 %v5169_v33  ;;  %v5211_v3 = vld [vmem:[%s8090_s1 + $0x304] ss:$16 sps:$4 sm:$0xff]   ;;  %v5214_v5 = vld [vmem:[%s8090_s1 + $0x300] ss:$16 sps:$4 sm:$0xff]  }
  0x34   : > { %v284_v6 = vld [vmem:[%s5928_s22] sm:$0xff]  ;;  %v286_v8 = vld [vmem:[%s5928_s22 + $0x10] sm:$0xff] }
  0x35   : > { %1692 = vmatpush2.bf16.msra.mxu0 %v5171_v34  ;;  %v5217_v10 = vld [vmem:[%s8090_s1 + $0x4e4] ss:$16 sps:$4 sm:$0xff]   ;;  %v5215_v12 = vld [vmem:[%s8090_s1 + $0x4e0] ss:$16 sps:$4 sm:$0xff]   ;;  %v6015_v15 = vpack.c.bf16 %v291_v7, %v284_v6  ;;  %v6017_v16 = vpack.c.bf16 %v293_v9, %v286_v8 }
  0x36   : > { %1805 = vmatpush2.bf16.msra.mxu1 %v5172_v35  ;;  %1693 = vmatprep.subr.bf16.mxu0 %v5173_v36  ;;  %v5220_v11 = vld [vmem:[%s8090_s1 + $0x604] ss:$16 sps:$4 sm:$0xff]   ;;  %v5218_v19 = vld [vmem:[%s8090_s1 + $0x600] ss:$16 sps:$4 sm:$0xff]  }
  0x37   : > { %1806 = vmatprep.subr.bf16.mxu1 %v5175_v37  ;;  %v306_v14 = vld [vmem:[%s5928_s22 + $0xb0] sm:$0xff]  ;;  %v308_v18 = vld [vmem:[%s5928_s22 + $0xc0] sm:$0xff] }
  0x38   : > { %v5223_v20 = vld [vmem:[%s8090_s1 + $0x4c4] ss:$16 sps:$4 sm:$0xff]   ;;  %v6027_v21 = vpack.c.bf16 %v306_v14, %v299_v13  ;;  %v5221_v22 = vld [vmem:[%s8090_s1 + $0x4c0] ss:$16 sps:$4 sm:$0xff]   ;;  %v6032_v23 = vpack.c.bf16 %v308_v18, %v301_v17  ;;  %v5271_v13 = vld [vmem:[%s8090_s1 + $0x2ec] ss:$16 sps:$4 sm:$0xff]  }
  0x39   : > { %1694 = vmatpush2.bf16.msra.mxu0 %v5177_v38  ;;  %v298_v24 = vld [vmem:[%s5928_s22 + $0x70] sm:$0xff]  ;;  %v300_v26 = vld [vmem:[%s5928_s22 + $0x80] sm:$0xff]  ;;  %v349_v14 = vld [vmem:[%s5928_s22 + $0x208] sm:$0xff] }
  0x3a   : > { %1807 = vmatpush2.bf16.msra.mxu1 %v5178_v39  ;;  %1695 = vmatprep.subr.bf16.mxu0 %v5179_v40  ;;  %v5226_v28 = vld [vmem:[%s8090_s1 + $0x4a4] ss:$16 sps:$4 sm:$0xff]   ;;  %v6049_v33 = vpack.c.bf16 %v305_v25, %v298_v24  ;;  %v6051_v34 = vpack.c.bf16 %v307_v27, %v300_v26  ;;  %v5224_v35 = vld [vmem:[%s8090_s1 + $0x4a0] ss:$16 sps:$4 sm:$0xff]   ;;  %v355_v18 = vld [vmem:[%s5928_s22 + $0x238] sm:$0xff] }
  0x3b   : > { %1808 = vmatprep.subr.bf16.mxu1 %v5181_v41  ;;  %v320_v30 = vld [vmem:[%s5928_s22 + $0x120] sm:$0xff]  ;;  %v322_v32 = vld [vmem:[%s5928_s22 + $0x130] sm:$0xff]  ;;  %v319_v41 = vld [vmem:[%s5928_s22 + $0x118] sm:$0xff] }
  0x3c   : > { %v6056_v36 = vpack.c.bf16 %v320_v30, %v313_v29  ;;  %v5229_v37 = vld [vmem:[%s8090_s1 + $0x484] ss:$16 sps:$4 sm:$0xff]   ;;  %v6061_v38 = vpack.c.bf16 %v322_v32, %v315_v31  ;;  %v5227_v39 = vld [vmem:[%s8090_s1 + $0x480] ss:$16 sps:$4 sm:$0xff]   ;;  %v361_v32 = vld [vmem:[%s5928_s22 + $0x268] sm:$0xff] }
  0x3d   : > { %1696 = vmatpush2.bf16.msra.mxu0 %v5183_v42  ;;  %v312_v40 = vld [vmem:[%s5928_s22 + $0xe0] sm:$0xff]  ;;  %v314_v42 = vld [vmem:[%s5928_s22 + $0xf0] sm:$0xff] }
  0x3e   : > { %1809 = vmatpush2.bf16.msra.mxu1 %v5184_v43  ;;  %1697 = vmatprep.subr.bf16.mxu0 %v5185_v44  ;;  %v321_v43 = vld [vmem:[%s5928_s22 + $0x128] sm:$0xff]  ;;  %v5232_v44 = vld [vmem:[%s8090_s1 + $0x464] ss:$16 sps:$4 sm:$0xff]   ;;  %v6081_v49 = vpack.c.bf16 %v319_v41, %v312_v40  ;;  %v5239_v9 = vld [vmem:[%s8090_s1 + $0x400] ss:$16 sps:$4 sm:$0xff]  }
  0x3f   : > { %1810 = vmatprep.subr.bf16.mxu1 %v5187_v45  ;;  %v327_v45 = vld [vmem:[%s5928_s22 + $0x158] sm:$0xff]  ;;  %v334_v46 = vld [vmem:[%s5928_s22 + $0x190] sm:$0xff]  ;;  %v336_v48 = vld [vmem:[%s5928_s22 + $0x1a0] sm:$0xff] }
  0x40   : > { %v5241_v7 = vld [vmem:[%s8090_s1 + $0x404] ss:$16 sps:$4 sm:$0xff]   ;;  %v5242_v26 = vld [vmem:[%s8090_s1 + $0x5e0] ss:$16 sps:$4 sm:$0xff]   ;;  %v369_v40 = vld [vmem:[%s5928_s22 + $0x2a8] sm:$0xff] }
  0x41   : > { %1698 = vmatpush2.bf16.msra.mxu0 %v5189_v50  ;;  %v6083_v50 = vpack.c.bf16 %v321_v43, %v314_v42  ;;  %v5244_v17 = vld [vmem:[%s8090_s1 + $0x5e4] ss:$16 sps:$4 sm:$0xff]   ;;  %v5245_v30 = vld [vmem:[%s8090_s1 + $0x5c0] ss:$16 sps:$4 sm:$0xff]   ;;  %v371_v42 = vld [vmem:[%s5928_s22 + $0x2b8] sm:$0xff] }
  0x42   : > { %1811 = vmatpush2.bf16.msra.mxu1 %v5190_v51  ;;  %1699 = vmatprep.subr.bf16.mxu0 %v5191_v52  ;;  %v5230_v51 = vld [vmem:[%s8090_s1 + $0x460] ss:$16 sps:$4 sm:$0xff]   ;;  %v6088_v52 = vpack.c.bf16 %v334_v46, %v327_v45 }
  0x43   : > { %1812 = vmatprep.subr.bf16.mxu1 %v5193_v55  ;;  %v5235_v55 = vld [vmem:[%s8090_s1 + $0x444] ss:$16 sps:$4 sm:$0xff]   ;;  %v5248_v46 = vld [vmem:[%s8090_s1 + $0x5a0] ss:$16 sps:$4 sm:$0xff]  }
  0x44   : > { %v354_v31 = vld [vmem:[%s5928_s22 + $0x230] sm:$0xff]  ;;  %v376_v41 = vld [vmem:[%s5928_s22 + $0x2e0] sm:$0xff] }
  0x45   : > { %1700 = vmatpush2.bf16.msra.mxu0 %v5195_v56  ;;  %v6093_v56 = vpack.c.bf16 %v336_v48, %v329_v47  ;;  %v378_v43 = vld [vmem:[%s5928_s22 + $0x2f0] sm:$0xff]  ;;  %v6187_v47 = vpack.c.bf16 %v376_v41, %v369_v40  ;;  %v297_v41 = vld [vmem:[%s5928_s22 + $0x68] sm:$0xff] }
  0x46   : > { %1813 = vmatpush2.bf16.msra.mxu1 %v5196_v57  ;;  %1701 = vmatprep.subr.bf16.mxu0 %v5197_v58  ;;  %v5233_v57 = vld [vmem:[%s8090_s1 + $0x440] ss:$16 sps:$4 sm:$0xff]   ;;  %v5253_v48 = vld [vmem:[%s8090_s1 + $0x584] ss:$16 sps:$4 sm:$0xff]  }
  0x47   : > { %1814 = vmatprep.subr.bf16.mxu1 %v5199_v59  ;;  %v326_v58 = vld [vmem:[%s5928_s22 + $0x150] sm:$0xff]  ;;  %v333_v59 = vld [vmem:[%s5928_s22 + $0x188] sm:$0xff] }
  0x48   : > { %v290_v40 = vld [vmem:[%s5928_s22 + $0x30] sm:$0xff] }
  0x49   : > { %1702 = vmatpush2.bf16.msra.mxu0 %v5201_v60  ;;  %v328_v60 = vld [vmem:[%s5928_s22 + $0x160] sm:$0xff] }
  0x4a   : > { %1815 = vmatpush2.bf16.msra.mxu1 %v5202_v61  ;;  %1703 = vmatprep.subr.bf16.mxu0 %v5203_v62  ;;  %v335_v61 = vld [vmem:[%s5928_s22 + $0x198] sm:$0xff]  ;;  %v5238_v62 = vld [vmem:[%s8090_s1 + $0x424] ss:$16 sps:$4 sm:$0xff]  }
  0x4b   : > { %1816 = vmatprep.subr.bf16.mxu1 %v5205_v63  ;;  %v341_v63 = vld [vmem:[%s5928_s22 + $0x1c8] sm:$0xff] }
  0x4d   : > { %1704 = vmatpush2.bf16.msra.mxu0 %v5207_v0  ;;  %v348_v0 = vld [vmem:[%s5928_s22 + $0x200] sm:$0xff] }
  0x4e   : > { %1817 = vmatpush2.bf16.msra.mxu1 %v5208_v1  ;;  %1705 = vmatprep.subr.bf16.mxu0 %v5209_v2  ;;  %v343_v1 = vld [vmem:[%s5928_s22 + $0x1d8] sm:$0xff]  ;;  %v350_v2 = vld [vmem:[%s5928_s22 + $0x210] sm:$0xff]  ;;  %v6120_v6 = vpack.c.bf16 %v348_v0, %v341_v63  ;;  %v385_v0 = vld [vmem:[%s5928_s22 + $0x328] sm:$0xff] }
  0x4f   : > { %1818 = vmatprep.subr.bf16.mxu1 %v5211_v3  ;;  %v6113_v3 = vpack.c.bf16 %v333_v59, %v326_v58  ;;  %v6125_v8 = vpack.c.bf16 %v350_v2, %v343_v1  ;;  %v375_v58 = vld [vmem:[%s5928_s22 + $0x2d8] sm:$0xff]  ;;  %v370_v59 = vld [vmem:[%s5928_s22 + $0x2b0] sm:$0xff]  ;;  %v392_v1 = vld [vmem:[%s5928_s22 + $0x360] sm:$0xff] }
  0x50   : > { %v390_v63 = vld [vmem:[%s5928_s22 + $0x350] sm:$0xff] }
  0x51   : > { %1706 = vmatpush2.bf16.msra.mxu0 %v5213_v4  ;;  %v6115_v4 = vpack.c.bf16 %v335_v61, %v328_v60  ;;  %v377_v60 = vld [vmem:[%s5928_s22 + $0x2e8] sm:$0xff]  ;;  %v5256_v61 = vld [vmem:[%s8090_s1 + $0x564] ss:$16 sps:$4 sm:$0xff]  }
  0x52   : > { %1819 = vmatpush2.bf16.msra.mxu1 %v5214_v5  ;;  %1901 = vmatprep.subr.bf16.mxu0 %v5217_v10  ;;  %v5236_v5 = vld [vmem:[%s8090_s1 + $0x420] ss:$16 sps:$4 sm:$0xff]  }
  0x53   : > { %2028 = vmatprep.subr.bf16.mxu1 %v5220_v11  ;;  %v340_v10 = vld [vmem:[%s5928_s22 + $0x1c0] sm:$0xff]  ;;  %v347_v11 = vld [vmem:[%s5928_s22 + $0x1f8] sm:$0xff] }
  0x54   : > { %1708 = vmatmul.mubr.bf16.vlgmr.msra.gmra.mxu0 %v6015_v15  ;;  %v6148_v24 = vpack.c.bf16 %v347_v11, %v340_v10  ;;  %v5259_v10 = vld [vmem:[%s8090_s1 + $0x544] ss:$16 sps:$4 sm:$0xff]   ;;  %v6224_v11 = vpack.c.bf16 %v392_v1, %v385_v0  ;;  %v5275_v0 = vld [vmem:[%s8090_s1 + $0x2c8] ss:$16 sps:$4 sm:$0xff]  }
  0x55   : > { %1821 = vmatmul.mubr.bf16.vlgmr.msra.gmra.mxu1 %v6017_v16  ;;  %1902 = vmatpush1.bf16.msra.mxu0 %v5215_v12  ;;  %v342_v12 = vld [vmem:[%s5928_s22 + $0x1d0] sm:$0xff] }
  0x56   : > { %2029 = vmatpush1.bf16.msra.mxu1 %v5218_v19  ;;  %1903 = vmatprep.subr.bf16.mxu0 %v5223_v20  ;;  %v362_v19 = vld [vmem:[%s5928_s22 + $0x270] sm:$0xff]  ;;  %v357_v20 = vld [vmem:[%s5928_s22 + $0x248] sm:$0xff]  ;;  %v6150_v25 = vpack.c.bf16 %v349_v14, %v342_v12 }
  0x57   : > { %1717 = vmatprep.mubr.bf16.mxu0 %v6027_v21  ;;  %1830 = vmatprep.mubr.bf16.mxu1 %v6032_v23  ;;  %v6155_v27 = vpack.c.bf16 %v362_v19, %v355_v18  ;;  %v5257_v12 = vld [vmem:[%s8090_s1 + $0x540] ss:$16 sps:$4 sm:$0xff]   ;;  %v389_v14 = vld [vmem:[%s5928_s22 + $0x348] sm:$0xff]  ;;  %v391_v18 = vld [vmem:[%s5928_s22 + $0x358] sm:$0xff] }
  0x58   : > { %2240 = vmatprep.subr.bf16.mxu1 %v5271_v13  ;;  %v382_v13 = vld [vmem:[%s5928_s22 + $0x310] sm:$0xff] }
  0x59   : > { %1904 = vmatpush1.bf16.msra.mxu0 %v5221_v22  ;;  %v364_v22 = vld [vmem:[%s5928_s22 + $0x280] sm:$0xff]  ;;  %v302_v1 = vld [vmem:[%s5928_s22 + $0x90] sm:$0xff] }
  0x5a   : > { %1905 = vmatprep.subr.bf16.mxu0 %v5226_v28  ;;  %v5247_v28 = vld [vmem:[%s8090_s1 + $0x5c4] ss:$16 sps:$4 sm:$0xff]   ;;  %v6160_v29 = vpack.c.bf16 %v364_v22, %v357_v20  ;;  %v289_v20 = vld [vmem:[%s5928_s22 + $0x28] sm:$0xff] }
  0x5b   : > { %v5262_v19 = vld [vmem:[%s8090_s1 + $0x524] ss:$16 sps:$4 sm:$0xff]  }
  0x5c   : > { %1718 = vmatmul.mubr.bf16.gmra.mxu0 %v6049_v33  ;;  %v296_v22 = vld [vmem:[%s5928_s22 + $0x60] sm:$0xff] }
  0x5d   : > { %1831 = vmatmul.mubr.bf16.gmra.mxu1 %v6051_v34  ;;  %1906 = vmatpush1.bf16.msra.mxu0 %v5224_v35  ;;  %v356_v35 = vld [vmem:[%s5928_s22 + $0x240] sm:$0xff] }
  0x5e   : > { %1727 = vmatprep.mubr.bf16.mxu0 %v6056_v36  ;;  %1907 = vmatprep.subr.bf16.mxu0 %v5229_v37  ;;  %v363_v37 = vld [vmem:[%s5928_s22 + $0x278] sm:$0xff] }
  0x5f   : > { %1840 = vmatprep.mubr.bf16.mxu1 %v6061_v38  ;;  %v6182_v45 = vpack.c.bf16 %v363_v37, %v356_v35  ;;  %v5263_v35 = vld [vmem:[%s8090_s1 + $0x500] ss:$16 sps:$4 sm:$0xff]  }
  0x60   : > { %v288_v37 = vld [vmem:[%s5928_s22 + $0x20] sm:$0xff] }
  0x61   : > { %1908 = vmatpush1.bf16.msra.mxu0 %v5227_v39  ;;  %v5250_v39 = vld [vmem:[%s8090_s1 + $0x5a4] ss:$16 sps:$4 sm:$0xff]  }
  0x62   : > { %1909 = vmatprep.subr.bf16.mxu0 %v5232_v44  ;;  %v6180_v44 = vpack.c.bf16 %v361_v32, %v354_v31  ;;  %v6249_v31 = vpack.c.bf16 %v296_v22, %v289_v20  ;;  %v5265_v32 = vld [vmem:[%s8090_s1 + $0x504] ss:$16 sps:$4 sm:$0xff]   ;;  %v5278_v22 = vld [vmem:[%s8090_s1 + $0xa8] ss:$16 sps:$4 sm:$0xff]  }
  0x63   : > { %v324_v20 = vld [vmem:[%s5928_s22 + $0x140] sm:$0xff] }
  0x64   : > { %1728 = vmatmul.mubr.bf16.gmra.mxu0 %v6081_v49 }
  0x65   : > { %1841 = vmatmul.mubr.bf16.gmra.mxu1 %v6083_v50  ;;  %1910 = vmatpush1.bf16.msra.mxu0 %v5230_v51  ;;  %v6192_v51 = vpack.c.bf16 %v378_v43, %v371_v42  ;;  %v8098_v42 = vmov 0   ;;  %v5268_v43 = vld [vmem:[%s8090_s1 + $0xec] ss:$16 sps:$4 sm:$0xff]  }
  0x66   : > { %1737 = vmatprep.mubr.bf16.mxu0 %v6088_v52  ;;  %1911 = vmatprep.subr.bf16.mxu0 %v5235_v55  ;;  %v5251_v55 = vld [vmem:[%s8090_s1 + $0x580] ss:$16 sps:$4 sm:$0xff]  }
  0x67   : > { %1850 = vmatprep.mubr.bf16.mxu1 %v6093_v56 }
  0x69   : > { %1912 = vmatpush1.bf16.msra.mxu0 %v5233_v57  ;;  %v368_v57 = vld [vmem:[%s5928_s22 + $0x2a0] sm:$0xff] }
  0x6a   : > { %1913 = vmatprep.subr.bf16.mxu0 %v5238_v62  ;;  %v383_v62 = vld [vmem:[%s5928_s22 + $0x318] sm:$0xff]  ;;  %v6212_v2 = vpack.c.bf16 %v375_v58, %v368_v57  ;;  %v6276_v57 = vpack.c.bf16 %v297_v41, %v290_v40  ;;  %v316_v41 = vld [vmem:[%s5928_s22 + $0x100] sm:$0xff] }
  0x6b   : > { %v303_v58 = vld [vmem:[%s5928_s22 + $0x98] sm:$0xff] }
  0x6c   : > { %1738 = vmatmul.mubr.bf16.gmra.mxu0 %v6113_v3 }
  0x6d   : > { %1851 = vmatmul.mubr.bf16.gmra.mxu1 %v6115_v4  ;;  %1914 = vmatpush1.bf16.msra.mxu0 %v5236_v5  ;;  %v6214_v5 = vpack.c.bf16 %v377_v60, %v370_v59  ;;  %v310_v59 = vld [vmem:[%s5928_s22 + $0xd0] sm:$0xff]  ;;  %v5274_v60 = vld [vmem:[%s8090_s1 + $0xcc] ss:$16 sps:$4 sm:$0xff]  }
  0x6e   : > { %1747 = vmatprep.mubr.bf16.mxu0 %v6120_v6  ;;  %1915 = vmatprep.subr.bf16.mxu0 %v5241_v7  ;;  %v5254_v7 = vld [vmem:[%s8090_s1 + $0x560] ss:$16 sps:$4 sm:$0xff]  }
  0x6f   : > { %1860 = vmatprep.mubr.bf16.mxu1 %v6125_v8 }
  0x71   : > { %1916 = vmatpush1.bf16.msra.mxu0 %v5239_v9  ;;  %v6219_v9 = vpack.c.bf16 %v390_v63, %v383_v62  ;;  %v5272_v62 = vld [vmem:[%s8090_s1 + $0xc8] ss:$16 sps:$4 sm:$0xff]   ;;  %v6289_v63 = vpack.c.bf16 %v310_v59, %v303_v58  ;;  %v5292_v58 = vld [vmem:[%s8090_s1 + $0x6c] ss:$16 sps:$4 sm:$0xff]  }
  0x72   : > { %1917 = vmatprep.subr.bf16.mxu0 %v5244_v17  ;;  %v384_v17 = vld [vmem:[%s5928_s22 + $0x320] sm:$0xff]  ;;  %v5295_v59 = vld [vmem:[%s8090_s1 + $0x26c] ss:$16 sps:$4 sm:$0xff]  }
  0x74   : > { %1748 = vmatmul.mubr.bf16.gmra.mxu0 %v6148_v24 }
  0x75   : > { %1861 = vmatmul.mubr.bf16.gmra.mxu1 %v6150_v25  ;;  %1918 = vmatpush2.bf16.msra.mxu0 %v5242_v26  ;;  %v6242_v26 = vpack.c.bf16 %v389_v14, %v382_v13  ;;  %v5280_v13 = vld [vmem:[%s8090_s1 + $0xac] ss:$16 sps:$4 sm:$0xff]  }
  0x76   : > { %1757 = vmatprep.mubr.bf16.mxu0 %v6155_v27  ;;  %1919 = vmatprep.subr.bf16.mxu0 %v5247_v28  ;;  %v6244_v28 = vpack.c.bf16 %v391_v18, %v384_v17  ;;  %v5283_v14 = vld [vmem:[%s8090_s1 + $0x2ac] ss:$16 sps:$4 sm:$0xff]  }
  0x77   : > { %1870 = vmatprep.mubr.bf16.mxu1 %v6160_v29  ;;  %v317_v17 = vld [vmem:[%s5928_s22 + $0x108] sm:$0xff] }
  0x78   : > { %v6333_v40 = vpack.c.bf16 %v324_v20, %v317_v17  ;;  %v330_v20 = vld [vmem:[%s5928_s22 + $0x170] sm:$0xff] }
  0x79   : > { %1920 = vmatpush2.bf16.msra.mxu0 %v5245_v30  ;;  %v5260_v30 = vld [vmem:[%s8090_s1 + $0x520] ss:$16 sps:$4 sm:$0xff]  }
  0x7a   : > { %1921 = vmatprep.subr.bf16.mxu0 %v5250_v39  ;;  %v295_v39 = vld [vmem:[%s5928_s22 + $0x58] sm:$0xff] }
  0x7c   : > { %1758 = vmatmul.mubr.bf16.gmra.mxu0 %v6180_v44 }
  0x7d   : > { %1871 = vmatmul.mubr.bf16.gmra.mxu1 %v6182_v45  ;;  %1922 = vmatpush2.bf16.msra.mxu0 %v5248_v46  ;;  %v5266_v46 = vld [vmem:[%s8090_s1 + $0xe8] ss:$16 sps:$4 sm:$0xff]  }
  0x7e   : > { %1767 = vmatprep.mubr.bf16.mxu0 %v6187_v47  ;;  %1923 = vmatprep.subr.bf16.mxu0 %v5253_v48  ;;  %v5269_v48 = vld [vmem:[%s8090_s1 + $0x2e8] ss:$16 sps:$4 sm:$0xff]  }
  0x7f   : > { %1880 = vmatprep.mubr.bf16.mxu1 %v6192_v51 }
  0x81   : > { %1924 = vmatpush2.bf16.msra.mxu0 %v5251_v55  ;;  %v6274_v55 = vpack.c.bf16 %v295_v39, %v288_v37  ;;  %v5284_v37 = vld [vmem:[%s8090_s1 + $0x88] ss:$16 sps:$4 sm:$0xff]  }
  0x82   : > { %1925 = vmatprep.subr.bf16.mxu0 %v5256_v61  ;;  %v5277_v61 = vld [vmem:[%s8090_s1 + $0x2cc] ss:$16 sps:$4 sm:$0xff]   ;;  %v5287_v39 = vld [vmem:[%s8090_s1 + $0x288] ss:$16 sps:$4 sm:$0xff]  }
  0x84   : > { %1768 = vmatmul.mubr.bf16.gmra.mxu0 %v6212_v2 }
  0x85   : > { %1881 = vmatmul.mubr.bf16.gmra.mxu1 %v6214_v5  ;;  %1926 = vmatpush2.bf16.msra.mxu0 %v5254_v7  ;;  %v309_v7 = vld [vmem:[%s5928_s22 + $0xc8] sm:$0xff] }
  0x86   : > { %1777 = vmatprep.mubr.bf16.mxu0 %v6219_v9  ;;  %1927 = vmatprep.subr.bf16.mxu0 %v5259_v10  ;;  %v304_v10 = vld [vmem:[%s5928_s22 + $0xa0] sm:$0xff]  ;;  %v6310_v18 = vpack.c.bf16 %v309_v7, %v302_v1  ;;  %v331_v1 = vld [vmem:[%s5928_s22 + $0x178] sm:$0xff]  ;;  %v338_v7 = vld [vmem:[%s5928_s22 + $0x1b0] sm:$0xff] }
  0x87   : > { %1890 = vmatprep.mubr.bf16.mxu1 %v6224_v11  ;;  %v6374_v17 = vpack.c.bf16 %v338_v7, %v331_v1  ;;  %v5311_v1 = vld [vmem:[%s8090_s1 + $0x208] ss:$16 sps:$4 sm:$0xff]  }
  0x89   : > { %1928 = vmatpush2.bf16.msra.mxu0 %v5257_v12  ;;  %v311_v12 = vld [vmem:[%s5928_s22 + $0xd8] sm:$0xff] }
  0x8a   : > { %1929 = vmatprep.subr.bf16.mxu0 %v5262_v19  ;;  %v6312_v19 = vpack.c.bf16 %v311_v12, %v304_v10  ;;  %v5298_v10 = vld [vmem:[%s8090_s1 + $0x4c] ss:$16 sps:$4 sm:$0xff]  }
  0x8b   : > { %v5301_v12 = vld [vmem:[%s8090_s1 + $0x24c] ss:$16 sps:$4 sm:$0xff]  }
  0x8c   : > { %1778 = vmatmul.mubr.bf16.gmra.mxu0 %v6242_v26 }
  0x8d   : > { %1891 = vmatmul.mubr.bf16.gmra.mxu1 %v6244_v28  ;;  %1930 = vmatpush2.bf16.msra.mxu0 %v5260_v30  ;;  %v5281_v30 = vld [vmem:[%s8090_s1 + $0x2a8] ss:$16 sps:$4 sm:$0xff]  }
  0x8e   : > { %1933 = vmatprep.mubr.bf16.mxu0 %v6249_v31  ;;  %1931 = vmatprep.subr.bf16.mxu0 %v5265_v32  ;;  %v5286_v32 = vld [vmem:[%s8090_s1 + $0x8c] ss:$16 sps:$4 sm:$0xff]  }
  0x8f   : > { %2046 = vmatprep.mubr.bf16.mxu1 %v8098_v42 }
  0x91   : > { %1932 = vmatpush2.bf16.msra.mxu0 %v5263_v35  ;;  %v5289_v35 = vld [vmem:[%s8090_s1 + $0x28c] ss:$16 sps:$4 sm:$0xff]  }
  0x92   : > { %2127 = vmatprep.subr.bf16.mxu0 %v5268_v43  ;;  %v323_v43 = vld [vmem:[%s5928_s22 + $0x138] sm:$0xff] }
  0x94   : > { %1934 = vmatmul.mubr.bf16.vlgmr.msra.gmra.mxu0 %v6274_v55 }
  0x95   : > { %4765 = vmatmul.mubr.msk.bf16.vlgmr.msra.gmra.mxu1 %vm1650_vm0, %v6276_v57  ;;  %2128 = vmatpush1.bf16.msra.mxu0 %v5266_v46  ;;  %v318_v46 = vld [vmem:[%s5928_s22 + $0x110] sm:$0xff] }
  0x96   : > { %2241 = vmatpush1.bf16.msra.mxu1 %v5269_v48  ;;  %2129 = vmatprep.subr.bf16.mxu0 %v5274_v60  ;;  %v325_v48 = vld [vmem:[%s5928_s22 + $0x148] sm:$0xff] }
  0x97   : > { %2242 = vmatprep.subr.bf16.mxu1 %v5277_v61  ;;  %1943 = vmatprep.mubr.bf16.mxu0 %v6289_v63  ;;  %v5290_v60 = vld [vmem:[%s8090_s1 + $0x68] ss:$16 sps:$4 sm:$0xff]  }
  0x98   : > { %2056 = vmatprep.mubr.bf16.mxu1 %v8098_v42  ;;  %v5293_v61 = vld [vmem:[%s8090_s1 + $0x268] ss:$16 sps:$4 sm:$0xff]  }
  0x99   : > { %2130 = vmatpush1.bf16.msra.mxu0 %v5272_v62  ;;  %v6356_v62 = vpack.c.bf16 %v323_v43, %v316_v41  ;;  %v5305_v41 = vld [vmem:[%s8090_s1 + $0x228] ss:$16 sps:$4 sm:$0xff]  }
  0x9a   : > { %2243 = vmatpush1.bf16.msra.mxu1 %v5275_v0  ;;  %2131 = vmatprep.subr.bf16.mxu0 %v5280_v13  ;;  %v6358_v0 = vpack.c.bf16 %v325_v48, %v318_v46  ;;  %v5296_v13 = vld [vmem:[%s8090_s1 + $0x48] ss:$16 sps:$4 sm:$0xff]  }
  0x9b   : > { %2244 = vmatprep.subr.bf16.mxu1 %v5283_v14  ;;  %v5299_v14 = vld [vmem:[%s8090_s1 + $0x248] ss:$16 sps:$4 sm:$0xff]  }
  0x9c   : > { %1944 = vmatmul.mubr.bf16.gmra.mxu0 %v6310_v18  ;;  %v345_v48 = vld [vmem:[%s5928_s22 + $0x1e8] sm:$0xff] }
  0x9d   : > { %4766 = vmatmul.mubr.msk.bf16.gmra.mxu1 %vm1650_vm0, %v6312_v19  ;;  %2132 = vmatpush1.bf16.msra.mxu0 %v5278_v22  ;;  %v337_v22 = vld [vmem:[%s5928_s22 + $0x1a8] sm:$0xff] }
  0x9e   : > { %2245 = vmatpush1.bf16.msra.mxu1 %v5281_v30  ;;  %2133 = vmatprep.subr.bf16.mxu0 %v5286_v32  ;;  %v332_v30 = vld [vmem:[%s5928_s22 + $0x180] sm:$0xff]  ;;  %v339_v32 = vld [vmem:[%s5928_s22 + $0x1b8] sm:$0xff]  ;;  %v6397_v43 = vpack.c.bf16 %v337_v22, %v330_v20 }
  0x9f   : > { %2246 = vmatprep.subr.bf16.mxu1 %v5289_v35  ;;  %1953 = vmatprep.mubr.bf16.mxu0 %v6333_v40  ;;  %v5304_v35 = vld [vmem:[%s8090_s1 + $0x2c] ss:$16 sps:$4 sm:$0xff]   ;;  %v6399_v46 = vpack.c.bf16 %v339_v32, %v332_v30  ;;  %v5314_v30 = vld [vmem:[%s8090_s1 + $0x1e8] ss:$16 sps:$4 sm:$0xff]  }
  0xa0   : > { %2066 = vmatprep.mubr.bf16.mxu1 %v8098_v42  ;;  %v5316_v20 = vld [vmem:[%s8090_s1 + $0x1ec] ss:$16 sps:$4 sm:$0xff]   ;;  %v5317_v32 = vld [vmem:[%s8090_s1 + $0x3e8] ss:$16 sps:$4 sm:$0xff]  }
  0xa1   : > { %2134 = vmatpush1.bf16.msra.mxu0 %v5284_v37  ;;  %v5307_v37 = vld [vmem:[%s8090_s1 + $0x22c] ss:$16 sps:$4 sm:$0xff]  }
  0xa2   : > { %2247 = vmatpush1.bf16.msra.mxu1 %v5287_v39  ;;  %2135 = vmatprep.subr.bf16.mxu0 %v5292_v58  ;;  %v5302_v39 = vld [vmem:[%s8090_s1 + $0x28] ss:$16 sps:$4 sm:$0xff]   ;;  %v352_v58 = vld [vmem:[%s5928_s22 + $0x220] sm:$0xff]  ;;  %v5319_v22 = vld [vmem:[%s8090_s1 + $0x3ec] ss:$16 sps:$4 sm:$0xff]  }
  0xa3   : > { %2248 = vmatprep.subr.bf16.mxu1 %v5295_v59  ;;  %v5310_v59 = vld [vmem:[%s8090_s1 + $0xc] ss:$16 sps:$4 sm:$0xff]   ;;  %v6415_v7 = vpack.c.bf16 %v352_v58, %v345_v48 }
  0xa4   : > { %1954 = vmatmul.mubr.bf16.gmra.mxu0 %v6356_v62  ;;  %v5322_v48 = vld [vmem:[%s8090_s1 + $0x1cc] ss:$16 sps:$4 sm:$0xff]  }
  0xa5   : > { %4767 = vmatmul.mubr.msk.bf16.gmra.mxu1 %vm1650_vm0, %v6358_v0  ;;  %2136 = vmatpush1.bf16.msra.mxu0 %v5290_v60  ;;  %v5313_v60 = vld [vmem:[%s8090_s1 + $0x20c] ss:$16 sps:$4 sm:$0xff]  }
  0xa6   : > { %2249 = vmatpush1.bf16.msra.mxu1 %v5293_v61  ;;  %2137 = vmatprep.subr.bf16.mxu0 %v5298_v10  ;;  %v5308_v61 = vld [vmem:[%s8090_s1 + $0x8] ss:$16 sps:$4 sm:$0xff]   ;;  %v344_v10 = vld [vmem:[%s5928_s22 + $0x1e0] sm:$0xff]  ;;  %v5325_v58 = vld [vmem:[%s8090_s1 + $0x3cc] ss:$16 sps:$4 sm:$0xff]  }
  0xa7   : > { %2250 = vmatprep.subr.bf16.mxu1 %v5301_v12  ;;  %1963 = vmatprep.mubr.bf16.mxu0 %v6374_v17  ;;  %v351_v12 = vld [vmem:[%s5928_s22 + $0x218] sm:$0xff] }
  0xa8   : > { %2076 = vmatprep.mubr.bf16.mxu1 %v8098_v42 }
  0xa9   : > { %2138 = vmatpush1.bf16.msra.mxu0 %v5296_v13  ;;  %v346_v13 = vld [vmem:[%s5928_s22 + $0x1f0] sm:$0xff] }
  0xaa   : > { %2251 = vmatpush1.bf16.msra.mxu1 %v5299_v14  ;;  %2139 = vmatprep.subr.bf16.mxu0 %v5304_v35  ;;  %v353_v14 = vld [vmem:[%s5928_s22 + $0x228] sm:$0xff]  ;;  %v6438_v35 = vpack.c.bf16 %v351_v12, %v344_v10  ;;  %v360_v12 = vld [vmem:[%s5928_s22 + $0x260] sm:$0xff] }
  0xab   : > { %2252 = vmatprep.subr.bf16.mxu1 %v5307_v37  ;;  %v6440_v37 = vpack.c.bf16 %v353_v14, %v346_v13  ;;  %v365_v10 = vld [vmem:[%s5928_s22 + $0x288] sm:$0xff]  ;;  %v367_v13 = vld [vmem:[%s5928_s22 + $0x298] sm:$0xff] }
  0xac   : > { %1964 = vmatmul.mubr.bf16.gmra.mxu0 %v6397_v43  ;;  %v5328_v14 = vld [vmem:[%s8090_s1 + $0x1ac] ss:$16 sps:$4 sm:$0xff]  }
  0xad   : > { %4768 = vmatmul.mubr.msk.bf16.gmra.mxu1 %vm1650_vm0, %v6399_v46  ;;  %2140 = vmatpush1.bf16.msra.mxu0 %v5302_v39  ;;  %v359_v39 = vld [vmem:[%s5928_s22 + $0x258] sm:$0xff] }
  0xae   : > { %2253 = vmatpush1.bf16.msra.mxu1 %v5305_v41  ;;  %2141 = vmatprep.subr.bf16.mxu0 %v5310_v59  ;;  %v366_v41 = vld [vmem:[%s5928_s22 + $0x290] sm:$0xff]  ;;  %v5320_v59 = vld [vmem:[%s8090_s1 + $0x1c8] ss:$16 sps:$4 sm:$0xff]  }
  0xaf   : > { %2254 = vmatprep.subr.bf16.mxu1 %v5313_v60  ;;  %1973 = vmatprep.mubr.bf16.mxu0 %v6415_v7  ;;  %v5323_v60 = vld [vmem:[%s8090_s1 + $0x3c8] ss:$16 sps:$4 sm:$0xff]  }
  0xb0   : > { %2086 = vmatprep.mubr.bf16.mxu1 %v8098_v42 }
  0xb1   : > { %2142 = vmatpush1.bf16.msra.mxu0 %v5308_v61  ;;  %v6456_v61 = vpack.c.bf16 %v366_v41, %v359_v39  ;;  %v373_v39 = vld [vmem:[%s5928_s22 + $0x2c8] sm:$0xff]  ;;  %v380_v41 = vld [vmem:[%s5928_s22 + $0x300] sm:$0xff] }
  0xb2   : > { %2255 = vmatpush1.bf16.msra.mxu1 %v5311_v1  ;;  %2143 = vmatprep.subr.bf16.mxu0 %v5316_v20  ;;  %v358_v1 = vld [vmem:[%s5928_s22 + $0x250] sm:$0xff]  ;;  %v5331_v20 = vld [vmem:[%s8090_s1 + $0x3ac] ss:$16 sps:$4 sm:$0xff]  }
  0xb3   : > { %2256 = vmatprep.subr.bf16.mxu1 %v5319_v22  ;;  %v5326_v22 = vld [vmem:[%s8090_s1 + $0x1a8] ss:$16 sps:$4 sm:$0xff]  }
  0xb4   : > { %1974 = vmatmul.mubr.bf16.gmra.mxu0 %v6438_v35 }
  0xb5   : > { %4769 = vmatmul.mubr.msk.bf16.gmra.mxu1 %vm1650_vm0, %v6440_v37  ;;  %2144 = vmatpush2.bf16.msra.mxu0 %v5314_v30  ;;  %v6476_v30 = vpack.c.bf16 %v365_v10, %v358_v1  ;;  %v5337_v1 = vld [vmem:[%s8090_s1 + $0x38c] ss:$16 sps:$4 sm:$0xff]   ;;  %v6497_v10 = vpack.c.bf16 %v380_v41, %v373_v39 }
  0xb6   : > { %2257 = vmatpush2.bf16.msra.mxu1 %v5317_v32  ;;  %2145 = vmatprep.subr.bf16.mxu0 %v5322_v48  ;;  %v6478_v32 = vpack.c.bf16 %v367_v13, %v360_v12  ;;  %v5329_v48 = vld [vmem:[%s8090_s1 + $0x3a8] ss:$16 sps:$4 sm:$0xff]   ;;  %v372_v12 = vld [vmem:[%s5928_s22 + $0x2c0] sm:$0xff]  ;;  %v5340_v39 = vld [vmem:[%s8090_s1 + $0x16c] ss:$16 sps:$4 sm:$0xff]  }
  0xb7   : > { %2258 = vmatprep.subr.bf16.mxu1 %v5325_v58  ;;  %1983 = vmatprep.mubr.bf16.mxu0 %v6456_v61  ;;  %8114 = vst [vmem:[#allocation5_spill] sm:$0xff] %v6476_v30  ;;  %v5334_v58 = vld [vmem:[%s8090_s1 + $0x18c] ss:$16 sps:$4 sm:$0xff]   ;;  %8116 = vst [vmem:[#allocation7_spill] sm:$0xff] %v6497_v10 }
  0xb8   : > { %2096 = vmatprep.mubr.bf16.mxu1 %v8098_v42  ;;  %8115 = vst [vmem:[#allocation6_spill] sm:$0xff] %v6478_v32  ;;  %v379_v13 = vld [vmem:[%s5928_s22 + $0x2f8] sm:$0xff] }
  0xb9   : > { %2146 = vmatpush2.bf16.msra.mxu0 %v5320_v59  ;;  %v5332_v59 = vld [vmem:[%s8090_s1 + $0x188] ss:$16 sps:$4 sm:$0xff]   ;;  %v5343_v41 = vld [vmem:[%s8090_s1 + $0x36c] ss:$16 sps:$4 sm:$0xff]  }
  0xba   : > { %2259 = vmatpush2.bf16.msra.mxu1 %v5323_v60  ;;  %2147 = vmatprep.subr.bf16.mxu0 %v5328_v14  ;;  %v5335_v60 = vld [vmem:[%s8090_s1 + $0x388] ss:$16 sps:$4 sm:$0xff]   ;;  %v374_v14 = vld [vmem:[%s5928_s22 + $0x2d0] sm:$0xff] }
  0xbb   : > { %2260 = vmatprep.subr.bf16.mxu1 %v5331_v20  ;;  %v381_v20 = vld [vmem:[%s5928_s22 + $0x308] sm:$0xff] }
  0xbc   : > { %1984 = vmatmul.mubr.bf16.gmra.mxu0 %v6476_v30  ;;  %v5352_v30 = vld [vmem:[%s8090_s1 + $0x12c] ss:$16 sps:$4 sm:$0xff]  }
  0xbd   : > { %4770 = vmatmul.mubr.msk.bf16.gmra.mxu1 %vm1650_vm0, %v6478_v32  ;;  %2148 = vmatpush2.bf16.msra.mxu0 %v5326_v22  ;;  %v5338_v22 = vld [vmem:[%s8090_s1 + $0x168] ss:$16 sps:$4 sm:$0xff]   ;;  %v394_v32 = vld [vmem:[%s5928_s22 + $0x370] sm:$0xff] }
  0xbe   : > { %2261 = vmatpush2.bf16.msra.mxu1 %v5329_v48  ;;  %2149 = vmatprep.subr.bf16.mxu0 %v5334_v58  ;;  %v387_v48 = vld [vmem:[%s5928_s22 + $0x338] sm:$0xff]  ;;  %v6518_v58 = vpack.c.bf16 %v379_v13, %v372_v12 }
  0xbf   : > { %2262 = vmatprep.subr.bf16.mxu1 %v5337_v1  ;;  %1993 = vmatprep.mubr.bf16.mxu0 %v6497_v10  ;;  %v6520_v1 = vpack.c.bf16 %v381_v20, %v374_v14  ;;  %v5346_v10 = vld [vmem:[%s8090_s1 + $0x14c] ss:$16 sps:$4 sm:$0xff]   ;;  %v5344_v13 = vld [vmem:[%s8090_s1 + $0x148] ss:$16 sps:$4 sm:$0xff]   ;;  %v386_v14 = vld [vmem:[%s5928_s22 + $0x330] sm:$0xff] }
  0xc0   : > { %2106 = vmatprep.mubr.bf16.mxu1 %v8098_v42  ;;  %8117 = vst [vmem:[#allocation8_spill] sm:$0xff] %v6518_v58  ;;  %v5341_v42 = vld [vmem:[%s8090_s1 + $0x368] ss:$16 sps:$4 sm:$0xff]   ;;  %v5349_v12 = vld [vmem:[%s8090_s1 + $0x34c] ss:$16 sps:$4 sm:$0xff]  }
  0xc1   : > { %8118 = vst [vmem:[#allocation9_spill] sm:$0xff] %v6520_v1  ;;  %2150 = vmatpush2.bf16.msra.mxu0 %v5332_v59  ;;  %v5347_v59 = vld [vmem:[%s8090_s1 + $0x348] ss:$16 sps:$4 sm:$0xff]  }
  0xc2   : > { %2263 = vmatpush2.bf16.msra.mxu1 %v5335_v60  ;;  %2151 = vmatprep.subr.bf16.mxu0 %v5340_v39  ;;  %v6538_v60 = vpack.c.bf16 %v394_v32, %v387_v48  ;;  %v393_v20 = vld [vmem:[%s5928_s22 + $0x368] sm:$0xff]  ;;  %v388_v39 = vld [vmem:[%s5928_s22 + $0x340] sm:$0xff]  ;;  %v8120_v48 = vmov 0  }
  0xc3   : > { %2264 = vmatprep.subr.bf16.mxu1 %v5343_v41  ;;  %v395_v41 = vld [vmem:[%s5928_s22 + $0x378] sm:$0xff] }
  0xc4   : > { %8119 = vst [vmem:[#allocation10_spill] sm:$0xff] %v6538_v60  ;;  %1994 = vmatmul.mubr.bf16.gmra.mxu0 %v6518_v58  ;;  %v5355_v32 = vld [vmem:[%s8090_s1 + $0x32c] ss:$16 sps:$4 sm:$0xff]   ;;  %v5356_v58 = vld [vmem:[%s8090_s1 + $0x108] ss:$16 sps:$4 sm:$0xff]  }
  0xc5   : > { %4771 = vmatmul.mubr.msk.bf16.gmra.mxu1 %vm1650_vm0, %v6520_v1  ;;  %2152 = vmatpush2.bf16.msra.mxu0 %v5338_v22  ;;  %v5350_v1 = vld [vmem:[%s8090_s1 + $0x128] ss:$16 sps:$4 sm:$0xff]   ;;  %v6561_v22 = vpack.c.bf16 %v393_v20, %v386_v14 }
  0xc6   : > { %2265 = vmatpush2.bf16.msra.mxu1 %v5341_v42  ;;  %2153 = vmatprep.subr.bf16.mxu0 %v5346_v10  ;;  %v5353_v42 = vld [vmem:[%s8090_s1 + $0x328] ss:$16 sps:$4 sm:$0xff]   ;;  %v6563_v10 = vpack.c.bf16 %v395_v41, %v388_v39 }
  0xc7   : > { %2266 = vmatprep.subr.bf16.mxu1 %v5349_v12  ;;  %2003 = vmatprep.mubr.bf16.mxu0 %v6538_v60  ;;  %v5358_v12 = vld [vmem:[%s8090_s1 + $0x10c] ss:$16 sps:$4 sm:$0xff]   ;;  %v5359_v14 = vld [vmem:[%s8090_s1 + $0x308] ss:$16 sps:$4 sm:$0xff]  }
  0xc8   : > { %2116 = vmatprep.mubr.bf16.mxu1 %v8120_v48  ;;  %v5361_v60 = vld [vmem:[%s8090_s1 + $0x30c] ss:$16 sps:$4 sm:$0xff]   ;;  %v5365_v20 = vld [vmem:[%s8090_s1 + $0x608] ss:$16 sps:$4 sm:$0xff]  }
  0xc9   : > { %2154 = vmatpush2.bf16.msra.mxu0 %v5344_v13  ;;  %v5367_v13 = vld [vmem:[%s8090_s1 + $0x60c] ss:$16 sps:$4 sm:$0xff]  }
  0xca   : > { %2267 = vmatpush2.bf16.msra.mxu1 %v5347_v59  ;;  %2155 = vmatprep.subr.bf16.mxu0 %v5352_v30  ;;  %v5364_v30 = vld [vmem:[%s8090_s1 + $0x4ec] ss:$16 sps:$4 sm:$0xff]   ;;  %v5362_v59 = vld [vmem:[%s8090_s1 + $0x4e8] ss:$16 sps:$4 sm:$0xff]  }
  0xcb   : > { %2268 = vmatprep.subr.bf16.mxu1 %v5355_v32 }
  0xcc   : > { %2004 = vmatmul.mubr.bf16.gmra.mxu0 %v6561_v22 }
  0xcd   : > { %4772 = vmatmul.mubr.msk.bf16.gmra.mxu1 %vm1650_vm0, %v6563_v10  ;;  %2156 = vmatpush2.bf16.msra.mxu0 %v5350_v1  ;;  %v5370_v1 = vld [vmem:[%s8090_s1 + $0x4cc] ss:$16 sps:$4 sm:$0xff]  }
  0xce   : > { %2269 = vmatpush2.bf16.msra.mxu1 %v5353_v42  ;;  %2157 = vmatprep.subr.bf16.mxu0 %v5358_v12  ;;  %v5418_v42 = vld [vmem:[%s8092_s3 + $0xc4] ss:$16 sps:$4 sm:$0xff]  }
  0xcf   : > { %2270 = vmatprep.subr.bf16.mxu1 %v5361_v60  ;;  %2159 = vmatprep.mubr.bf16.mxu0 %v5949_v53  ;;  %v5368_v53 = vld [vmem:[%s8090_s1 + $0x4c8] ss:$16 sps:$4 sm:$0xff]  }
  0xd0   : > { %2272 = vmatprep.mubr.bf16.mxu1 %v5951_v54  ;;  %v5373_v54 = vld [vmem:[%s8090_s1 + $0x4ac] ss:$16 sps:$4 sm:$0xff]   ;;  %v5389_v60 = vld [vmem:[%s8090_s1 + $0x5e8] ss:$16 sps:$4 sm:$0xff]  }
  0xd1   : > { %2158 = vmatpush2.bf16.msra.mxu0 %v5356_v58  ;;  %v5371_v58 = vld [vmem:[%s8090_s1 + $0x4a8] ss:$16 sps:$4 sm:$0xff]  }
  0xd2   : > { %2271 = vmatpush2.bf16.msra.mxu1 %v5359_v14  ;;  %2353 = vmatprep.subr.bf16.mxu0 %v5364_v30 }
  0xd3   : > { %2480 = vmatprep.subr.bf16.mxu1 %v5367_v13 }
  0xd4   : > { %2160 = vmatmul.mubr.bf16.vlgmr.msra.gmra.mxu0 %v6015_v15  ;;  %v5376_v15 = vld [vmem:[%s8090_s1 + $0x48c] ss:$16 sps:$4 sm:$0xff]  }
  0xd5   : > { %2273 = vmatmul.mubr.bf16.vlgmr.msra.gmra.mxu1 %v6017_v16  ;;  %2354 = vmatpush1.bf16.msra.mxu0 %v5362_v59  ;;  %v5374_v16 = vld [vmem:[%s8090_s1 + $0x488] ss:$16 sps:$4 sm:$0xff]  }
  0xd6   : > { %2481 = vmatpush1.bf16.msra.mxu1 %v5365_v20  ;;  %2355 = vmatprep.subr.bf16.mxu0 %v5370_v1  ;;  %v5416_v20 = vld [vmem:[%s8092_s3 + $0xc0] ss:$16 sps:$4 sm:$0xff]  }
  0xd7   : > { %2169 = vmatprep.mubr.bf16.mxu0 %v6027_v21  ;;  %2282 = vmatprep.mubr.bf16.mxu1 %v6032_v23  ;;  %v5379_v21 = vld [vmem:[%s8090_s1 + $0x46c] ss:$16 sps:$4 sm:$0xff]   ;;  %v5377_v23 = vld [vmem:[%s8090_s1 + $0x468] ss:$16 sps:$4 sm:$0xff]  }
  0xd9   : > { %2356 = vmatpush1.bf16.msra.mxu0 %v5368_v53 }
  0xda   : > { %2357 = vmatprep.subr.bf16.mxu0 %v5373_v54 }
  0xdc   : > { %2170 = vmatmul.mubr.bf16.gmra.mxu0 %v6049_v33  ;;  %v5382_v33 = vld [vmem:[%s8090_s1 + $0x44c] ss:$16 sps:$4 sm:$0xff]  }
  0xdd   : > { %2283 = vmatmul.mubr.bf16.gmra.mxu1 %v6051_v34  ;;  %2358 = vmatpush1.bf16.msra.mxu0 %v5371_v58  ;;  %v5380_v34 = vld [vmem:[%s8090_s1 + $0x448] ss:$16 sps:$4 sm:$0xff]  }
  0xde   : > { %2179 = vmatprep.mubr.bf16.mxu0 %v6056_v36  ;;  %2359 = vmatprep.subr.bf16.mxu0 %v5376_v15  ;;  %v5385_v36 = vld [vmem:[%s8090_s1 + $0x42c] ss:$16 sps:$4 sm:$0xff]  }
  0xdf   : > { %2292 = vmatprep.mubr.bf16.mxu1 %v6061_v38  ;;  %v5383_v38 = vld [vmem:[%s8090_s1 + $0x428] ss:$16 sps:$4 sm:$0xff]  }
  0xe1   : > { %2360 = vmatpush1.bf16.msra.mxu0 %v5374_v16  ;;  %v5419_v16 = vld [vmem:[%s8092_s3 + $0xa0] ss:$16 sps:$4 sm:$0xff]  }
  0xe2   : > { %2361 = vmatprep.subr.bf16.mxu0 %v5379_v21  ;;  %v5424_v21 = vld [vmem:[%s8092_s3 + $0x84] ss:$16 sps:$4 sm:$0xff]  }
  0xe4   : > { %2180 = vmatmul.mubr.bf16.gmra.mxu0 %v6081_v49  ;;  %v5388_v49 = vld [vmem:[%s8090_s1 + $0x40c] ss:$16 sps:$4 sm:$0xff]  }
  0xe5   : > { %2293 = vmatmul.mubr.bf16.gmra.mxu1 %v6083_v50  ;;  %2362 = vmatpush1.bf16.msra.mxu0 %v5377_v23  ;;  %v5386_v50 = vld [vmem:[%s8090_s1 + $0x408] ss:$16 sps:$4 sm:$0xff]  }
  0xe6   : > { %2189 = vmatprep.mubr.bf16.mxu0 %v6088_v52  ;;  %2363 = vmatprep.subr.bf16.mxu0 %v5382_v33  ;;  %v650_v52 = vlaneseq }
  0xe7   : > { %2302 = vmatprep.mubr.bf16.mxu1 %v6093_v56  ;;  %v5391_v56 = vld [vmem:[%s8090_s1 + $0x5ec] ss:$16 sps:$4 sm:$0xff]  }
  0xe8   : > { %v6658_v39 = vshrl.u32 %v650_v52, 7 }
  0xe9   : > { %2364 = vmatpush1.bf16.msra.mxu0 %v5380_v34 }
  0xea   : > { %2365 = vmatprep.subr.bf16.mxu0 %v5385_v36  ;;  %8121 = vst [vmem:[#allocation11_spill] sm:$0xff] %v6658_v39 }
  0xec   : > { %2190 = vmatmul.mubr.bf16.gmra.mxu0 %v6113_v3  ;;  %v5394_v3 = vld [vmem:[%s8090_s1 + $0x5cc] ss:$16 sps:$4 sm:$0xff]  }
  0xed   : > { %2303 = vmatmul.mubr.bf16.gmra.mxu1 %v6115_v4  ;;  %2366 = vmatpush1.bf16.msra.mxu0 %v5383_v38  ;;  %v5392_v4 = vld [vmem:[%s8090_s1 + $0x5c8] ss:$16 sps:$4 sm:$0xff]  }
  0xee   : > { %2199 = vmatprep.mubr.bf16.mxu0 %v6120_v6  ;;  %2367 = vmatprep.subr.bf16.mxu0 %v5388_v49  ;;  %v5397_v6 = vld [vmem:[%s8090_s1 + $0x5ac] ss:$16 sps:$4 sm:$0xff]   ;;  %v5422_v49 = vld [vmem:[%s8092_s3 + $0x80] ss:$16 sps:$4 sm:$0xff]  }
  0xef   : > { %2312 = vmatprep.mubr.bf16.mxu1 %v6125_v8  ;;  %v5395_v8 = vld [vmem:[%s8090_s1 + $0x5a8] ss:$16 sps:$4 sm:$0xff]  }
  0xf1   : > { %2368 = vmatpush1.bf16.msra.mxu0 %v5386_v50 }
  0xf2   : > { %2369 = vmatprep.subr.bf16.mxu0 %v5391_v56 }
  0xf4   : > { %2200 = vmatmul.mubr.bf16.gmra.mxu0 %v6148_v24  ;;  %v5400_v24 = vld [vmem:[%s8090_s1 + $0x58c] ss:$16 sps:$4 sm:$0xff]  }
  0xf5   : > { %2313 = vmatmul.mubr.bf16.gmra.mxu1 %v6150_v25  ;;  %2370 = vmatpush2.bf16.msra.mxu0 %v5389_v60  ;;  %v5398_v25 = vld [vmem:[%s8090_s1 + $0x588] ss:$16 sps:$4 sm:$0xff]  }
  0xf6   : > { %2209 = vmatprep.mubr.bf16.mxu0 %v6155_v27  ;;  %2371 = vmatprep.subr.bf16.mxu0 %v5394_v3  ;;  %v5403_v27 = vld [vmem:[%s8090_s1 + $0x56c] ss:$16 sps:$4 sm:$0xff]  }
  0xf7   : > { %2322 = vmatprep.mubr.bf16.mxu1 %v6160_v29  ;;  %v5401_v29 = vld [vmem:[%s8090_s1 + $0x568] ss:$16 sps:$4 sm:$0xff]  }
  0xf9   : > { %2372 = vmatpush2.bf16.msra.mxu0 %v5392_v4  ;;  %v5425_v4 = vld [vmem:[%s8092_s3 + $0x60] ss:$16 sps:$4 sm:$0xff]  }
  0xfa   : > { %2373 = vmatprep.subr.bf16.mxu0 %v5397_v6  ;;  %v5511_v6 = vld [vmem:[%s8092_s3 + $0x2e4] ss:$16 sps:$4 sm:$0xff]  }
  0xfb   : > { %3578 = vmatprep.subr.bf16.mxu1 %v5511_v6  ;;  %v5442_v6 = vld [vmem:[%s8092_s3 + $0x1c4] ss:$16 sps:$4 sm:$0xff]  }
  0xfc   : > { %2210 = vmatmul.mubr.bf16.gmra.mxu0 %v6180_v44  ;;  %v5406_v44 = vld [vmem:[%s8090_s1 + $0x54c] ss:$16 sps:$4 sm:$0xff]  }
  0xfd   : > { %2323 = vmatmul.mubr.bf16.gmra.mxu1 %v6182_v45  ;;  %2374 = vmatpush2.bf16.msra.mxu0 %v5395_v8  ;;  %v5404_v45 = vld [vmem:[%s8090_s1 + $0x548] ss:$16 sps:$4 sm:$0xff]   ;;  %v5430_v8 = vld [vmem:[%s8092_s3 + $0x44] ss:$16 sps:$4 sm:$0xff]  }
  0xfe   : > { %2219 = vmatprep.mubr.bf16.mxu0 %v6187_v47  ;;  %2375 = vmatprep.subr.bf16.mxu0 %v5400_v24  ;;  %v5409_v47 = vld [vmem:[%s8090_s1 + $0x52c] ss:$16 sps:$4 sm:$0xff]   ;;  %v5509_v24 = vld [vmem:[%s8092_s3 + $0x2e0] ss:$16 sps:$4 sm:$0xff]  }
  0xff   : > { %2332 = vmatprep.mubr.bf16.mxu1 %v6192_v51  ;;  %v5407_v51 = vld [vmem:[%s8090_s1 + $0x528] ss:$16 sps:$4 sm:$0xff]  }
 0x101   : > { %2376 = vmatpush2.bf16.msra.mxu0 %v5398_v25 }
 0x102   : > { %2377 = vmatprep.subr.bf16.mxu0 %v5403_v27 }
 0x104   : > { %2220 = vmatmul.mubr.bf16.gmra.mxu0 %v6212_v2  ;;  %v5412_v2 = vld [vmem:[%s8090_s1 + $0x50c] ss:$16 sps:$4 sm:$0xff]  }
 0x105   : > { %2333 = vmatmul.mubr.bf16.gmra.mxu1 %v6214_v5  ;;  %2378 = vmatpush2.bf16.msra.mxu0 %v5401_v29  ;;  %v5410_v5 = vld [vmem:[%s8090_s1 + $0x508] ss:$16 sps:$4 sm:$0xff]  }
 0x106   : > { %2229 = vmatprep.mubr.bf16.mxu0 %v6219_v9  ;;  %2379 = vmatprep.subr.bf16.mxu0 %v5406_v44  ;;  %v8105_v9 = vsub.s32 0, %v6658_v39 }
 0x107   : > { %2342 = vmatprep.mubr.bf16.mxu1 %v6224_v11  ;;  %v648_v11 = vld [vmem:[%s8091_s2] sm:$0xf] }
 0x108   : > { %v6728_v41 = vrot.slane %v648_v11, %v8105_v9 }
 0x109   : > { %2380 = vmatpush2.bf16.msra.mxu0 %v5404_v45 }
 0x10a   : > { %2381 = vmatprep.subr.bf16.mxu0 %v5409_v47  ;;  %v5428_v47 = vld [vmem:[%s8092_s3 + $0x40] ss:$16 sps:$4 sm:$0xff]  }
 0x10c   : > { %2230 = vmatmul.mubr.bf16.gmra.mxu0 %v6242_v26  ;;  %v5415_v26 = vld [vmem:[%s8092_s3 + $0xe4] ss:$16 sps:$4 sm:$0xff]  }
 0x10d   : > { %2343 = vmatmul.mubr.bf16.gmra.mxu1 %v6244_v28  ;;  %2382 = vmatpush2.bf16.msra.mxu0 %v5407_v51  ;;  %v8106_v28 = vsub.s32 1, %v6658_v39 }
 0x10e   : > { %2385 = vmatprep.mubr.bf16.mxu0 %v6249_v31  ;;  %2383 = vmatprep.subr.bf16.mxu0 %v5412_v2  ;;  %v5413_v31 = vld [vmem:[%s8092_s3 + $0xe0] ss:$16 sps:$4 sm:$0xff]  }
 0x10f   : > { %2498 = vmatprep.mubr.bf16.mxu1 %v8120_v48  ;;  %v6735_v32 = vrot.slane %v648_v11, %v8106_v28  ;;  %v5512_v2 = vld [vmem:[%s8092_s3 + $0x2c0] ss:$16 sps:$4 sm:$0xff]  }
 0x111   : > { %2384 = vmatpush2.bf16.msra.mxu0 %v5410_v5 }
 0x112   : > { %3465 = vmatprep.subr.bf16.mxu0 %v5415_v26 }
 0x114   : > { %v1709_v12 = vpop.f32.mrf.mxu0  ;;  %2386 = vmatmul.mubr.bf16.vlgmr.msra.gmra.mxu0 %v6274_v55 }
 0x115   : > { %v1822_v14 = vpop.f32.mrf.mxu1  ;;  %4773 = vmatmul.mubr.msk.bf16.vlgmr.msra.gmra.mxu1 %vm1650_vm0, %v6276_v57  ;;  %v1710_v30 = vadd.f32 %v1709_v12, %v6728_v41  ;;  %2395 = vmatprep.mubr.bf16.mxu0 %v6289_v63  ;;  %v5421_v57 = vld [vmem:[%s8092_s3 + $0xa4] ss:$16 sps:$4 sm:$0xff]   ;;  %v5431_v12 = vld [vmem:[%s8092_s3 + $0x20] ss:$16 sps:$4 sm:$0xff]  }
 0x116   : > { %2508 = vmatprep.mubr.bf16.mxu1 %v8120_v48  ;;  %v1711_v13 = vpop.f32.mrf.mxu0  ;;  %3466 = vmatpush1.bf16.msra.mxu0 %v5413_v31 }
 0x117   : > { %v1824_v59 = vpop.f32.mrf.mxu1  ;;  %v6749_v1 = vadd.f32 %v1822_v14, %v1710_v30  ;;  %v1712_v55 = vadd.f32 %v1711_v13, %v6735_v32  ;;  %3467 = vmatprep.subr.bf16.mxu0 %v5418_v42  ;;  %3579 = vmatpush1.bf16.msra.mxu1 %v5509_v24  ;;  %v5517_v14 = vld [vmem:[%s8092_s3 + $0x2a4] ss:$16 sps:$4 sm:$0xff]   ;;  %v5515_v13 = vld [vmem:[%s8092_s3 + $0x2a0] ss:$16 sps:$4 sm:$0xff]  }
 0x118   : > { %v6755_v53 = vpop.f32.mrf.mxu0  ;;  %v5436_v30 = vld [vmem:[%s8092_s3 + $0x4] ss:$16 sps:$4 sm:$0xff]  }
 0x119   : > { %v6757_v63 = vpop.f32.mrf.mxu1  ;;  %v6759_v54 = vadd.f32 %v1824_v59, %v1712_v55 }
 0x11a   : > { %v6761_v58 = vpop.f32.mrf.mxu0  ;;  %3468 = vmatpush1.bf16.msra.mxu0 %v5416_v20 }
 0x11b   : > { %v6763_v15 = vpop.f32.mrf.mxu1  ;;  %3469 = vmatprep.subr.bf16.mxu0 %v5421_v57 }
 0x11c   : > { %v1719_v23 = vpop.f32.mrf.mxu0  ;;  %2396 = vmatmul.mubr.bf16.gmra.mxu0 %v6310_v18 }
 0x11d   : > { %v1832_v33 = vpop.f32.mrf.mxu1  ;;  %4774 = vmatmul.mubr.msk.bf16.gmra.mxu1 %vm1650_vm0, %v6312_v19  ;;  %v1720_v34 = vadd.f32 %v1719_v23, %v6728_v41  ;;  %2405 = vmatprep.mubr.bf16.mxu0 %v6333_v40  ;;  %v5427_v19 = vld [vmem:[%s8092_s3 + $0x64] ss:$16 sps:$4 sm:$0xff]  }
 0x11e   : > { %2518 = vmatprep.mubr.bf16.mxu1 %v8120_v48  ;;  %v1721_v36 = vpop.f32.mrf.mxu0  ;;  %3470 = vmatpush1.bf16.msra.mxu0 %v5419_v16 }
 0x11f   : > { %v1834_v38 = vpop.f32.mrf.mxu1  ;;  %v6780_v50 = vadd.f32 %v1832_v33, %v1720_v34  ;;  %v1722_v18 = vadd.f32 %v1721_v36, %v6735_v32  ;;  %3471 = vmatprep.subr.bf16.mxu0 %v5424_v21  ;;  %v5434_v21 = vld [vmem:[%s8092_s3] ss:$16 sps:$4 sm:$0xff]  }
 0x120   : > { %v6786_v52 = vpop.f32.mrf.mxu0  ;;  %v5518_v33 = vld [vmem:[%s8092_s3 + $0x280] ss:$16 sps:$4 sm:$0xff]  }
 0x121   : > { %v6788_v40 = vpop.f32.mrf.mxu1  ;;  %v6790_v56 = vadd.f32 %v1834_v38, %v1722_v18 }
 0x122   : > { %v6792_v60 = vpop.f32.mrf.mxu0  ;;  %3472 = vmatpush1.bf16.msra.mxu0 %v5422_v49 }
 0x123   : > { %v6794_v3 = vpop.f32.mrf.mxu1  ;;  %3473 = vmatprep.subr.bf16.mxu0 %v5427_v19  ;;  %v5437_v19 = vld [vmem:[%s8092_s3 + $0x1e0] ss:$16 sps:$4 sm:$0xff]  }
 0x124   : > { %v1729_v25 = vpop.f32.mrf.mxu0  ;;  %2406 = vmatmul.mubr.bf16.gmra.mxu0 %v6356_v62  ;;  %v5514_v62 = vld [vmem:[%s8092_s3 + $0x2c4] ss:$16 sps:$4 sm:$0xff]  }
 0x125   : > { %v1842_v27 = vpop.f32.mrf.mxu1  ;;  %4775 = vmatmul.mubr.msk.bf16.gmra.mxu1 %vm1650_vm0, %v6358_v0  ;;  %v1730_v29 = vadd.f32 %v1729_v25, %v6728_v41  ;;  %2415 = vmatprep.mubr.bf16.mxu0 %v6374_v17  ;;  %v5433_v17 = vld [vmem:[%s8092_s3 + $0x24] ss:$16 sps:$4 sm:$0xff]  }
 0x126   : > { %2528 = vmatprep.mubr.bf16.mxu1 %v8120_v48  ;;  %v1731_v44 = vpop.f32.mrf.mxu0  ;;  %3474 = vmatpush1.bf16.msra.mxu0 %v5425_v4  ;;  %v5523_v4 = vld [vmem:[%s8092_s3 + $0x264] ss:$16 sps:$4 sm:$0xff]  }
 0x127   : > { %v1844_v45 = vpop.f32.mrf.mxu1  ;;  %v6820_v51 = vadd.f32 %v1842_v27, %v1730_v29  ;;  %v1732_v0 = vadd.f32 %v1731_v44, %v6735_v32  ;;  %3475 = vmatprep.subr.bf16.mxu0 %v5430_v8  ;;  %3580 = vmatprep.subr.bf16.mxu1 %v5514_v62  ;;  %v5521_v8 = vld [vmem:[%s8092_s3 + $0x260] ss:$16 sps:$4 sm:$0xff]  }
 0x128   : > { %v6829_v5 = vpop.f32.mrf.mxu0  ;;  %3581 = vmatpush1.bf16.msra.mxu1 %v5512_v2  ;;  %v5524_v62 = vld [vmem:[%s8092_s3 + $0x240] ss:$16 sps:$4 sm:$0xff]  }
 0x129   : > { %v6831_v11 = vpop.f32.mrf.mxu1  ;;  %v6833_v26 = vadd.f32 %v1844_v45, %v1732_v0  ;;  %3582 = vmatprep.subr.bf16.mxu1 %v5517_v14  ;;  %v5440_v45 = vld [vmem:[%s8092_s3 + $0x1c0] ss:$16 sps:$4 sm:$0xff]  }
 0x12a   : > { %v6835_v31 = vpop.f32.mrf.mxu0  ;;  %3476 = vmatpush1.bf16.msra.mxu0 %v5428_v47 }
 0x12b   : > { %v6837_v42 = vpop.f32.mrf.mxu1  ;;  %3477 = vmatprep.subr.bf16.mxu0 %v5433_v17 }
 0x12c   : > { %v1739_v59 = vpop.f32.mrf.mxu0  ;;  %2416 = vmatmul.mubr.bf16.gmra.mxu0 %v6397_v43  ;;  %v5520_v43 = vld [vmem:[%s8092_s3 + $0x284] ss:$16 sps:$4 sm:$0xff]   ;;  %3583 = vmatpush1.bf16.msra.mxu1 %v5515_v13 }
 0x12d   : > { %v1852_v20 = vpop.f32.mrf.mxu1  ;;  %4776 = vmatmul.mubr.msk.bf16.gmra.mxu1 %vm1650_vm0, %v6399_v46  ;;  %v1740_v55 = vadd.f32 %v1739_v59, %v6728_v41  ;;  %2425 = vmatprep.mubr.bf16.mxu0 %v6415_v7  ;;  %v5439_v7 = vld [vmem:[%s8092_s3 + $0x1e4] ss:$16 sps:$4 sm:$0xff]  }
 0x12e   : > { %2538 = vmatprep.mubr.bf16.mxu1 %v8120_v48  ;;  %v1741_v57 = vpop.f32.mrf.mxu0  ;;  %3478 = vmatpush1.bf16.msra.mxu0 %v5431_v12  ;;  %v5529_v13 = vld [vmem:[%s8092_s3 + $0x224] ss:$16 sps:$4 sm:$0xff]  }
 0x12f   : > { %v1854_v16 = vpop.f32.mrf.mxu1  ;;  %v6863_v23 = vadd.f32 %v1852_v20, %v1740_v55  ;;  %v1742_v46 = vadd.f32 %v1741_v57, %v6735_v32  ;;  %3479 = vmatprep.subr.bf16.mxu0 %v5436_v30  ;;  %3584 = vmatprep.subr.bf16.mxu1 %v5520_v43  ;;  %v5443_v30 = vld [vmem:[%s8092_s3 + $0x1a0] ss:$16 sps:$4 sm:$0xff]   ;;  %v5448_v59 = vld [vmem:[%s8092_s3 + $0x184] ss:$16 sps:$4 sm:$0xff]  }
 0x130   : > { %v6872_v34 = vpop.f32.mrf.mxu0  ;;  %3585 = vmatpush1.bf16.msra.mxu1 %v5518_v33  ;;  %v5527_v20 = vld [vmem:[%s8092_s3 + $0x220] ss:$16 sps:$4 sm:$0xff]  }
 0x131   : > { %v6874_v36 = vpop.f32.mrf.mxu1  ;;  %v6876_v38 = vadd.f32 %v1854_v16, %v1742_v46  ;;  %3586 = vmatprep.subr.bf16.mxu1 %v5523_v4  ;;  %v8122_v16 = vld [vmem:[#allocation5_spill] sm:$0xff]  ;;  %v8124_v46 = vld [vmem:[#allocation7_spill] sm:$0xff] }
 0x132   : > { %v6878_v49 = vpop.f32.mrf.mxu0  ;;  %3480 = vmatpush1.bf16.msra.mxu0 %v5434_v21  ;;  %v8123_v21 = vld [vmem:[#allocation6_spill] sm:$0xff]  ;;  %v5532_v4 = vld [vmem:[%s8092_s3 + $0x204] ss:$16 sps:$4 sm:$0xff]  }
 0x133   : > { %v6880_v18 = vpop.f32.mrf.mxu1  ;;  %3481 = vmatprep.subr.bf16.mxu0 %v5439_v7 }
 0x134   : > { %v1749_v24 = vpop.f32.mrf.mxu0  ;;  %2426 = vmatmul.mubr.bf16.gmra.mxu0 %v6438_v35  ;;  %v5526_v35 = vld [vmem:[%s8092_s3 + $0x244] ss:$16 sps:$4 sm:$0xff]   ;;  %3587 = vmatpush1.bf16.msra.mxu1 %v5521_v8 }
 0x135   : > { %v1862_v25 = vpop.f32.mrf.mxu1  ;;  %4777 = vmatmul.mubr.msk.bf16.gmra.mxu1 %vm1650_vm0, %v6440_v37  ;;  %v1750_v27 = vadd.f32 %v1749_v24, %v6728_v41  ;;  %2435 = vmatprep.mubr.bf16.mxu0 %v6456_v61  ;;  %v5445_v61 = vld [vmem:[%s8092_s3 + $0x1a4] ss:$16 sps:$4 sm:$0xff]  }
 0x136   : > { %2548 = vmatprep.mubr.bf16.mxu1 %v8120_v48  ;;  %v1751_v29 = vpop.f32.mrf.mxu0  ;;  %3482 = vmatpush2.bf16.msra.mxu0 %v5437_v19  ;;  %v5446_v19 = vld [vmem:[%s8092_s3 + $0x180] ss:$16 sps:$4 sm:$0xff]   ;;  %v5451_v24 = vld [vmem:[%s8092_s3 + $0x164] ss:$16 sps:$4 sm:$0xff]  }
 0x137   : > { %v1864_v44 = vpop.f32.mrf.mxu1  ;;  %v6906_v47 = vadd.f32 %v1862_v25, %v1750_v27  ;;  %v1752_v37 = vadd.f32 %v1751_v29, %v6735_v32  ;;  %3483 = vmatprep.subr.bf16.mxu0 %v5442_v6  ;;  %3588 = vmatprep.subr.bf16.mxu1 %v5526_v35  ;;  %v5530_v25 = vld [vmem:[%s8092_s3 + $0x200] ss:$16 sps:$4 sm:$0xff]  }
 0x138   : > { %v6915_v0 = vpop.f32.mrf.mxu0  ;;  %3589 = vmatpush1.bf16.msra.mxu1 %v5524_v62  ;;  %v5454_v62 = vld [vmem:[%s8092_s3 + $0x144] ss:$16 sps:$4 sm:$0xff]  }
 0x139   : > { %v6917_v17 = vpop.f32.mrf.mxu1  ;;  %v6919_v2 = vadd.f32 %v1864_v44, %v1752_v37  ;;  %3590 = vmatprep.subr.bf16.mxu1 %v5529_v13  ;;  %v5449_v37 = vld [vmem:[%s8092_s3 + $0x160] ss:$16 sps:$4 sm:$0xff]  }
 0x13a   : > { %v6921_v12 = vpop.f32.mrf.mxu0  ;;  %3484 = vmatpush2.bf16.msra.mxu0 %v5440_v45 }
 0x13b   : > { %v6923_v14 = vpop.f32.mrf.mxu1  ;;  %3485 = vmatprep.subr.bf16.mxu0 %v5445_v61  ;;  %v5535_v61 = vld [vmem:[%s8092_s3 + $0x3e4] ss:$16 sps:$4 sm:$0xff]  }
 0x13c   : > { %v1759_v55 = vpop.f32.mrf.mxu0  ;;  %2436 = vmatmul.mubr.bf16.gmra.mxu0 %v8122_v16  ;;  %3591 = vmatpush1.bf16.msra.mxu1 %v5527_v20  ;;  %v8125_v20 = vld [vmem:[#allocation8_spill] sm:$0xff]  ;;  %v8127_v16 = vld [vmem:[#allocation10_spill] sm:$0xff] }
 0x13d   : > { %v1872_v57 = vpop.f32.mrf.mxu1  ;;  %4778 = vmatmul.mubr.msk.bf16.gmra.mxu1 %vm1650_vm0, %v8123_v21  ;;  %v1760_v43 = vadd.f32 %v1759_v55, %v6728_v41  ;;  %2445 = vmatprep.mubr.bf16.mxu0 %v8124_v46  ;;  %v8126_v55 = vld [vmem:[#allocation9_spill] sm:$0xff] }
 0x13e   : > { %2558 = vmatprep.mubr.bf16.mxu1 %v8120_v48  ;;  %v1761_v7 = vpop.f32.mrf.mxu0  ;;  %3486 = vmatpush2.bf16.msra.mxu0 %v5443_v30  ;;  %v5533_v30 = vld [vmem:[%s8092_s3 + $0x3e0] ss:$16 sps:$4 sm:$0xff]  }
 0x13f   : > { %v1874_v33 = vpop.f32.mrf.mxu1  ;;  %v6949_v6 = vadd.f32 %v1872_v57, %v1760_v43  ;;  %v1762_v8 = vadd.f32 %v1761_v7, %v6735_v32  ;;  %3487 = vmatprep.subr.bf16.mxu0 %v5448_v59  ;;  %3592 = vmatprep.subr.bf16.mxu1 %v5532_v4  ;;  %v5452_v46 = vld [vmem:[%s8092_s3 + $0x140] ss:$16 sps:$4 sm:$0xff]   ;;  %v5538_v7 = vld [vmem:[%s8092_s3 + $0x3c4] ss:$16 sps:$4 sm:$0xff]  }
 0x140   : > { %v6958_v27 = vpop.f32.mrf.mxu0  ;;  %3593 = vmatpush1.bf16.msra.mxu1 %v5530_v25  ;;  %v5536_v4 = vld [vmem:[%s8092_s3 + $0x3c0] ss:$16 sps:$4 sm:$0xff]  }
 0x141   : > { %v6960_v29 = vpop.f32.mrf.mxu1  ;;  %v6962_v44 = vadd.f32 %v1874_v33, %v1762_v8  ;;  %3594 = vmatprep.subr.bf16.mxu1 %v5535_v61 }
 0x142   : > { %v6964_v45 = vpop.f32.mrf.mxu0  ;;  %3488 = vmatpush2.bf16.msra.mxu0 %v5446_v19 }
 0x143   : > { %v6966_v35 = vpop.f32.mrf.mxu1  ;;  %3489 = vmatprep.subr.bf16.mxu0 %v5451_v24 }
 0x144   : > { %v1769_v13 = vpop.f32.mrf.mxu0  ;;  %2446 = vmatmul.mubr.bf16.gmra.mxu0 %v8125_v20  ;;  %3595 = vmatpush2.bf16.msra.mxu1 %v5533_v30  ;;  %v5541_v30 = vld [vmem:[%s8092_s3 + $0x3a4] ss:$16 sps:$4 sm:$0xff]  }
 0x145   : > { %v1882_v59 = vpop.f32.mrf.mxu1  ;;  %4779 = vmatmul.mubr.msk.bf16.gmra.mxu1 %vm1650_vm0, %v8126_v55  ;;  %v1770_v57 = vadd.f32 %v1769_v13, %v6728_v41  ;;  %2455 = vmatprep.mubr.bf16.mxu0 %v8127_v16  ;;  %v5460_v13 = vld [vmem:[%s8092_s3 + $0x104] ss:$16 sps:$4 sm:$0xff]  }
 0x146   : > { %2568 = vmatprep.mubr.bf16.mxu1 %v8120_v48  ;;  %v1771_v21 = vpop.f32.mrf.mxu0  ;;  %3490 = vmatpush2.bf16.msra.mxu0 %v5449_v37  ;;  %v5457_v48 = vld [vmem:[%s8092_s3 + $0x124] ss:$16 sps:$4 sm:$0xff]  }
 0x147   : > { %v1884_v43 = vpop.f32.mrf.mxu1  ;;  %v6992_v33 = vadd.f32 %v1882_v59, %v1770_v57  ;;  %v1772_v19 = vadd.f32 %v1771_v21, %v6735_v32  ;;  %3491 = vmatprep.subr.bf16.mxu0 %v5454_v62  ;;  %3596 = vmatprep.subr.bf16.mxu1 %v5538_v7  ;;  %v5455_v62 = vld [vmem:[%s8092_s3 + $0x120] ss:$16 sps:$4 sm:$0xff]  }
 0x148   : > { %v7001_v8 = vpop.f32.mrf.mxu0  ;;  %3597 = vmatpush2.bf16.msra.mxu1 %v5536_v4  ;;  %v5539_v59 = vld [vmem:[%s8092_s3 + $0x3a0] ss:$16 sps:$4 sm:$0xff]  }
 0x149   : > { %v7003_v24 = vpop.f32.mrf.mxu1  ;;  %v7005_v25 = vadd.f32 %v1884_v43, %v1772_v19  ;;  %3598 = vmatprep.subr.bf16.mxu1 %v5541_v30  ;;  %v5458_v43 = vld [vmem:[%s8092_s3 + $0x100] ss:$16 sps:$4 sm:$0xff]  }
 0x14a   : > { %v7007_v37 = vpop.f32.mrf.mxu0  ;;  %3492 = vmatpush2.bf16.msra.mxu0 %v5452_v46  ;;  %v5544_v46 = vld [vmem:[%s8092_s3 + $0x384] ss:$16 sps:$4 sm:$0xff]   ;;  %v5542_v19 = vld [vmem:[%s8092_s3 + $0x380] ss:$16 sps:$4 sm:$0xff]  }
 0x14b   : > { %v7009_v61 = vpop.f32.mrf.mxu1  ;;  %3493 = vmatprep.subr.bf16.mxu0 %v5457_v48 }
 0x14c   : > { %v1779_v20 = vpop.f32.mrf.mxu0  ;;  %2456 = vmatmul.mubr.bf16.gmra.mxu0 %v6561_v22  ;;  %3599 = vmatpush2.bf16.msra.mxu1 %v5539_v59  ;;  %v1714_v59 = vadd.f32 %v6755_v53, %v6728_v41 }
 0x14d   : > { %v1892_v55 = vpop.f32.mrf.mxu1  ;;  %4780 = vmatmul.mubr.msk.bf16.gmra.mxu1 %vm1650_vm0, %v6563_v10  ;;  %v1780_v57 = vadd.f32 %v1779_v20, %v6728_v41  ;;  %v5463_v10 = vld [vmem:[%s8092_s3 + $0xec] ss:$16 sps:$4 sm:$0xff]   ;;  %3600 = vmatprep.subr.bf16.mxu1 %v5544_v46 }
 0x14e   : > { %v1781_v16 = vpop.f32.mrf.mxu0  ;;  %3494 = vmatpush2.bf16.msra.mxu0 %v5455_v62  ;;  %v1827_v53 = vadd.f32 %v6757_v63, %v1714_v59  ;;  %v5553_v63 = vld [vmem:[%s8092_s3 + $0x324] ss:$16 sps:$4 sm:$0xff]  }
 0x14f   : > { %v1894_v21 = vpop.f32.mrf.mxu1  ;;  %v7033_v7 = vadd.f32 %v1892_v55, %v1780_v57  ;;  %v1782_v22 = vadd.f32 %v1781_v16, %v6735_v32  ;;  %3495 = vmatprep.subr.bf16.mxu0 %v5460_v13  ;;  %v5547_v13 = vld [vmem:[%s8092_s3 + $0x364] ss:$16 sps:$4 sm:$0xff]   ;;  %v5545_v55 = vld [vmem:[%s8092_s3 + $0x360] ss:$16 sps:$4 sm:$0xff]  }
 0x150   : > { %v7042_v48 = vpop.f32.mrf.mxu0  ;;  %3601 = vmatpush2.bf16.msra.mxu1 %v5542_v19  ;;  %v5548_v19 = vld [vmem:[%s8092_s3 + $0x340] ss:$16 sps:$4 sm:$0xff]  }
 0x151   : > { %8128 = vst [vmem:[#allocation5_spill] sm:$0xff] %v7033_v7  ;;  %v7044_v4 = vpop.f32.mrf.mxu1  ;;  %v7046_v62 = vadd.f32 %v1894_v21, %v1782_v22  ;;  %3602 = vmatprep.subr.bf16.mxu1 %v5547_v13  ;;  %v1716_v21 = vadd.f32 %v6761_v58, %v6735_v32  ;;  %v5550_v22 = vld [vmem:[%s8092_s3 + $0x344] ss:$16 sps:$4 sm:$0xff]  }
 0x152   : > { %8129 = vst [vmem:[#allocation6_spill] sm:$0xff] %v7044_v4  ;;  %v7048_v30 = vpop.f32.mrf.mxu0  ;;  %3496 = vmatpush2.bf16.msra.mxu0 %v5458_v43 }
 0x153   : > { %8130 = vst [vmem:[#allocation7_spill] sm:$0xff] %v7046_v62  ;;  %v7050_v20 = vpop.f32.mrf.mxu1  ;;  %3691 = vmatprep.subr.bf16.mxu0 %v5463_v10  ;;  %v1829_v58 = vadd.f32 %v6763_v15, %v1716_v21  ;;  %v1726_v21 = vadd.f32 %v6792_v60, %v6735_v32 }
 0x154   : > { %8131 = vst [vmem:[#allocation8_spill] sm:$0xff] %v7050_v20  ;;  %v1935_v57 = vpop.f32.mrf.mxu0  ;;  %3603 = vmatpush2.bf16.msra.mxu1 %v5545_v55 }
 0x155   : > { %v2048_v16 = vpop.f32.mrf.mxu1  ;;  %v1936_v13 = vadd.f32 %v1935_v57, %v6749_v1  ;;  %3604 = vmatprep.subr.bf16.mxu1 %v5550_v22  ;;  %v5551_v1 = vld [vmem:[%s8092_s3 + $0x320] ss:$16 sps:$4 sm:$0xff]  }
 0x156   : > { %v1937_v43 = vpop.f32.mrf.mxu0 }
 0x157   : > { %v2050_v46 = vpop.f32.mrf.mxu1  ;;  %v1938_v10 = vadd.f32 %v1937_v43, %v6759_v54  ;;  %v1724_v54 = vadd.f32 %v6786_v52, %v6728_v41  ;;  %v2049_v57 = vadd.f32 %v2048_v16, %v1936_v13  ;;  %v1839_v13 = vadd.f32 %v6794_v3, %v1726_v21  ;;  %v5559_v3 = vld [vmem:[%s8092_s3 + $0x2ec] ss:$16 sps:$4 sm:$0xff]  }
 0x158   : > { %v1939_v9 = vpop.f32.mrf.mxu0  ;;  %3605 = vmatpush2.bf16.msra.mxu1 %v5548_v19  ;;  %v1736_v21 = vadd.f32 %v6835_v31, %v6735_v32 }
 0x159   : > { %v2052_v28 = vpop.f32.mrf.mxu1  ;;  %v1940_v20 = vadd.f32 %v1939_v9, %v1827_v53  ;;  %v2051_v59 = vadd.f32 %v2050_v46, %v1938_v10  ;;  %3606 = vmatprep.subr.bf16.mxu1 %v5553_v63  ;;  %v1837_v52 = vadd.f32 %v6788_v40, %v1724_v54  ;;  %v5554_v46 = vld [vmem:[%s8092_s3 + $0x300] ss:$16 sps:$4 sm:$0xff]   ;;  %v2579_v60 = vmax.f32 %v2049_v57, 0.0  ;;  %v5461_v40 = vld [vmem:[%s8092_s3 + $0xe8] ss:$16 sps:$4 sm:$0xff]  }
 0x15a   : > { %v1941_v7 = vpop.f32.mrf.mxu0 }
 0x15b   : > { %v2054_v62 = vpop.f32.mrf.mxu1  ;;  %v2053_v55 = vadd.f32 %v2052_v28, %v1940_v20  ;;  %v1942_v43 = vadd.f32 %v1941_v7, %v1829_v58  ;;  %v5556_v28 = vld [vmem:[%s8092_s3 + $0x304] ss:$16 sps:$4 sm:$0xff]   ;;  %v2580_v7 = vmax.f32 %v2051_v59, 0.0 }
 0x15c   : > { %v1945_v15 = vpop.f32.mrf.mxu0  ;;  %3607 = vmatpush2.bf16.msra.mxu1 %v5551_v1 }
 0x15d   : > { %v2058_v9 = vpop.f32.mrf.mxu1  ;;  %v2055_v22 = vadd.f32 %v2054_v62, %v1942_v43  ;;  %v2583_v53 = vmax.f32 %v2053_v55, 0.0  ;;  %v1946_v62 = vadd.f32 %v1945_v15, %v6780_v50  ;;  %3608 = vmatprep.subr.bf16.mxu1 %v5556_v28  ;;  %v5466_v50 = vld [vmem:[%s8092_s3 + $0xcc] ss:$16 sps:$4 sm:$0xff]  }
 0x15e   : > { %v1947_v4 = vpop.f32.mrf.mxu0 }
 0x15f   : > { %v2060_v39 = vpop.f32.mrf.mxu1  ;;  %v2584_v20 = vmax.f32 %v2055_v22, 0.0  ;;  %v1948_v16 = vadd.f32 %v1947_v4, %v6790_v56  ;;  %v1734_v56 = vadd.f32 %v6829_v5, %v6728_v41  ;;  %v7099_v4 = vpack.c.bf16 %v2583_v53, %v2579_v60 }
 0x160   : > { %v1949_v10 = vpop.f32.mrf.mxu0  ;;  %3609 = vmatpush2.bf16.msra.mxu1 %v5554_v46  ;;  %v2059_v57 = vadd.f32 %v2058_v9, %v1946_v62  ;;  %v5469_v9 = vld [vmem:[%s8092_s3 + $0xac] ss:$16 sps:$4 sm:$0xff]  }
 0x161   : > { %v2062_v19 = vpop.f32.mrf.mxu1  ;;  %v1950_v58 = vadd.f32 %v1949_v10, %v1837_v52  ;;  %v7092_v63 = vpack.c.bf16 %v2584_v20, %v2580_v7  ;;  %v2061_v55 = vadd.f32 %v2060_v39, %v1948_v16  ;;  %3804 = vmatprep.subr.bf16.mxu1 %v5559_v3  ;;  %v5464_v39 = vld [vmem:[%s8092_s3 + $0xc8] ss:$16 sps:$4 sm:$0xff]   ;;  %v1847_v7 = vadd.f32 %v6831_v11, %v1734_v56 }
 0x162   : > { %v1951_v54 = vpop.f32.mrf.mxu0  ;;  %v2587_v46 = vmax.f32 %v2059_v57, 0.0 }
 0x163   : > { %v2064_v59 = vpop.f32.mrf.mxu1  ;;  %v2063_v43 = vadd.f32 %v2062_v19, %v1950_v58  ;;  %v1952_v1 = vadd.f32 %v1951_v54, %v1839_v13  ;;  %3497 = vmatprep.mubr.bf16.mxu0 %v7092_v63  ;;  %v2588_v20 = vmax.f32 %v2061_v55, 0.0  ;;  %v1849_v19 = vadd.f32 %v6837_v42, %v1736_v21 }
 0x164   : > { %v1955_v5 = vpop.f32.mrf.mxu0  ;;  %3498 = vmatmul.mubr.bf16.vlgmr.msra.gmra.mxu0 %v7099_v4 }
 0x165   : > { %v2068_v15 = vpop.f32.mrf.mxu1  ;;  %v2065_v22 = vadd.f32 %v2064_v59, %v1952_v1  ;;  %3692 = vmatpush1.bf16.msra.mxu0 %v5461_v40  ;;  %v2591_v53 = vmax.f32 %v2063_v43, 0.0  ;;  %v1956_v60 = vadd.f32 %v1955_v5, %v6820_v51  ;;  %v5467_v40 = vld [vmem:[%s8092_s3 + $0xa8] ss:$16 sps:$4 sm:$0xff]   ;;  %v5472_v51 = vld [vmem:[%s8092_s3 + $0x8c] ss:$16 sps:$4 sm:$0xff]   ;;  %v1746_v1 = vadd.f32 %v6878_v49, %v6735_v32 }
 0x166   : > { %v1957_v28 = vpop.f32.mrf.mxu0  ;;  %3693 = vmatprep.subr.bf16.mxu0 %v5466_v50  ;;  %v5470_v5 = vld [vmem:[%s8092_s3 + $0x88] ss:$16 sps:$4 sm:$0xff]  }
 0x167   : > { %v2070_v52 = vpop.f32.mrf.mxu1  ;;  %v2592_v16 = vmax.f32 %v2065_v22, 0.0  ;;  %v1958_v31 = vadd.f32 %v1957_v28, %v6833_v26  ;;  %v7126_v11 = vpack.c.bf16 %v2591_v53, %v2587_v46  ;;  %v1744_v26 = vadd.f32 %v6872_v34, %v6728_v41 }
 0x168   : > { %v1959_v62 = vpop.f32.mrf.mxu0  ;;  %v2069_v3 = vadd.f32 %v2068_v15, %v1956_v60  ;;  %v5475_v15 = vld [vmem:[%s8092_s3 + $0x6c] ss:$16 sps:$4 sm:$0xff]   ;;  %v5473_v60 = vld [vmem:[%s8092_s3 + $0x68] ss:$16 sps:$4 sm:$0xff]  }
 0x169   : > { %v2072_v10 = vpop.f32.mrf.mxu1  ;;  %v1960_v13 = vadd.f32 %v1959_v62, %v1847_v7  ;;  %3694 = vmatpush1.bf16.msra.mxu0 %v5464_v39  ;;  %v7121_v58 = vpack.c.bf16 %v2592_v16, %v2588_v20  ;;  %v2071_v42 = vadd.f32 %v2070_v52, %v1958_v31  ;;  %v1857_v39 = vadd.f32 %v6874_v36, %v1744_v26 }
 0x16a   : > { %v1961_v56 = vpop.f32.mrf.mxu0  ;;  %3695 = vmatprep.subr.bf16.mxu0 %v5469_v9  ;;  %v2595_v52 = vmax.f32 %v2069_v3, 0.0  ;;  %v1859_v16 = vadd.f32 %v6880_v18, %v1746_v1  ;;  %v5481_v3 = vld [vmem:[%s8092_s3 + $0x2c] ss:$16 sps:$4 sm:$0xff]  }
 0x16b   : > { %v2074_v54 = vpop.f32.mrf.mxu1  ;;  %v2073_v59 = vadd.f32 %v2072_v10, %v1960_v13  ;;  %v1962_v50 = vadd.f32 %v1961_v56, %v1849_v19  ;;  %3507 = vmatprep.mubr.bf16.mxu0 %v7121_v58  ;;  %v2596_v53 = vmax.f32 %v2071_v42, 0.0  ;;  %v5476_v42 = vld [vmem:[%s8092_s3 + $0x48] ss:$16 sps:$4 sm:$0xff]  }
 0x16c   : > { %v1965_v55 = vpop.f32.mrf.mxu0  ;;  %3508 = vmatmul.mubr.bf16.gmra.mxu0 %v7126_v11 }
 0x16d   : > { %v2078_v43 = vpop.f32.mrf.mxu1  ;;  %v2075_v57 = vadd.f32 %v2074_v54, %v1962_v50  ;;  %3696 = vmatpush1.bf16.msra.mxu0 %v5467_v40  ;;  %v2599_v34 = vmax.f32 %v2073_v59, 0.0  ;;  %v1966_v9 = vadd.f32 %v1965_v55, %v6863_v23  ;;  %v5478_v23 = vld [vmem:[%s8092_s3 + $0x4c] ss:$16 sps:$4 sm:$0xff]  }
 0x16e   : > { %v1967_v21 = vpop.f32.mrf.mxu0  ;;  %3697 = vmatprep.subr.bf16.mxu0 %v5472_v51  ;;  %v1756_v51 = vadd.f32 %v6921_v12, %v6735_v32 }
 0x16f   : > { %v2080_v22 = vpop.f32.mrf.mxu1  ;;  %v2600_v28 = vmax.f32 %v2075_v57, 0.0  ;;  %v1968_v49 = vadd.f32 %v1967_v21, %v6876_v38  ;;  %v7152_v36 = vpack.c.bf16 %v2599_v34, %v2595_v52  ;;  %v1754_v38 = vadd.f32 %v6915_v0, %v6728_v41 }
 0x170   : > { %v1969_v7 = vpop.f32.mrf.mxu0  ;;  %v2079_v40 = vadd.f32 %v2078_v43, %v1966_v9 }
 0x171   : > { %v2082_v20 = vpop.f32.mrf.mxu1  ;;  %v1970_v31 = vadd.f32 %v1969_v7, %v1857_v39  ;;  %3698 = vmatpush1.bf16.msra.mxu0 %v5470_v5  ;;  %v7147_v46 = vpack.c.bf16 %v2600_v28, %v2596_v53  ;;  %v2081_v18 = vadd.f32 %v2080_v22, %v1968_v49  ;;  %v1867_v55 = vadd.f32 %v6917_v17, %v1754_v38  ;;  %v5479_v53 = vld [vmem:[%s8092_s3 + $0x28] ss:$16 sps:$4 sm:$0xff]   ;;  %v5487_v38 = vld [vmem:[%s8092_s3 + $0x1ec] ss:$16 sps:$4 sm:$0xff]  }
 0x172   : > { %v1971_v62 = vpop.f32.mrf.mxu0  ;;  %3699 = vmatprep.subr.bf16.mxu0 %v5475_v15  ;;  %v2603_v57 = vmax.f32 %v2079_v40, 0.0  ;;  %v1869_v22 = vadd.f32 %v6923_v14, %v1756_v51 }
 0x173   : > { %v2084_v10 = vpop.f32.mrf.mxu1  ;;  %v2083_v19 = vadd.f32 %v2082_v20, %v1970_v31  ;;  %v1972_v13 = vadd.f32 %v1971_v62, %v1859_v16  ;;  %3517 = vmatprep.mubr.bf16.mxu0 %v7147_v46  ;;  %v2604_v43 = vmax.f32 %v2081_v18, 0.0  ;;  %v1766_v31 = vadd.f32 %v6964_v45, %v6735_v32  ;;  %v5482_v62 = vld [vmem:[%s8092_s3 + $0x8] ss:$16 sps:$4 sm:$0xff]  }
 0x174   : > { %v1975_v56 = vpop.f32.mrf.mxu0  ;;  %3518 = vmatmul.mubr.bf16.gmra.mxu0 %v7152_v36 }
 0x175   : > { %v2088_v54 = vpop.f32.mrf.mxu1  ;;  %v2085_v26 = vadd.f32 %v2084_v10, %v1972_v13  ;;  %3700 = vmatpush1.bf16.msra.mxu0 %v5473_v60  ;;  %v2607_v0 = vmax.f32 %v2083_v19, 0.0  ;;  %v1976_v5 = vadd.f32 %v1975_v56, %v6906_v47  ;;  %v5484_v47 = vld [vmem:[%s8092_s3 + $0xc] ss:$16 sps:$4 sm:$0xff]  }
 0x176   : > { %v1977_v59 = vpop.f32.mrf.mxu0  ;;  %3701 = vmatprep.subr.bf16.mxu0 %v5478_v23 }
 0x177   : > { %v2090_v50 = vpop.f32.mrf.mxu1  ;;  %v2608_v1 = vmax.f32 %v2085_v26, 0.0  ;;  %v1978_v12 = vadd.f32 %v1977_v59, %v6919_v2  ;;  %v7178_v17 = vpack.c.bf16 %v2607_v0, %v2603_v57  ;;  %v1764_v2 = vadd.f32 %v6958_v27, %v6728_v41  ;;  %v5485_v59 = vld [vmem:[%s8092_s3 + $0x1e8] ss:$16 sps:$4 sm:$0xff]  }
 0x178   : > { %v1979_v34 = vpop.f32.mrf.mxu0  ;;  %v2089_v7 = vadd.f32 %v2088_v54, %v1976_v5  ;;  %v1879_v26 = vadd.f32 %v6966_v35, %v1766_v31  ;;  %v1776_v5 = vadd.f32 %v7007_v37, %v6735_v32  ;;  %v5491_v31 = vld [vmem:[%s8092_s3 + $0x1a8] ss:$16 sps:$4 sm:$0xff]  }
 0x179   : > { %v2092_v21 = vpop.f32.mrf.mxu1  ;;  %v1980_v15 = vadd.f32 %v1979_v34, %v1867_v55  ;;  %3702 = vmatpush1.bf16.msra.mxu0 %v5476_v42  ;;  %v7173_v39 = vpack.c.bf16 %v2608_v1, %v2604_v43  ;;  %v2091_v14 = vadd.f32 %v2090_v50, %v1978_v12  ;;  %v1877_v18 = vadd.f32 %v6960_v29, %v1764_v2 }
 0x17a   : > { %v1981_v28 = vpop.f32.mrf.mxu0  ;;  %3703 = vmatprep.subr.bf16.mxu0 %v5481_v3  ;;  %v2611_v40 = vmax.f32 %v2089_v7, 0.0  ;;  %v1889_v7 = vadd.f32 %v7009_v61, %v1776_v5 }
 0x17b   : > { %v2094_v49 = vpop.f32.mrf.mxu1  ;;  %v2093_v52 = vadd.f32 %v2092_v21, %v1980_v15  ;;  %v1982_v9 = vadd.f32 %v1981_v28, %v1869_v22  ;;  %3527 = vmatprep.mubr.bf16.mxu0 %v7173_v39  ;;  %v2612_v19 = vmax.f32 %v2091_v14, 0.0  ;;  %v5488_v21 = vld [vmem:[%s8092_s3 + $0x1c8] ss:$16 sps:$4 sm:$0xff]  }
 0x17c   : > { %v1985_v20 = vpop.f32.mrf.mxu0  ;;  %3528 = vmatmul.mubr.bf16.gmra.mxu0 %v7178_v17 }
 0x17d   : > { %v2098_v16 = vpop.f32.mrf.mxu1  ;;  %v2095_v60 = vadd.f32 %v2094_v49, %v1982_v9  ;;  %3704 = vmatpush1.bf16.msra.mxu0 %v5479_v53  ;;  %v2615_v27 = vmax.f32 %v2093_v52, 0.0  ;;  %v1986_v56 = vadd.f32 %v1985_v20, %v6949_v6  ;;  %v5490_v6 = vld [vmem:[%s8092_s3 + $0x1cc] ss:$16 sps:$4 sm:$0xff]  }
 0x17e   : > { %v1987_v10 = vpop.f32.mrf.mxu0  ;;  %3705 = vmatprep.subr.bf16.mxu0 %v5484_v47  ;;  %v5493_v53 = vld [vmem:[%s8092_s3 + $0x1ac] ss:$16 sps:$4 sm:$0xff]  }
 0x17f   : > { %v2100_v23 = vpop.f32.mrf.mxu1  ;;  %v2616_v13 = vmax.f32 %v2095_v60, 0.0  ;;  %v1988_v45 = vadd.f32 %v1987_v10, %v6962_v44  ;;  %v7204_v29 = vpack.c.bf16 %v2615_v27, %v2611_v40  ;;  %v1774_v44 = vadd.f32 %v7001_v8, %v6728_v41 }
 0x180   : > { %v1989_v54 = vpop.f32.mrf.mxu0  ;;  %v2099_v1 = vadd.f32 %v2098_v16, %v1986_v56 }
 0x181   : > { %v2102_v51 = vpop.f32.mrf.mxu1  ;;  %v1990_v42 = vadd.f32 %v1989_v54, %v1877_v18  ;;  %3706 = vmatpush1.bf16.msra.mxu0 %v5482_v62  ;;  %v7199_v0 = vpack.c.bf16 %v2616_v13, %v2612_v19  ;;  %v2101_v35 = vadd.f32 %v2100_v23, %v1988_v45  ;;  %v1887_v28 = vadd.f32 %v7003_v24, %v1774_v44  ;;  %v5494_v45 = vld [vmem:[%s8092_s3 + $0x188] ss:$16 sps:$4 sm:$0xff]   ;;  %v8135_v44 = vld [vmem:[#allocation5_spill] sm:$0xff] }
 0x182   : > { %v1991_v50 = vpop.f32.mrf.mxu0  ;;  %3707 = vmatprep.subr.bf16.mxu0 %v5487_v38  ;;  %v2619_v2 = vmax.f32 %v2099_v1, 0.0  ;;  %v1786_v19 = vadd.f32 %v7048_v30, %v6735_v32  ;;  %v8136_v1 = vld [vmem:[#allocation8_spill] sm:$0xff] }
 0x183   : > { %v2104_v3 = vpop.f32.mrf.mxu1  ;;  %v2103_v55 = vadd.f32 %v2102_v51, %v1990_v42  ;;  %v1992_v43 = vadd.f32 %v1991_v50, %v1879_v26  ;;  %3537 = vmatprep.mubr.bf16.mxu0 %v7199_v0  ;;  %v2620_v49 = vmax.f32 %v2101_v35, 0.0  ;;  %v5499_v51 = vld [vmem:[%s8092_s3 + $0x16c] ss:$16 sps:$4 sm:$0xff]   ;;  %v8134_v50 = vld [vmem:[#allocation7_spill] sm:$0xff] }
 0x184   : > { %v1995_v12 = vpop.f32.mrf.mxu0  ;;  %3538 = vmatmul.mubr.bf16.gmra.mxu0 %v7204_v29  ;;  %v8133_v42 = vld [vmem:[#allocation6_spill] sm:$0xff] }
 0x185   : > { %v2108_v57 = vpop.f32.mrf.mxu1  ;;  %v2105_v34 = vadd.f32 %v2104_v3, %v1992_v43  ;;  %3708 = vmatpush2.bf16.msra.mxu0 %v5485_v59  ;;  %v2623_v8 = vmax.f32 %v2103_v55, 0.0  ;;  %v1996_v14 = vadd.f32 %v1995_v12, %v6992_v33  ;;  %v5496_v33 = vld [vmem:[%s8092_s3 + $0x18c] ss:$16 sps:$4 sm:$0xff]   ;;  %v1899_v12 = vadd.f32 %v8136_v1, %v1786_v19 }
 0x186   : > { %v1997_v22 = vpop.f32.mrf.mxu0  ;;  %3709 = vmatprep.subr.bf16.mxu0 %v5490_v6 }
 0x187   : > { %v2110_v15 = vpop.f32.mrf.mxu1  ;;  %v2624_v47 = vmax.f32 %v2105_v34, 0.0  ;;  %v1998_v37 = vadd.f32 %v1997_v22, %v7005_v25  ;;  %v7230_v24 = vpack.c.bf16 %v2623_v8, %v2619_v2  ;;  %v1784_v25 = vadd.f32 %v7042_v48, %v6728_v41  ;;  %v8132_v41 = vld [vmem:[#allocation11_spill] sm:$0xff]  ;;  %v5637_v34 = vld [vmem:[%s8091_s2] sm:$0xf]  ;;  %v5497_v8 = vld [vmem:[%s8092_s3 + $0x168] ss:$16 sps:$4 sm:$0xff]  }
 0x188   : > { %v1999_v52 = vpop.f32.mrf.mxu0  ;;  %v2109_v23 = vadd.f32 %v2108_v57, %v1996_v14  ;;  %v8109_v48 = vsub.s32 2, %v8132_v41  ;;  %v8110_v26 = vsub.s32 3, %v8132_v41 }
 0x189   : > { %v2112_v9 = vpop.f32.mrf.mxu1  ;;  %v2000_v20 = vadd.f32 %v1999_v52, %v1887_v28  ;;  %3710 = vmatpush2.bf16.msra.mxu0 %v5488_v21  ;;  %v7225_v16 = vpack.c.bf16 %v2624_v47, %v2620_v49  ;;  %v2111_v61 = vadd.f32 %v2110_v15, %v1998_v37  ;;  %v1897_v32 = vadd.f32 %v8133_v42, %v1784_v25  ;;  %v5502_v28 = vld [vmem:[%s8092_s3 + $0x14c] ss:$16 sps:$4 sm:$0xff]  }
 0x18a   : > { %v2001_v60 = vpop.f32.mrf.mxu0  ;;  %3711 = vmatprep.subr.bf16.mxu0 %v5493_v53  ;;  %v2627_v6 = vmax.f32 %v2109_v23, 0.0  ;;  %v7260_v21 = vrot.slane %v5637_v34, %v8109_v48  ;;  %v7273_v2 = vrot.slane %v5637_v34, %v8110_v26  ;;  %v5505_v25 = vld [vmem:[%s8092_s3 + $0x12c] ss:$16 sps:$4 sm:$0xff]  }
 0x18b   : > { %v2114_v62 = vpop.f32.mrf.mxu1  ;;  %v2113_v27 = vadd.f32 %v2112_v9, %v2000_v20  ;;  %v2002_v10 = vadd.f32 %v2001_v60, %v1889_v7  ;;  %3547 = vmatprep.mubr.bf16.mxu0 %v7225_v16  ;;  %v2628_v30 = vmax.f32 %v2111_v61, 0.0  ;;  %v5508_v42 = vld [vmem:[%s8092_s3 + $0x10c] ss:$16 sps:$4 sm:$0xff]  }
 0x18c   : > { %v2005_v38 = vpop.f32.mrf.mxu0  ;;  %3548 = vmatmul.mubr.bf16.gmra.mxu0 %v7230_v24 }
 0x18d   : > { %v2118_v18 = vpop.f32.mrf.mxu1  ;;  %v2115_v13 = vadd.f32 %v2114_v62, %v2002_v10  ;;  %3712 = vmatpush2.bf16.msra.mxu0 %v5491_v31  ;;  %v2631_v40 = vmax.f32 %v2113_v27, 0.0  ;;  %v2006_v35 = vadd.f32 %v2005_v38, %v8135_v44  ;;  %v5500_v31 = vld [vmem:[%s8092_s3 + $0x148] ss:$16 sps:$4 sm:$0xff]  }
 0x18e   : > { %v2007_v56 = vpop.f32.mrf.mxu0  ;;  %3713 = vmatprep.subr.bf16.mxu0 %v5496_v33 }
 0x18f   : > { %v2120_v54 = vpop.f32.mrf.mxu1  ;;  %v2632_v59 = vmax.f32 %v2115_v13, 0.0  ;;  %v2008_v3 = vadd.f32 %v2007_v56, %v8134_v50  ;;  %v7265_v22 = vpack.c.bf16 %v2631_v40, %v2627_v6  ;;  %v2119_v14 = vadd.f32 %v2118_v18, %v2006_v35  ;;  %v5503_v40 = vld [vmem:[%s8092_s3 + $0x128] ss:$16 sps:$4 sm:$0xff]  }
 0x190   : > { %v2009_v55 = vpop.f32.mrf.mxu0  ;;  %v5506_v50 = vld [vmem:[%s8092_s3 + $0x108] ss:$16 sps:$4 sm:$0xff]  }
 0x191   : > { %v2122_v43 = vpop.f32.mrf.mxu1  ;;  %v2010_v57 = vadd.f32 %v2009_v55, %v1897_v32  ;;  %3714 = vmatpush2.bf16.msra.mxu0 %v5494_v45  ;;  %v7253_v5 = vpack.c.bf16 %v2632_v59, %v2628_v30  ;;  %v2121_v49 = vadd.f32 %v2120_v54, %v2008_v3  ;;  %v2635_v38 = vmax.f32 %v2119_v14, 0.0 }
 0x192   : > { %v2011_v15 = vpop.f32.mrf.mxu0  ;;  %3715 = vmatprep.subr.bf16.mxu0 %v5499_v51 }
 0x193   : > { %v2124_v53 = vpop.f32.mrf.mxu1  ;;  %v2123_v47 = vadd.f32 %v2122_v43, %v2010_v57  ;;  %v2012_v37 = vadd.f32 %v2011_v15, %v1899_v12  ;;  %3557 = vmatprep.mubr.bf16.mxu0 %v7253_v5  ;;  %v2636_v61 = vmax.f32 %v2121_v49, 0.0 }
 0x194   : > { %v2161_v52 = vpop.f32.mrf.mxu0  ;;  %3558 = vmatmul.mubr.bf16.gmra.mxu0 %v7265_v22 }
 0x195   : > { %v2274_v9 = vpop.f32.mrf.mxu1  ;;  %v2125_v7 = vadd.f32 %v2124_v53, %v2012_v37  ;;  %v2162_v20 = vadd.f32 %v2161_v52, %v7260_v21  ;;  %3716 = vmatpush2.bf16.msra.mxu0 %v5497_v8  ;;  %v2639_v60 = vmax.f32 %v2123_v47, 0.0 }
 0x196   : > { %v2163_v62 = vpop.f32.mrf.mxu0  ;;  %3717 = vmatprep.subr.bf16.mxu0 %v5502_v28 }
 0x197   : > { %v2276_v33 = vpop.f32.mrf.mxu1  ;;  %v2640_v27 = vmax.f32 %v2125_v7, 0.0  ;;  %v7283_v10 = vadd.f32 %v2274_v9, %v2162_v20  ;;  %v2164_v23 = vadd.f32 %v2163_v62, %v7273_v2  ;;  %v7297_v56 = vpack.c.bf16 %v2639_v60, %v2635_v38 }
 0x198   : > { %v7286_v18 = vpop.f32.mrf.mxu0 }
 0x199   : > { %v7288_v19 = vpop.f32.mrf.mxu1  ;;  %v7290_v13 = vadd.f32 %v2276_v33, %v2164_v23  ;;  %3718 = vmatpush2.bf16.msra.mxu0 %v5500_v31  ;;  %v7292_v45 = vpack.c.bf16 %v2640_v27, %v2636_v61 }
 0x19a   : > { %v7299_v54 = vpop.f32.mrf.mxu0  ;;  %3719 = vmatprep.subr.bf16.mxu0 %v5505_v25 }
 0x19b   : > { %v7301_v51 = vpop.f32.mrf.mxu1  ;;  %3567 = vmatprep.mubr.bf16.mxu0 %v7292_v45 }
 0x19c   : > { %v2171_v32 = vpop.f32.mrf.mxu0  ;;  %3568 = vmatmul.mubr.bf16.gmra.mxu0 %v7297_v56 }
 0x19d   : > { %v2284_v30 = vpop.f32.mrf.mxu1  ;;  %v2172_v59 = vadd.f32 %v2171_v32, %v7260_v21  ;;  %3720 = vmatpush2.bf16.msra.mxu0 %v5503_v40  ;;  %3723 = vmatprep.mubr.bf16.mxu0 %v7092_v63 }
 0x19e   : > { %v2173_v3 = vpop.f32.mrf.mxu0  ;;  %3721 = vmatprep.subr.bf16.mxu0 %v5508_v42 }
 0x19f   : > { %v2286_v6 = vpop.f32.mrf.mxu1  ;;  %v7313_v44 = vadd.f32 %v2284_v30, %v2172_v59  ;;  %v2174_v35 = vadd.f32 %v2173_v3, %v7273_v2 }
 0x1a0   : > { %v7316_v55 = vpop.f32.mrf.mxu0 }
 0x1a1   : > { %v7318_v43 = vpop.f32.mrf.mxu1  ;;  %v7320_v1 = vadd.f32 %v2286_v6, %v2174_v35  ;;  %3722 = vmatpush2.bf16.msra.mxu0 %v5506_v50 }
 0x1a2   : > { %v7322_v12 = vpop.f32.mrf.mxu0 }
 0x1a3   : > { %v7324_v63 = vpop.f32.mrf.mxu1 }
 0x1a4   : > { %v2181_v57 = vpop.f32.mrf.mxu0  ;;  %3724 = vmatmul.mubr.bf16.vlgmr.msra.gmra.mxu0 %v7099_v4 }
 0x1a5   : > { %v2294_v34 = vpop.f32.mrf.mxu1  ;;  %v2182_v8 = vadd.f32 %v2181_v57, %v7260_v21  ;;  %3733 = vmatprep.mubr.bf16.mxu0 %v7121_v58 }
 0x1a6   : > { %v2183_v15 = vpop.f32.mrf.mxu0 }
 0x1a7   : > { %v2296_v53 = vpop.f32.mrf.mxu1  ;;  %v7329_v28 = vadd.f32 %v2294_v34, %v2182_v8  ;;  %v2184_v49 = vadd.f32 %v2183_v15, %v7273_v2 }
 0x1a8   : > { %v7332_v47 = vpop.f32.mrf.mxu0 }
 0x1a9   : > { %v7334_v37 = vpop.f32.mrf.mxu1  ;;  %v7336_v14 = vadd.f32 %v2296_v53, %v2184_v49 }
 0x1aa   : > { %v7338_v52 = vpop.f32.mrf.mxu0 }
 0x1ab   : > { %v7340_v9 = vpop.f32.mrf.mxu1 }
 0x1ac   : > { %v2191_v4 = vpop.f32.mrf.mxu0  ;;  %3734 = vmatmul.mubr.bf16.gmra.mxu0 %v7126_v11 }
 0x1ad   : > { %v2304_v7 = vpop.f32.mrf.mxu1  ;;  %v2192_v58 = vadd.f32 %v2191_v4, %v7260_v21  ;;  %3743 = vmatprep.mubr.bf16.mxu0 %v7147_v46 }
 0x1ae   : > { %v2193_v20 = vpop.f32.mrf.mxu0 }
 0x1af   : > { %v2306_v31 = vpop.f32.mrf.mxu1  ;;  %v7345_v60 = vadd.f32 %v2304_v7, %v2192_v58  ;;  %v2194_v62 = vadd.f32 %v2193_v20, %v7273_v2 }
 0x1b0   : > { %v7348_v33 = vpop.f32.mrf.mxu0 }
 0x1b1   : > { %v7350_v25 = vpop.f32.mrf.mxu1  ;;  %v7352_v61 = vadd.f32 %v2306_v31, %v2194_v62 }
 0x1b2   : > { %v7354_v27 = vpop.f32.mrf.mxu0 }
 0x1b3   : > { %v7356_v23 = vpop.f32.mrf.mxu1 }
 0x1b4   : > { %v2201_v11 = vpop.f32.mrf.mxu0  ;;  %3744 = vmatmul.mubr.bf16.gmra.mxu0 %v7152_v36 }
 0x1b5   : > { %v2314_v38 = vpop.f32.mrf.mxu1  ;;  %v2202_v46 = vadd.f32 %v2201_v11, %v7260_v21  ;;  %3753 = vmatprep.mubr.bf16.mxu0 %v7173_v39 }
 0x1b6   : > { %v2203_v40 = vpop.f32.mrf.mxu0 }
 0x1b7   : > { %v2316_v42 = vpop.f32.mrf.mxu1  ;;  %v7361_v32 = vadd.f32 %v2314_v38, %v2202_v46  ;;  %v2204_v30 = vadd.f32 %v2203_v40, %v7273_v2 }
 0x1b8   : > { %v7364_v59 = vpop.f32.mrf.mxu0 }
 0x1b9   : > { %v7366_v50 = vpop.f32.mrf.mxu1  ;;  %v7368_v3 = vadd.f32 %v2316_v42, %v2204_v30 }
 0x1ba   : > { %v7370_v6 = vpop.f32.mrf.mxu0 }
 0x1bb   : > { %v7372_v35 = vpop.f32.mrf.mxu1 }
 0x1bc   : > { %v2211_v36 = vpop.f32.mrf.mxu0  ;;  %3754 = vmatmul.mubr.bf16.gmra.mxu0 %v7178_v17 }
 0x1bd   : > { %v2324_v57 = vpop.f32.mrf.mxu1  ;;  %v2212_v39 = vadd.f32 %v2211_v36, %v7260_v21  ;;  %3763 = vmatprep.mubr.bf16.mxu0 %v7199_v0 }
 0x1be   : > { %v2213_v34 = vpop.f32.mrf.mxu0 }
 0x1bf   : > { %v2326_v8 = vpop.f32.mrf.mxu1  ;;  %v7377_v15 = vadd.f32 %v2324_v57, %v2212_v39  ;;  %v2214_v53 = vadd.f32 %v2213_v34, %v7273_v2 }
 0x1c0   : > { %v7380_v49 = vpop.f32.mrf.mxu0 }
 0x1c1   : > { %v7382_v4 = vpop.f32.mrf.mxu1  ;;  %v7384_v7 = vadd.f32 %v2326_v8, %v2214_v53 }
 0x1c2   : > { %v7386_v58 = vpop.f32.mrf.mxu0 }
 0x1c3   : > { %v7388_v20 = vpop.f32.mrf.mxu1 }
 0x1c4   : > { %v2221_v17 = vpop.f32.mrf.mxu0  ;;  %3764 = vmatmul.mubr.bf16.gmra.mxu0 %v7204_v29 }
 0x1c5   : > { %v2334_v31 = vpop.f32.mrf.mxu1  ;;  %v2222_v0 = vadd.f32 %v2221_v17, %v7260_v21  ;;  %3773 = vmatprep.mubr.bf16.mxu0 %v7225_v16 }
 0x1c6   : > { %v2223_v62 = vpop.f32.mrf.mxu0 }
 0x1c7   : > { %v2336_v11 = vpop.f32.mrf.mxu1  ;;  %v7393_v38 = vadd.f32 %v2334_v31, %v2222_v0  ;;  %v2224_v46 = vadd.f32 %v2223_v62, %v7273_v2 }
 0x1c8   : > { %v7396_v40 = vpop.f32.mrf.mxu0 }
 0x1c9   : > { %v7398_v42 = vpop.f32.mrf.mxu1  ;;  %v7400_v30 = vadd.f32 %v2336_v11, %v2224_v46 }
 0x1ca   : > { %v7402_v36 = vpop.f32.mrf.mxu0 }
 0x1cb   : > { %v7404_v57 = vpop.f32.mrf.mxu1 }
 0x1cc   : > { %v2231_v29 = vpop.f32.mrf.mxu0  ;;  %3774 = vmatmul.mubr.bf16.gmra.mxu0 %v7230_v24  ;;  %v2166_v24 = vadd.f32 %v7286_v18, %v7260_v21 }
 0x1cd   : > { %v2344_v39 = vpop.f32.mrf.mxu1  ;;  %v2232_v16 = vadd.f32 %v2231_v29, %v7260_v21  ;;  %3783 = vmatprep.mubr.bf16.mxu0 %v7253_v5 }
 0x1ce   : > { %v2233_v34 = vpop.f32.mrf.mxu0 }
 0x1cf   : > { %v2346_v8 = vpop.f32.mrf.mxu1  ;;  %v7409_v53 = vadd.f32 %v2344_v39, %v2232_v16  ;;  %v2234_v17 = vadd.f32 %v2233_v34, %v7273_v2  ;;  %v2168_v39 = vadd.f32 %v7299_v54, %v7273_v2  ;;  %v2176_v54 = vadd.f32 %v7316_v55, %v7260_v21 }
 0x1d0   : > { %v7412_v31 = vpop.f32.mrf.mxu0 }
 0x1d1   : > { %8137 = vst [vmem:[#allocation9_spill] sm:$0xff] %v7409_v53  ;;  %8138 = vst [vmem:[#allocation10_spill] sm:$0xff] %v7412_v31  ;;  %v7414_v0 = vpop.f32.mrf.mxu1  ;;  %v7416_v62 = vadd.f32 %v2346_v8, %v2234_v17  ;;  %v2279_v8 = vadd.f32 %v7288_v19, %v2166_v24  ;;  %v2281_v18 = vadd.f32 %v7301_v51, %v2168_v39 }
 0x1d2   : > { %8139 = vst [vmem:[#allocation6_spill] sm:$0xff] %v7414_v0  ;;  %v7418_v11 = vpop.f32.mrf.mxu0 }
 0x1d3   : > { %8140 = vst [vmem:[#allocation7_spill] sm:$0xff] %v7416_v62  ;;  %8141 = vst [vmem:[#allocation5_spill] sm:$0xff] %v7418_v11  ;;  %v7420_v46 = vpop.f32.mrf.mxu1 }
 0x1d4   : > { %8142 = vst [vmem:[#allocation8_spill] sm:$0xff] %v7420_v46  ;;  %v2387_v5 = vpop.f32.mrf.mxu0  ;;  %3784 = vmatmul.mubr.bf16.gmra.mxu0 %v7265_v22 }
 0x1d5   : > { %v2500_v29 = vpop.f32.mrf.mxu1  ;;  %3793 = vmatprep.mubr.bf16.mxu0 %v7292_v45  ;;  %v2388_v48 = vadd.f32 %v2387_v5, %v7283_v10  ;;  %v2178_v10 = vadd.f32 %v7322_v12, %v7273_v2  ;;  %v2289_v5 = vadd.f32 %v7318_v43, %v2176_v54  ;;  %v5557_v12 = vld [vmem:[%s8092_s3 + $0x2e8] ss:$16 sps:$4 sm:$0xff]  }
 0x1d6   : > { %v2389_v16 = vpop.f32.mrf.mxu0 }
 0x1d7   : > { %v2502_v34 = vpop.f32.mrf.mxu1  ;;  %v2390_v17 = vadd.f32 %v2389_v16, %v7290_v13  ;;  %v2501_v11 = vadd.f32 %v2500_v29, %v2388_v48 }
 0x1d8   : > { %v2391_v26 = vpop.f32.mrf.mxu0 }
 0x1d9   : > { %v2504_v41 = vpop.f32.mrf.mxu1  ;;  %v2392_v46 = vadd.f32 %v2391_v26, %v2279_v8  ;;  %v2503_v62 = vadd.f32 %v2502_v34, %v2390_v17 }
 0x1da   : > { %v2393_v53 = vpop.f32.mrf.mxu0 }
 0x1db   : > { %v2506_v22 = vpop.f32.mrf.mxu1  ;;  %v2505_v45 = vadd.f32 %v2504_v41, %v2392_v46  ;;  %v2394_v0 = vadd.f32 %v2393_v53, %v2281_v18  ;;  %v2582_v39 = vmax.f32 %v2503_v62, 0.0  ;;  %v2581_v41 = vmax.f32 %v2501_v11, 0.0 }
 0x1dc   : > { %v2397_v31 = vpop.f32.mrf.mxu0  ;;  %3794 = vmatmul.mubr.bf16.gmra.mxu0 %v7297_v56  ;;  %v2291_v56 = vadd.f32 %v7324_v63, %v2178_v10 }
 0x1dd   : > { %v2510_v19 = vpop.f32.mrf.mxu1  ;;  %v2507_v13 = vadd.f32 %v2506_v22, %v2394_v0  ;;  %v2585_v24 = vmax.f32 %v2505_v45, 0.0  ;;  %v2398_v48 = vadd.f32 %v2397_v31, %v7313_v44  ;;  %v2186_v44 = vadd.f32 %v7332_v47, %v7260_v21  ;;  %v5560_v45 = vld [vmem:[%s8092_s3 + $0x2c8] ss:$16 sps:$4 sm:$0xff]  }
 0x1de   : > { %v2399_v51 = vpop.f32.mrf.mxu0  ;;  %v2188_v22 = vadd.f32 %v7338_v52, %v7273_v2 }
 0x1df   : > { %v2512_v26 = vpop.f32.mrf.mxu1  ;;  %v2586_v16 = vmax.f32 %v2507_v13, 0.0  ;;  %v2400_v55 = vadd.f32 %v2399_v51, %v7320_v1  ;;  %v7446_v0 = vpack.c.bf16 %v2585_v24, %v2581_v41  ;;  %v5562_v1 = vld [vmem:[%s8092_s3 + $0x2cc] ss:$16 sps:$4 sm:$0xff]   ;;  %v2511_v8 = vadd.f32 %v2510_v19, %v2398_v48 }
 0x1e0   : > { %v2401_v53 = vpop.f32.mrf.mxu0  ;;  %v5565_v19 = vld [vmem:[%s8092_s3 + $0x2ac] ss:$16 sps:$4 sm:$0xff]   ;;  %v2299_v24 = vadd.f32 %v7334_v37, %v2186_v44  ;;  %v2301_v41 = vadd.f32 %v7340_v9, %v2188_v22 }
 0x1e1   : > { %v2514_v46 = vpop.f32.mrf.mxu1  ;;  %v2402_v29 = vadd.f32 %v2401_v53, %v2289_v5  ;;  %v7441_v34 = vpack.c.bf16 %v2586_v16, %v2582_v39  ;;  %v2513_v31 = vadd.f32 %v2512_v26, %v2400_v55  ;;  %v2589_v5 = vmax.f32 %v2511_v8, 0.0 }
 0x1e2   : > { %v2403_v43 = vpop.f32.mrf.mxu0 }
 0x1e3   : > { %v2516_v62 = vpop.f32.mrf.mxu1  ;;  %v2515_v63 = vadd.f32 %v2514_v46, %v2402_v29  ;;  %v2404_v11 = vadd.f32 %v2403_v43, %v2291_v56  ;;  %3610 = vmatprep.mubr.bf16.mxu1 %v7441_v34  ;;  %v2590_v51 = vmax.f32 %v2513_v31, 0.0  ;;  %v5563_v46 = vld [vmem:[%s8092_s3 + $0x2a8] ss:$16 sps:$4 sm:$0xff]   ;;  %v2198_v31 = vadd.f32 %v7354_v27, %v7273_v2 }
 0x1e4   : > { %v2407_v17 = vpop.f32.mrf.mxu0  ;;  %3611 = vmatmul.mubr.bf16.vlgmr.msra.gmra.mxu1 %v7446_v0 }
 0x1e5   : > { %v2520_v18 = vpop.f32.mrf.mxu1  ;;  %v2517_v54 = vadd.f32 %v2516_v62, %v2404_v11  ;;  %3805 = vmatpush1.bf16.msra.mxu1 %v5557_v12  ;;  %v2593_v47 = vmax.f32 %v2515_v63, 0.0  ;;  %v2408_v39 = vadd.f32 %v2407_v17, %v7329_v28  ;;  %v5568_v28 = vld [vmem:[%s8092_s3 + $0x28c] ss:$16 sps:$4 sm:$0xff]   ;;  %v5566_v11 = vld [vmem:[%s8092_s3 + $0x288] ss:$16 sps:$4 sm:$0xff]  }
 0x1e6   : > { %v2409_v10 = vpop.f32.mrf.mxu0  ;;  %3806 = vmatprep.subr.bf16.mxu1 %v5562_v1 }
 0x1e7   : > { %v2522_v13 = vpop.f32.mrf.mxu1  ;;  %v2594_v26 = vmax.f32 %v2517_v54, 0.0  ;;  %v2410_v52 = vadd.f32 %v2409_v10, %v7336_v14  ;;  %v7472_v37 = vpack.c.bf16 %v2593_v47, %v2589_v5  ;;  %v2196_v14 = vadd.f32 %v7348_v33, %v7260_v21 }
 0x1e8   : > { %v2411_v16 = vpop.f32.mrf.mxu0  ;;  %v2521_v62 = vadd.f32 %v2520_v18, %v2408_v39  ;;  %v5571_v18 = vld [vmem:[%s8092_s3 + $0x26c] ss:$16 sps:$4 sm:$0xff]  }
 0x1e9   : > { %v2524_v55 = vpop.f32.mrf.mxu1  ;;  %v2412_v48 = vadd.f32 %v2411_v16, %v2299_v24  ;;  %3807 = vmatpush1.bf16.msra.mxu1 %v5560_v45  ;;  %v7467_v53 = vpack.c.bf16 %v2594_v26, %v2590_v51  ;;  %v2523_v9 = vadd.f32 %v2522_v13, %v2410_v52  ;;  %v2309_v22 = vadd.f32 %v7350_v25, %v2196_v14  ;;  %v5569_v52 = vld [vmem:[%s8092_s3 + $0x268] ss:$16 sps:$4 sm:$0xff]  }
 0x1ea   : > { %v2413_v56 = vpop.f32.mrf.mxu0  ;;  %3808 = vmatprep.subr.bf16.mxu1 %v5565_v19  ;;  %v2597_v47 = vmax.f32 %v2521_v62, 0.0  ;;  %v2311_v24 = vadd.f32 %v7356_v23, %v2198_v31 }
 0x1eb   : > { %v2526_v29 = vpop.f32.mrf.mxu1  ;;  %v2525_v12 = vadd.f32 %v2524_v55, %v2412_v48  ;;  %v2414_v43 = vadd.f32 %v2413_v56, %v2301_v41  ;;  %3620 = vmatprep.mubr.bf16.mxu1 %v7467_v53  ;;  %v2598_v54 = vmax.f32 %v2523_v9, 0.0  ;;  %v2208_v56 = vadd.f32 %v7370_v6, %v7273_v2 }
 0x1ec   : > { %v2417_v1 = vpop.f32.mrf.mxu0  ;;  %3621 = vmatmul.mubr.bf16.gmra.mxu1 %v7472_v37 }
 0x1ed   : > { %v2530_v44 = vpop.f32.mrf.mxu1  ;;  %v2527_v63 = vadd.f32 %v2526_v29, %v2414_v43  ;;  %3809 = vmatpush1.bf16.msra.mxu1 %v5563_v46  ;;  %v2601_v33 = vmax.f32 %v2525_v12, 0.0  ;;  %v2418_v10 = vadd.f32 %v2417_v1, %v7345_v60  ;;  %v5574_v60 = vld [vmem:[%s8092_s3 + $0x24c] ss:$16 sps:$4 sm:$0xff]  }
 0x1ee   : > { %v2419_v8 = vpop.f32.mrf.mxu0  ;;  %3810 = vmatprep.subr.bf16.mxu1 %v5568_v28  ;;  %v5572_v28 = vld [vmem:[%s8092_s3 + $0x248] ss:$16 sps:$4 sm:$0xff]   ;;  %v5577_v12 = vld [vmem:[%s8092_s3 + $0x22c] ss:$16 sps:$4 sm:$0xff]  }
 0x1ef   : > { %v2532_v17 = vpop.f32.mrf.mxu1  ;;  %v2602_v45 = vmax.f32 %v2527_v63, 0.0  ;;  %v2420_v27 = vadd.f32 %v2419_v8, %v7352_v61  ;;  %v7498_v25 = vpack.c.bf16 %v2601_v33, %v2597_v47  ;;  %v2206_v61 = vadd.f32 %v7364_v59, %v7260_v21 }
 0x1f0   : > { %v2421_v13 = vpop.f32.mrf.mxu0  ;;  %v2531_v41 = vadd.f32 %v2530_v44, %v2418_v10  ;;  %v2321_v33 = vadd.f32 %v7372_v35, %v2208_v56 }
 0x1f1   : > { %v2534_v19 = vpop.f32.mrf.mxu1  ;;  %v2422_v51 = vadd.f32 %v2421_v13, %v2309_v22  ;;  %3811 = vmatpush1.bf16.msra.mxu1 %v5566_v11  ;;  %v7493_v26 = vpack.c.bf16 %v2602_v45, %v2598_v54  ;;  %v2533_v23 = vadd.f32 %v2532_v17, %v2420_v27  ;;  %v2319_v43 = vadd.f32 %v7366_v50, %v2206_v61 }
 0x1f2   : > { %v2423_v5 = vpop.f32.mrf.mxu0  ;;  %3812 = vmatprep.subr.bf16.mxu1 %v5571_v18  ;;  %v2605_v44 = vmax.f32 %v2531_v41, 0.0  ;;  %v5575_v18 = vld [vmem:[%s8092_s3 + $0x228] ss:$16 sps:$4 sm:$0xff]  }
 0x1f3   : > { %v2536_v39 = vpop.f32.mrf.mxu1  ;;  %v2535_v16 = vadd.f32 %v2534_v19, %v2422_v51  ;;  %v2424_v55 = vadd.f32 %v2423_v5, %v2311_v24  ;;  %3630 = vmatprep.mubr.bf16.mxu1 %v7493_v26  ;;  %v2606_v62 = vmax.f32 %v2533_v23, 0.0  ;;  %v2218_v19 = vadd.f32 %v7386_v58, %v7273_v2  ;;  %v5578_v51 = vld [vmem:[%s8092_s3 + $0x208] ss:$16 sps:$4 sm:$0xff]  }
 0x1f4   : > { %v2427_v48 = vpop.f32.mrf.mxu0  ;;  %3631 = vmatmul.mubr.bf16.gmra.mxu1 %v7498_v25 }
 0x1f5   : > { %v2540_v46 = vpop.f32.mrf.mxu1  ;;  %v2537_v29 = vadd.f32 %v2536_v39, %v2424_v55  ;;  %3813 = vmatpush1.bf16.msra.mxu1 %v5569_v52  ;;  %v2609_v59 = vmax.f32 %v2535_v16, 0.0  ;;  %v2428_v31 = vadd.f32 %v2427_v48, %v7361_v32  ;;  %v5580_v32 = vld [vmem:[%s8092_s3 + $0x20c] ss:$16 sps:$4 sm:$0xff]  }
 0x1f6   : > { %v2429_v14 = vpop.f32.mrf.mxu0  ;;  %3814 = vmatprep.subr.bf16.mxu1 %v5574_v60  ;;  %v5583_v39 = vld [vmem:[%s8092_s3 + $0x3ec] ss:$16 sps:$4 sm:$0xff]  }
 0x1f7   : > { %v2542_v9 = vpop.f32.mrf.mxu1  ;;  %v2610_v1 = vmax.f32 %v2537_v29, 0.0  ;;  %v2430_v6 = vadd.f32 %v2429_v14, %v7368_v3  ;;  %v7524_v50 = vpack.c.bf16 %v2609_v59, %v2605_v44  ;;  %v2216_v3 = vadd.f32 %v7380_v49, %v7260_v21 }
 0x1f8   : > { %v2431_v63 = vpop.f32.mrf.mxu0  ;;  %v2541_v47 = vadd.f32 %v2540_v46, %v2428_v31  ;;  %v2331_v46 = vadd.f32 %v7388_v20, %v2218_v19  ;;  %v5584_v31 = vld [vmem:[%s8092_s3 + $0x3c8] ss:$16 sps:$4 sm:$0xff]  }
 0x1f9   : > { %v2544_v11 = vpop.f32.mrf.mxu1  ;;  %v2432_v8 = vadd.f32 %v2431_v63, %v2319_v43  ;;  %3815 = vmatpush1.bf16.msra.mxu1 %v5572_v28  ;;  %v7519_v17 = vpack.c.bf16 %v2610_v1, %v2606_v62  ;;  %v2543_v35 = vadd.f32 %v2542_v9, %v2430_v6  ;;  %v2329_v60 = vadd.f32 %v7382_v4, %v2216_v3  ;;  %v5581_v28 = vld [vmem:[%s8092_s3 + $0x3e8] ss:$16 sps:$4 sm:$0xff]  }
 0x1fa   : > { %v2433_v22 = vpop.f32.mrf.mxu0  ;;  %3816 = vmatprep.subr.bf16.mxu1 %v5577_v12  ;;  %v2613_v16 = vmax.f32 %v2541_v47, 0.0  ;;  %v2228_v6 = vadd.f32 %v7402_v36, %v7273_v2 }
 0x1fb   : > { %v2546_v54 = vpop.f32.mrf.mxu1  ;;  %v2545_v45 = vadd.f32 %v2544_v11, %v2432_v8  ;;  %v2434_v27 = vadd.f32 %v2433_v22, %v2321_v33  ;;  %3640 = vmatprep.mubr.bf16.mxu1 %v7519_v17  ;;  %v2614_v61 = vmax.f32 %v2543_v35, 0.0  ;;  %v5589_v33 = vld [vmem:[%s8092_s3 + $0x3ac] ss:$16 sps:$4 sm:$0xff]  }
 0x1fc   : > { %v2437_v10 = vpop.f32.mrf.mxu0  ;;  %3641 = vmatmul.mubr.bf16.gmra.mxu1 %v7524_v50 }
 0x1fd   : > { %v2550_v13 = vpop.f32.mrf.mxu1  ;;  %v2547_v24 = vadd.f32 %v2546_v54, %v2434_v27  ;;  %3817 = vmatpush1.bf16.msra.mxu1 %v5575_v18  ;;  %v2617_v49 = vmax.f32 %v2545_v45, 0.0  ;;  %v2438_v55 = vadd.f32 %v2437_v10, %v7377_v15  ;;  %v5586_v15 = vld [vmem:[%s8092_s3 + $0x3cc] ss:$16 sps:$4 sm:$0xff]   ;;  %v2341_v45 = vadd.f32 %v7404_v57, %v2228_v6  ;;  %v5587_v10 = vld [vmem:[%s8092_s3 + $0x3a8] ss:$16 sps:$4 sm:$0xff]  }
 0x1fe   : > { %v2439_v52 = vpop.f32.mrf.mxu0  ;;  %3818 = vmatprep.subr.bf16.mxu1 %v5580_v32 }
 0x1ff   : > { %v2552_v5 = vpop.f32.mrf.mxu1  ;;  %v2618_v23 = vmax.f32 %v2547_v24, 0.0  ;;  %v2440_v58 = vadd.f32 %v2439_v52, %v7384_v7  ;;  %v7550_v4 = vpack.c.bf16 %v2617_v49, %v2613_v16  ;;  %v2226_v7 = vadd.f32 %v7396_v40, %v7260_v21 }
 0x200   : > { %v2441_v41 = vpop.f32.mrf.mxu0  ;;  %v2551_v43 = vadd.f32 %v2550_v13, %v2438_v55 }
 0x201   : > { %v2554_v48 = vpop.f32.mrf.mxu1  ;;  %v7545_v56 = vpack.c.bf16 %v2618_v23, %v2614_v61  ;;  %v2442_v29 = vadd.f32 %v2441_v41, %v2329_v60  ;;  %3819 = vmatpush1.bf16.msra.mxu1 %v5578_v51  ;;  %v2553_v20 = vadd.f32 %v2552_v5, %v2440_v58  ;;  %v2339_v8 = vadd.f32 %v7398_v42, %v2226_v7  ;;  %v8144_v60 = vld [vmem:[#allocation5_spill] sm:$0xff]  ;;  %v5590_v58 = vld [vmem:[%s8092_s3 + $0x388] ss:$16 sps:$4 sm:$0xff]   ;;  %v5595_v41 = vld [vmem:[%s8092_s3 + $0x36c] ss:$16 sps:$4 sm:$0xff]  }
 0x202   : > { %v2443_v59 = vpop.f32.mrf.mxu0  ;;  %3820 = vmatprep.subr.bf16.mxu1 %v5583_v39  ;;  %v2621_v54 = vmax.f32 %v2551_v43, 0.0  ;;  %v2238_v61 = vadd.f32 %v8144_v60, %v7273_v2  ;;  %v8148_v43 = vld [vmem:[#allocation8_spill] sm:$0xff] }
 0x203   : > { %v2556_v14 = vpop.f32.mrf.mxu1  ;;  %v2555_v9 = vadd.f32 %v2554_v48, %v2442_v29  ;;  %v2444_v12 = vadd.f32 %v2443_v59, %v2331_v46  ;;  %3650 = vmatprep.mubr.bf16.mxu1 %v7545_v56  ;;  %v2622_v18 = vmax.f32 %v2553_v20, 0.0  ;;  %v8145_v48 = vld [vmem:[#allocation6_spill] sm:$0xff]  ;;  %v8146_v59 = vld [vmem:[#allocation7_spill] sm:$0xff]  ;;  %v5613_v60 = vld [vmem:[%s8094_s5 + $0x58] sm:$0xff]  }
 0x204   : > { %v2447_v62 = vpop.f32.mrf.mxu0  ;;  %3651 = vmatmul.mubr.bf16.gmra.mxu1 %v7550_v4 }
 0x205   : > { %v2560_v1 = vpop.f32.mrf.mxu1  ;;  %v2557_v44 = vadd.f32 %v2556_v14, %v2444_v12  ;;  %3821 = vmatpush2.bf16.msra.mxu1 %v5581_v28  ;;  %v2625_v40 = vmax.f32 %v2555_v9, 0.0  ;;  %v2448_v32 = vadd.f32 %v2447_v62, %v7393_v38  ;;  %v5592_v38 = vld [vmem:[%s8092_s3 + $0x38c] ss:$16 sps:$4 sm:$0xff]   ;;  %v2351_v62 = vadd.f32 %v8148_v43, %v2238_v61 }
 0x206   : > { %v2449_v63 = vpop.f32.mrf.mxu0  ;;  %3822 = vmatprep.subr.bf16.mxu1 %v5586_v15  ;;  %v8147_v15 = vld [vmem:[#allocation9_spill] sm:$0xff]  ;;  %v5605_v12 = vld [vmem:[%s8094_s5 + $0x78] sm:$0xff]  }
 0x207   : > { %v2562_v11 = vpop.f32.mrf.mxu1  ;;  %v2626_v22 = vmax.f32 %v2557_v44, 0.0  ;;  %v2450_v36 = vadd.f32 %v2449_v63, %v7400_v30  ;;  %v7576_v42 = vpack.c.bf16 %v2625_v40, %v2621_v54  ;;  %v8143_v30 = vld [vmem:[#allocation10_spill] sm:$0xff]  ;;  %v2561_v52 = vadd.f32 %v2560_v1, %v2448_v32  ;;  %4948 = vmatprep.subr.bf16.mxu0 %v5605_v12  ;;  %v5607_v54 = vld [vmem:[%s8094_s5 + $0x70] sm:$0xff]   ;;  %v5630_v12 = vld [vmem:[%s8094_s5 + $0x98] sm:$0xff]  }
 0x208   : > { %v2451_v3 = vpop.f32.mrf.mxu0  ;;  %v2236_v57 = vadd.f32 %v8143_v30, %v7260_v21  ;;  %v5593_v44 = vld [vmem:[%s8092_s3 + $0x368] ss:$16 sps:$4 sm:$0xff]  }
 0x209   : > { %v2564_v35 = vpop.f32.mrf.mxu1  ;;  %v7571_v27 = vpack.c.bf16 %v2626_v22, %v2622_v18  ;;  %v2452_v47 = vadd.f32 %v2451_v3, %v2339_v8  ;;  %3823 = vmatpush2.bf16.msra.mxu1 %v5584_v31  ;;  %v2563_v24 = vadd.f32 %v2562_v11, %v2450_v36  ;;  %v2629_v14 = vmax.f32 %v2561_v52, 0.0  ;;  %v5606_v31 = vld [vmem:[%s8094_s5 + $0x38] sm:$0xff]   ;;  %v5611_v52 = vld [vmem:[%s8094_s5 + $0x60] sm:$0xff]  }
 0x20a   : > { %v2453_v13 = vpop.f32.mrf.mxu0  ;;  %3824 = vmatprep.subr.bf16.mxu1 %v5589_v33  ;;  %v2349_v46 = vadd.f32 %v8145_v48, %v2236_v57  ;;  %v5598_v11 = vld [vmem:[%s8092_s3 + $0x34c] ss:$16 sps:$4 sm:$0xff]   ;;  %4949 = vmatpush3.bf16.msra.mxu0 %v5606_v31  ;;  %v5596_v3 = vld [vmem:[%s8092_s3 + $0x348] ss:$16 sps:$4 sm:$0xff]  }
 0x20b   : > { %v2566_v19 = vpop.f32.mrf.mxu1  ;;  %v2565_v51 = vadd.f32 %v2564_v35, %v2452_v47  ;;  %v2454_v49 = vadd.f32 %v2453_v13, %v2341_v45  ;;  %3660 = vmatprep.mubr.bf16.mxu1 %v7571_v27  ;;  %v2630_v29 = vmax.f32 %v2563_v24, 0.0  ;;  %v5608_v35 = vld [vmem:[%s8094_s5 + $0x30] sm:$0xff]   ;;  %v5601_v47 = vld [vmem:[%s8092_s3 + $0x32c] ss:$16 sps:$4 sm:$0xff]   ;;  %4950 = vmatprep.subr.bf16.mxu0 %v5607_v54  ;;  %v5599_v57 = vld [vmem:[%s8092_s3 + $0x328] ss:$16 sps:$4 sm:$0xff]  }
 0x20c   : > { %v2457_v5 = vpop.f32.mrf.mxu0  ;;  %3661 = vmatmul.mubr.bf16.gmra.mxu1 %v7576_v42  ;;  %v5610_v24 = vld [vmem:[%s8094_s5 + $0x28] sm:$0xff]  }
 0x20d   : > { %v2570_v39 = vpop.f32.mrf.mxu1  ;;  %v2567_v23 = vadd.f32 %v2566_v19, %v2454_v49  ;;  %3825 = vmatpush2.bf16.msra.mxu1 %v5587_v10  ;;  %v2633_v21 = vmax.f32 %v2565_v51, 0.0  ;;  %v2458_v7 = vadd.f32 %v2457_v5, %v8147_v15  ;;  %v5604_v49 = vld [vmem:[%s8092_s3 + $0x30c] ss:$16 sps:$4 sm:$0xff]   ;;  %v5602_v5 = vld [vmem:[%s8092_s3 + $0x308] ss:$16 sps:$4 sm:$0xff]  }
 0x20e   : > { %v2459_v16 = vpop.f32.mrf.mxu0  ;;  %3826 = vmatprep.subr.bf16.mxu1 %v5592_v38  ;;  %4951 = vmatpush3.bf16.msra.mxu0 %v5608_v35  ;;  %v5609_v38 = vld [vmem:[%s8094_s5 + $0x68] sm:$0xff]  }
 0x20f   : > { %v2572_v55 = vpop.f32.mrf.mxu1  ;;  %v2634_v28 = vmax.f32 %v2567_v23, 0.0  ;;  %v2460_v2 = vadd.f32 %v2459_v16, %v8146_v59  ;;  %v7608_v40 = vpack.c.bf16 %v2633_v21, %v2629_v14  ;;  %v2571_v22 = vadd.f32 %v2570_v39, %v2458_v7  ;;  %4952 = vmatprep.subr.bf16.mxu0 %v5609_v38  ;;  %v5612_v39 = vld [vmem:[%s8094_s5 + $0x20] sm:$0xff]   ;;  %v5615_v23 = vld [vmem:[%s8094_s5 + $0x50] sm:$0xff]   ;;  %v5617_v16 = vld [vmem:[%s8094_s5 + $0x48] sm:$0xff]  }
 0x210   : > { %v2461_v20 = vpop.f32.mrf.mxu0  ;;  %v5624_v59 = vld [vmem:[%s8094_s5 + $0xb0] sm:$0xff]   ;;  %v5626_v14 = vld [vmem:[%s8094_s5 + $0xa8] sm:$0xff]   ;;  %v5628_v7 = vld [vmem:[%s8094_s5 + $0xa0] sm:$0xff]  }
 0x211   : > { %v2574_v9 = vpop.f32.mrf.mxu1  ;;  %v7600_v1 = vpack.c.bf16 %v2634_v28, %v2630_v29  ;;  %v2462_v6 = vadd.f32 %v2461_v20, %v2349_v46  ;;  %3827 = vmatpush2.bf16.msra.mxu1 %v5590_v58  ;;  %v2573_v33 = vadd.f32 %v2572_v55, %v2460_v2  ;;  %v2637_v19 = vmax.f32 %v2571_v22, 0.0  ;;  %v5616_v58 = vld [vmem:[%s8094_s5 + $0x10] sm:$0xff]   ;;  %v5622_v29 = vld [vmem:[%s8094_s5 + $0xb8] sm:$0xff]  }
 0x212   : > { %v2463_v63 = vpop.f32.mrf.mxu0  ;;  %3828 = vmatprep.subr.bf16.mxu1 %v5595_v41  ;;  %4953 = vmatpush3.bf16.msra.mxu0 %v5610_v24  ;;  %v5620_v41 = vld [vmem:[%s8094_s5] sm:$0xff]   ;;  %v8149_v24 = vld [vmem:[#allocation11_spill] sm:$0xff] }
 0x213   : > { %v2575_v8 = vadd.f32 %v2574_v9, %v2462_v6  ;;  %v2464_v18 = vadd.f32 %v2463_v63, %v2351_v62  ;;  %3670 = vmatprep.mubr.bf16.mxu1 %v7600_v1  ;;  %v2576_v36 = vpop.f32.mrf.mxu1  ;;  %v2638_v10 = vmax.f32 %v2573_v33, 0.0  ;;  %4954 = vmatprep.subr.bf16.mxu0 %v5611_v52  ;;  %v5629_v9 = vld [vmem:[%s8094_s5 + $0xd8] sm:$0xff]   ;;  %v5632_v6 = vld [vmem:[%s8094_s5 + $0x90] sm:$0xff]   ;;  %v5634_v63 = vld [vmem:[%s8094_s5 + $0x88] sm:$0xff]   ;;  %v8151_v52 = vsub.s32 0, %v8149_v24 }
 0x214   : > { %3671 = vmatmul.mubr.bf16.gmra.mxu1 %v7608_v40  ;;  %v5635_v33 = vld [vmem:[%s8094_s5 + $0xc0] sm:$0xff]  }
 0x215   : > { %v2577_v32 = vadd.f32 %v2576_v36, %v2464_v18  ;;  %3829 = vmatpush2.bf16.msra.mxu1 %v5593_v44  ;;  %v2641_v45 = vmax.f32 %v2575_v8, 0.0  ;;  %v5636_v8 = vld [vmem:[%s8094_s5 + $0x80] sm:$0xff]  }
 0x216   : > { %3830 = vmatprep.subr.bf16.mxu1 %v5598_v11  ;;  %4955 = vmatpush3.bf16.msra.mxu0 %v5612_v39 }
 0x217   : > { %v2642_v13 = vmax.f32 %v2577_v32, 0.0  ;;  %v7638_v51 = vpack.c.bf16 %v2641_v45, %v2637_v19  ;;  %4956 = vmatprep.subr.bf16.mxu0 %v5613_v60 }
 0x219   : > { %v7630_v30 = vpack.c.bf16 %v2642_v13, %v2638_v10  ;;  %3831 = vmatpush2.bf16.msra.mxu1 %v5596_v3 }
 0x21a   : > { %3832 = vmatprep.subr.bf16.mxu1 %v5601_v47 }
 0x21b   : > { %3680 = vmatprep.mubr.bf16.mxu1 %v7630_v30 }
 0x21c   : > { %3681 = vmatmul.mubr.bf16.gmra.mxu1 %v7638_v51 }
 0x21d   : > { %3833 = vmatpush2.bf16.msra.mxu1 %v5599_v57  ;;  %3836 = vmatprep.mubr.bf16.mxu1 %v7441_v34  ;;  %v5614_v34 = vld [vmem:[%s8094_s5 + $0x18] sm:$0xff]  }
 0x21e   : > { %3834 = vmatprep.subr.bf16.mxu1 %v5604_v49  ;;  %4957 = vmatpush3.bf16.msra.mxu0 %v5614_v34 }
 0x21f   : > { %4958 = vmatprep.subr.bf16.mxu0 %v5615_v23 }
 0x221   : > { %3835 = vmatpush2.bf16.msra.mxu1 %v5602_v5 }
 0x222   : > { %4959 = vmatpush3.bf16.msra.mxu0 %v5616_v58 }
 0x223   : > { %4960 = vmatprep.subr.bf16.mxu0 %v5617_v16 }
 0x224   : > { %v7661_v61 = vpop.f32.mrf.mxu0  ;;  %3837 = vmatmul.mubr.bf16.vlgmr.msra.gmra.mxu1 %v7446_v0  ;;  %v5618_v0 = vld [vmem:[%s8094_s5 + $0x8] sm:$0xff]  }
 0x225   : > { %3846 = vmatprep.mubr.bf16.mxu1 %v7467_v53  ;;  %v5619_v53 = vld [vmem:[%s8094_s5 + $0x40] sm:$0xff]  }
 0x226   : > { %v7671_v21 = vpop.f32.mrf.mxu0  ;;  %4961 = vmatpush3.bf16.msra.mxu0 %v5618_v0 }
 0x227   : > { %4962 = vmatprep.subr.bf16.mxu0 %v5619_v53 }
 0x228   : > { %v7679_v55 = vpop.f32.mrf.mxu0 }
 0x22a   : > { %v7689_v48 = vpop.f32.mrf.mxu0  ;;  %4963 = vmatpush3.bf16.msra.mxu0 %v5620_v41 }
 0x22c   : > { %3847 = vmatmul.mubr.bf16.gmra.mxu1 %v7472_v37  ;;  %v7691_v46 = vpop.f32.mrf.mxu0 }
 0x22d   : > { %3856 = vmatprep.mubr.bf16.mxu1 %v7493_v26  ;;  %v5621_v26 = vld [vmem:[%s8094_s5 + $0xf8] sm:$0xff]  }
 0x22e   : > { %v7695_v37 = vpop.f32.mrf.mxu0  ;;  %5012 = vmatprep.subr.bf16.mxu1 %v5621_v26 }
 0x22f   : > { %5013 = vmatpush3.bf16.msra.mxu1 %v5622_v29 }
 0x230   : > { %v7703_v28 = vpop.f32.mrf.mxu0 }
 0x234   : > { %3857 = vmatmul.mubr.bf16.gmra.mxu1 %v7498_v25  ;;  %v7707_v25 = vpop.f32.mrf.mxu0 }
 0x235   : > { %3866 = vmatprep.mubr.bf16.mxu1 %v7519_v17  ;;  %v5623_v17 = vld [vmem:[%s8094_s5 + $0xf0] sm:$0xff]  }
 0x236   : > { %5014 = vmatprep.subr.bf16.mxu1 %v5623_v17  ;;  %v7715_v2 = vpop.f32.mrf.mxu0 }
 0x237   : > { %5015 = vmatpush3.bf16.msra.mxu1 %v5624_v59 }
 0x23c   : > { %3867 = vmatmul.mubr.bf16.gmra.mxu1 %v7524_v50  ;;  %v7719_v50 = vpop.f32.mrf.mxu0 }
 0x23d   : > { %3876 = vmatprep.mubr.bf16.mxu1 %v7545_v56  ;;  %v5625_v56 = vld [vmem:[%s8094_s5 + $0xe8] sm:$0xff]  }
 0x23e   : > { %5016 = vmatprep.subr.bf16.mxu1 %v5625_v56  ;;  %v7727_v15 = vpop.f32.mrf.mxu0 }
 0x23f   : > { %5017 = vmatpush3.bf16.msra.mxu1 %v5626_v14 }
 0x244   : > { %3877 = vmatmul.mubr.bf16.gmra.mxu1 %v7550_v4  ;;  %v7731_v4 = vpop.f32.mrf.mxu0 }
 0x245   : > { %3886 = vmatprep.mubr.bf16.mxu1 %v7571_v27  ;;  %v5627_v27 = vld [vmem:[%s8094_s5 + $0xe0] sm:$0xff]  }
 0x246   : > { %5018 = vmatprep.subr.bf16.mxu1 %v5627_v27  ;;  %v7739_v20 = vpop.f32.mrf.mxu0 }
 0x247   : > { %5019 = vmatpush3.bf16.msra.mxu1 %v5628_v7 }
 0x248   : > { %5020 = vmatprep.subr.bf16.mxu1 %v5629_v9 }
 0x24b   : > { %5021 = vmatpush3.bf16.msra.mxu1 %v5630_v12 }
 0x24c   : > { %3887 = vmatmul.mubr.bf16.gmra.mxu1 %v7576_v42  ;;  %v7743_v42 = vpop.f32.mrf.mxu0 }
 0x24d   : > { %3896 = vmatprep.mubr.bf16.mxu1 %v7600_v1  ;;  %v5631_v1 = vld [vmem:[%s8094_s5 + $0xd0] sm:$0xff]  }
 0x24e   : > { %v7751_v43 = vpop.f32.mrf.mxu0  ;;  %5022 = vmatprep.subr.bf16.mxu1 %v5631_v1 }
 0x24f   : > { %5023 = vmatpush3.bf16.msra.mxu1 %v5632_v6 }
 0x250   : > { %v7754_v62 = vpop.f32.mrf.mxu0 }
 0x252   : > { %v7762_v44 = vpop.f32.mrf.mxu0 }
 0x254   : > { %3897 = vmatmul.mubr.bf16.gmra.mxu1 %v7608_v40  ;;  %v7764_v31 = vpop.f32.mrf.mxu0  ;;  %v5633_v40 = vld [vmem:[%s8094_s5 + $0xc8] sm:$0xff]  }
 0x255   : > { %3906 = vmatprep.mubr.bf16.mxu1 %v7630_v30  ;;  %5024 = vmatprep.subr.bf16.mxu1 %v5633_v40  ;;  %v7809_v30 = vld [vmem:[%s8093_s4] sm:$0xf] }
 0x256   : > { %v7772_v11 = vpop.f32.mrf.mxu0  ;;  %5025 = vmatpush3.bf16.msra.mxu1 %v5634_v63  ;;  %v7821_v5 = vrot.slane %v7809_v30, %v8151_v52 }
 0x257   : > { %5026 = vmatprep.subr.bf16.mxu1 %v5635_v33 }
 0x258   : > { %v7780_v18 = vpop.f32.mrf.mxu0  ;;  %v3504_v58 = vadd.f32 %v7679_v55, %v7821_v5  ;;  %v3500_v16 = vadd.f32 %v7661_v61, %v7821_v5  ;;  %v3510_v6 = vadd.f32 %v7691_v46, %v7821_v5 }
 0x25a   : > { %5027 = vmatpush3.bf16.msra.mxu1 %v5636_v8  ;;  %v7782_v22 = vpop.f32.mrf.mxu0 }
 0x25c   : > { %3907 = vmatmul.mubr.bf16.gmra.mxu1 %v7638_v51  ;;  %v7784_v36 = vpop.f32.mrf.mxu0  ;;  %v8150_v51 = vsub.s32 1, %v8149_v24 }
 0x25e   : > { %v7786_v54 = vpop.f32.mrf.mxu0  ;;  %v7816_v49 = vrot.slane %v7809_v30, %v8150_v51 }
 0x260   : > { %v7788_v32 = vpop.f32.mrf.mxu0  ;;  %v3502_v23 = vadd.f32 %v7671_v21, %v7816_v49  ;;  %v3506_v53 = vadd.f32 %v7689_v48, %v7816_v49  ;;  %v3512_v61 = vadd.f32 %v7695_v37, %v7816_v49  ;;  %v3514_v48 = vadd.f32 %v7703_v28, %v7821_v5 }
 0x261   : > { %v3516_v33 = vadd.f32 %v7707_v25, %v7816_v49  ;;  %v3522_v25 = vadd.f32 %v7719_v50, %v7816_v49 }
 0x262   : > { %v7790_v3 = vpop.f32.mrf.mxu0 }
 0x264   : > { %v7792_v35 = vpop.f32.mrf.mxu0 }
 0x266   : > { %v7794_v45 = vpop.f32.mrf.mxu0 }
 0x268   : > { %v7796_v47 = vpop.f32.mrf.mxu0 }
 0x26a   : > { %v7798_v10 = vpop.f32.mrf.mxu0 }
 0x26c   : > { %v7800_v13 = vpop.f32.mrf.mxu0 }
 0x26e   : > { %v7802_v19 = vpop.f32.mrf.mxu0 }
 0x270   : > { %v7804_v38 = vpop.f32.mrf.mxu0 }
 0x272   : > { %v7811_v57 = vpop.f32.mrf.mxu0 }
 0x274   : > { %v7823_v60 = vpop.f32.mrf.mxu0 }
 0x276   : > { %v7833_v29 = vpop.f32.mrf.mxu0 }
 0x278   : > { %v7835_v9 = vpop.f32.mrf.mxu0 }
 0x27a   : > { %v7845_v52 = vpop.f32.mrf.mxu0 }
 0x2a4   : > { %v3612_v39 = vpop.f32.mrf.mxu1 }
 0x2a5   : > { %v3613_v17 = vadd.f32 %v3612_v39, %v3500_v16 }
 0x2a6   : > { %v3614_v34 = vpop.f32.mrf.mxu1 }
 0x2a7   : > { %v3615_v41 = vadd.f32 %v3614_v34, %v3502_v23  ;;  %v3917_v55 = vmax.f32 %v3613_v17, 0.0  ;;  %v3520_v17 = vadd.f32 %v7715_v2, %v7821_v5 }
 0x2a8   : > { %v3616_v0 = vpop.f32.mrf.mxu1 }
 0x2a9   : > { %v3617_v26 = vadd.f32 %v3616_v0, %v3504_v58  ;;  %v3918_v21 = vmax.f32 %v3615_v41, 0.0  ;;  %v7847_v0 = vpop.f32.mrf.mxu0  ;;  %v3524_v41 = vadd.f32 %v7727_v15, %v7821_v5 }
 0x2aa   : > { %v3618_v59 = vpop.f32.mrf.mxu1 }
 0x2ab   : > { %v3619_v56 = vadd.f32 %v3618_v59, %v3506_v53  ;;  %v3921_v14 = vmax.f32 %v3617_v26, 0.0 }
 0x2ac   : > { %v3622_v27 = vpop.f32.mrf.mxu1 }
 0x2ad   : > { %v3922_v7 = vmax.f32 %v3619_v56, 0.0  ;;  %v3981_v40 = vpack.c.bf16 %v3921_v14, %v3917_v55  ;;  %v3623_v39 = vadd.f32 %v3622_v27, %v3510_v6  ;;  %v3526_v14 = vadd.f32 %v7731_v4, %v7816_v49 }
 0x2ae   : > { %v3624_v12 = vpop.f32.mrf.mxu1  ;;  %v3532_v4 = vadd.f32 %v7743_v42, %v7816_v49 }
 0x2af   : > { %v3982_v1 = vpack.c.bf16 %v3922_v7, %v3918_v21  ;;  %v3625_v8 = vadd.f32 %v3624_v12, %v3512_v61  ;;  %v3925_v46 = vmax.f32 %v3623_v39, 0.0  ;;  %v7857_v7 = vpop.f32.mrf.mxu0 }
 0x2b0   : > { %v3626_v63 = vpop.f32.mrf.mxu1 }
 0x2b1   : > { %v3627_v51 = vadd.f32 %v3626_v63, %v3514_v48  ;;  %4308 = vmatprep.mubr.bf16.mxu0 %v3982_v1  ;;  %v3926_v58 = vmax.f32 %v3625_v8, 0.0  ;;  %v7859_v6 = vpop.f32.mrf.mxu0  ;;  %v3534_v63 = vadd.f32 %v7751_v43, %v7821_v5  ;;  %v3530_v8 = vadd.f32 %v7739_v20, %v7821_v5 }
 0x2b2   : > { %v3628_v34 = vpop.f32.mrf.mxu1  ;;  %4309 = vmatmul.mubr.bf16.vlgmr.msra.gmra.mxu0 %v3981_v40 }
 0x2b3   : > { %v3629_v37 = vadd.f32 %v3628_v34, %v3516_v33  ;;  %v3929_v23 = vmax.f32 %v3627_v51, 0.0  ;;  %v3536_v34 = vadd.f32 %v7754_v62, %v7816_v49  ;;  %v3542_v62 = vadd.f32 %v7764_v31, %v7816_v49 }
 0x2b4   : > { %v3632_v28 = vpop.f32.mrf.mxu1 }
 0x2b5   : > { %v3930_v16 = vmax.f32 %v3629_v37, 0.0  ;;  %v3985_v59 = vpack.c.bf16 %v3929_v23, %v3925_v46  ;;  %v3633_v55 = vadd.f32 %v3632_v28, %v3520_v17  ;;  %v7869_v28 = vpop.f32.mrf.mxu0  ;;  %v3544_v17 = vadd.f32 %v7772_v11, %v7821_v5 }
 0x2b6   : > { %v3634_v53 = vpop.f32.mrf.mxu1 }
 0x2b7   : > { %v3986_v26 = vpack.c.bf16 %v3930_v16, %v3926_v58  ;;  %v3635_v27 = vadd.f32 %v3634_v53, %v3522_v25  ;;  %v3933_v2 = vmax.f32 %v3633_v55, 0.0 }
 0x2b8   : > { %v3636_v56 = vpop.f32.mrf.mxu1 }
 0x2b9   : > { %v3637_v21 = vadd.f32 %v3636_v56, %v3524_v41  ;;  %4316 = vmatprep.mubr.bf16.mxu0 %v3986_v26  ;;  %v3934_v48 = vmax.f32 %v3635_v27, 0.0  ;;  %v7871_v41 = vpop.f32.mrf.mxu0  ;;  %v3540_v56 = vadd.f32 %v7762_v44, %v7821_v5 }
 0x2ba   : > { %v3638_v12 = vpop.f32.mrf.mxu1  ;;  %4317 = vmatmul.mubr.bf16.gmra.mxu0 %v3985_v59 }
 0x2bb   : > { %v3639_v50 = vadd.f32 %v3638_v12, %v3526_v14  ;;  %v3937_v61 = vmax.f32 %v3637_v21, 0.0  ;;  %v3546_v21 = vadd.f32 %v7780_v18, %v7816_v49  ;;  %v3552_v18 = vadd.f32 %v7784_v36, %v7816_v49 }
 0x2bc   : > { %v3642_v15 = vpop.f32.mrf.mxu1 }
 0x2bd   : > { %v3938_v1 = vmax.f32 %v3639_v50, 0.0  ;;  %v3989_v51 = vpack.c.bf16 %v3937_v61, %v3933_v2  ;;  %v3643_v58 = vadd.f32 %v3642_v15, %v3530_v8  ;;  %v7881_v50 = vpop.f32.mrf.mxu0  ;;  %v3550_v8 = vadd.f32 %v7782_v22, %v7821_v5 }
 0x2be   : > { %v3644_v40 = vpop.f32.mrf.mxu1 }
 0x2bf   : > { %v3990_v33 = vpack.c.bf16 %v3938_v1, %v3934_v48  ;;  %v3645_v37 = vadd.f32 %v3644_v40, %v3532_v4  ;;  %v3941_v20 = vmax.f32 %v3643_v58, 0.0  ;;  %v7883_v40 = vpop.f32.mrf.mxu0 }
 0x2c0   : > { %v3646_v39 = vpop.f32.mrf.mxu1 }
 0x2c1   : > { %v3647_v23 = vadd.f32 %v3646_v39, %v3534_v63  ;;  %4324 = vmatprep.mubr.bf16.mxu0 %v3990_v33  ;;  %v3942_v53 = vmax.f32 %v3645_v37, 0.0  ;;  %v3554_v63 = vadd.f32 %v7786_v54, %v7821_v5  ;;  %v7893_v58 = vpop.f32.mrf.mxu0 }
 0x2c2   : > { %v3648_v16 = vpop.f32.mrf.mxu1  ;;  %4325 = vmatmul.mubr.bf16.gmra.mxu0 %v3989_v51 }
 0x2c3   : > { %v3649_v42 = vadd.f32 %v3648_v16, %v3536_v34  ;;  %v3945_v46 = vmax.f32 %v3647_v23, 0.0  ;;  %v3556_v34 = vadd.f32 %v7788_v32, %v7816_v49  ;;  %v3562_v32 = vadd.f32 %v7792_v35, %v7816_v49 }
 0x2c4   : > { %v3652_v43 = vpop.f32.mrf.mxu1 }
 0x2c5   : > { %v3946_v25 = vmax.f32 %v3649_v42, 0.0  ;;  %v3993_v14 = vpack.c.bf16 %v3945_v46, %v3941_v20  ;;  %v3653_v61 = vadd.f32 %v3652_v43, %v3540_v56 }
 0x2c6   : > { %v3654_v26 = vpop.f32.mrf.mxu1 }
 0x2c7   : > { %v3994_v59 = vpack.c.bf16 %v3946_v25, %v3942_v53  ;;  %v3655_v55 = vadd.f32 %v3654_v26, %v3542_v62  ;;  %v3949_v44 = vmax.f32 %v3653_v61, 0.0  ;;  %v7895_v25 = vpop.f32.mrf.mxu0  ;;  %v3564_v26 = vadd.f32 %v7794_v45, %v7821_v5 }
 0x2c8   : > { %v3656_v27 = vpop.f32.mrf.mxu1 }
 0x2c9   : > { %v3657_v12 = vadd.f32 %v3656_v27, %v3544_v17  ;;  %4332 = vmatprep.mubr.bf16.mxu0 %v3994_v59  ;;  %v3950_v1 = vmax.f32 %v3655_v55, 0.0  ;;  %v3560_v17 = vadd.f32 %v7790_v3, %v7821_v5  ;;  %v7905_v55 = vpop.f32.mrf.mxu0 }
 0x2ca   : > { %v3658_v15 = vpop.f32.mrf.mxu1  ;;  %4333 = vmatmul.mubr.bf16.gmra.mxu0 %v3993_v14  ;;  %v3566_v14 = vadd.f32 %v7796_v47, %v7816_v49  ;;  %v3572_v47 = vadd.f32 %v7800_v13, %v7816_v49  ;;  %v8152_v13 = vsub.s32 3, %v8149_v24 }
 0x2cb   : > { %v3659_v31 = vadd.f32 %v3658_v15, %v3546_v21  ;;  %v3953_v48 = vmax.f32 %v3657_v12, 0.0 }
 0x2cc   : > { %v3662_v11 = vpop.f32.mrf.mxu1 }
 0x2cd   : > { %v3954_v2 = vmax.f32 %v3659_v31, 0.0  ;;  %v3997_v51 = vpack.c.bf16 %v3953_v48, %v3949_v44  ;;  %v3663_v16 = vadd.f32 %v3662_v11, %v3550_v8  ;;  %v7907_v11 = vpop.f32.mrf.mxu0 }
 0x2ce   : > { %v3664_v4 = vpop.f32.mrf.mxu1 }
 0x2cf   : > { %v3998_v33 = vpack.c.bf16 %v3954_v2, %v3950_v1  ;;  %v3665_v37 = vadd.f32 %v3664_v4, %v3552_v18  ;;  %v3957_v22 = vmax.f32 %v3663_v16, 0.0  ;;  %v3574_v2 = vadd.f32 %v7802_v19, %v7821_v5 }
 0x2d0   : > { %v3666_v39 = vpop.f32.mrf.mxu1  ;;  %v3570_v4 = vadd.f32 %v7798_v10, %v7821_v5  ;;  %v7922_v19 = vrot.slane %v7809_v30, %v8152_v13  ;;  %v8153_v10 = vsub.s32 2, %v8149_v24 }
 0x2d1   : > { %v3667_v23 = vadd.f32 %v3666_v39, %v3554_v63  ;;  %4340 = vmatprep.mubr.bf16.mxu0 %v3998_v33  ;;  %v3958_v43 = vmax.f32 %v3665_v37, 0.0  ;;  %v3576_v33 = vadd.f32 %v7804_v38, %v7816_v49  ;;  %v7917_v39 = vpop.f32.mrf.mxu0 }
 0x2d2   : > { %v3668_v42 = vpop.f32.mrf.mxu1  ;;  %4341 = vmatmul.mubr.bf16.gmra.mxu0 %v3997_v51  ;;  %v7927_v5 = vrot.slane %v7809_v30, %v8153_v10 }
 0x2d3   : > { %v3669_v36 = vadd.f32 %v3668_v42, %v3556_v34  ;;  %v3961_v46 = vmax.f32 %v3667_v23, 0.0 }
 0x2d4   : > { %v3672_v54 = vpop.f32.mrf.mxu1  ;;  %v3726_v24 = vadd.f32 %v7811_v57, %v7927_v5  ;;  %v3746_v13 = vadd.f32 %v7869_v28, %v7927_v5 }
 0x2d5   : > { %v3962_v53 = vmax.f32 %v3669_v36, 0.0  ;;  %v4001_v59 = vpack.c.bf16 %v3961_v46, %v3957_v22  ;;  %v3673_v12 = vadd.f32 %v3672_v54, %v3560_v17  ;;  %v7929_v36 = vpop.f32.mrf.mxu0 }
 0x2d6   : > { %v3674_v20 = vpop.f32.mrf.mxu1 }
 0x2d7   : > { %v4002_v62 = vpack.c.bf16 %v3962_v53, %v3958_v43  ;;  %v3675_v27 = vadd.f32 %v3674_v20, %v3562_v32  ;;  %v3965_v3 = vmax.f32 %v3673_v12, 0.0  ;;  %v3728_v43 = vadd.f32 %v7823_v60, %v7922_v19  ;;  %v7939_v17 = vpop.f32.mrf.mxu0 }
 0x2d8   : > { %v3676_v56 = vpop.f32.mrf.mxu1  ;;  %v3730_v53 = vadd.f32 %v7833_v29, %v7927_v5  ;;  %v3732_v32 = vadd.f32 %v7835_v9, %v7922_v19  ;;  %v3738_v9 = vadd.f32 %v7847_v0, %v7922_v19 }
 0x2d9   : > { %v3677_v21 = vadd.f32 %v3676_v56, %v3564_v26  ;;  %4348 = vmatprep.mubr.bf16.mxu0 %v4002_v62  ;;  %v3966_v31 = vmax.f32 %v3675_v27, 0.0  ;;  %v7941_v12 = vpop.f32.mrf.mxu0 }
 0x2da   : > { %v3678_v61 = vpop.f32.mrf.mxu1  ;;  %4349 = vmatmul.mubr.bf16.gmra.mxu0 %v4001_v59 }
 0x2db   : > { %v3679_v35 = vadd.f32 %v3678_v61, %v3566_v14  ;;  %v3969_v15 = vmax.f32 %v3677_v21, 0.0 }
 0x2dc   : > { %v3682_v45 = vpop.f32.mrf.mxu1 }
 0x2dd   : > { %v3970_v48 = vmax.f32 %v3679_v35, 0.0  ;;  %v4005_v18 = vpack.c.bf16 %v3969_v15, %v3965_v3  ;;  %v3683_v34 = vadd.f32 %v3682_v45, %v3570_v4  ;;  %v3740_v35 = vadd.f32 %v7857_v7, %v7927_v5 }
 0x2de   : > { %v3684_v1 = vpop.f32.mrf.mxu1  ;;  %v3736_v45 = vadd.f32 %v7845_v52, %v7927_v5  ;;  %v3742_v3 = vadd.f32 %v7859_v6, %v7922_v19  ;;  %v3748_v6 = vadd.f32 %v7871_v41, %v7922_v19 }
 0x2df   : > { %v4006_v44 = vpack.c.bf16 %v3970_v48, %v3966_v31  ;;  %v3685_v8 = vadd.f32 %v3684_v1, %v3572_v47  ;;  %v3973_v46 = vmax.f32 %v3683_v34, 0.0  ;;  %v3750_v34 = vadd.f32 %v7881_v50, %v7927_v5 }
 0x2e0   : > { %v3686_v63 = vpop.f32.mrf.mxu1 }
 0x2e1   : > { %v3687_v51 = vadd.f32 %v3686_v63, %v3574_v2  ;;  %4356 = vmatprep.mubr.bf16.mxu0 %v4006_v44  ;;  %v3974_v16 = vmax.f32 %v3685_v8, 0.0  ;;  %v7951_v2 = vpop.f32.mrf.mxu0 }
 0x2e2   : > { %v3688_v37 = vpop.f32.mrf.mxu1  ;;  %4357 = vmatmul.mubr.bf16.gmra.mxu0 %v4005_v18 }
 0x2e3   : > { %v3689_v23 = vadd.f32 %v3688_v37, %v3576_v33  ;;  %v3977_v38 = vmax.f32 %v3687_v51, 0.0  ;;  %v7953_v8 = vpop.f32.mrf.mxu0 }
 0x2e4   : > { %v3838_v49 = vpop.f32.mrf.mxu1 }
 0x2e5   : > { %v3978_v42 = vmax.f32 %v3689_v23, 0.0  ;;  %v4009_v30 = vpack.c.bf16 %v3977_v38, %v3973_v46  ;;  %v3839_v59 = vadd.f32 %v3838_v49, %v3726_v24  ;;  %v3752_v38 = vadd.f32 %v7883_v40, %v7922_v19 }
 0x2e6   : > { %v3840_v54 = vpop.f32.mrf.mxu1  ;;  %v3760_v40 = vadd.f32 %v7905_v55, %v7927_v5 }
 0x2e7   : > { %v4010_v22 = vpack.c.bf16 %v3978_v42, %v3974_v16  ;;  %v3841_v26 = vadd.f32 %v3840_v54, %v3728_v43  ;;  %v3919_v57 = vmax.f32 %v3839_v59, 0.0  ;;  %v3779_v42 = vpop.f32.mrf.mxu0 }
 0x2e8   : > { %v3842_v20 = vpop.f32.mrf.mxu1 }
 0x2e9   : > { %v3843_v62 = vadd.f32 %v3842_v20, %v3730_v53  ;;  %4364 = vmatprep.mubr.bf16.mxu0 %v4010_v22  ;;  %v3920_v27 = vmax.f32 %v3841_v26, 0.0  ;;  %v3781_v24 = vpop.f32.mrf.mxu0  ;;  %v3758_v20 = vadd.f32 %v7895_v25, %v7922_v19  ;;  %v3756_v26 = vadd.f32 %v7893_v58, %v7927_v5 }
 0x2ea   : > { %v3844_v56 = vpop.f32.mrf.mxu1  ;;  %4365 = vmatmul.mubr.bf16.gmra.mxu0 %v4009_v30 }
 0x2eb   : > { %v3845_v60 = vadd.f32 %v3844_v56, %v3732_v32  ;;  %v3923_v14 = vmax.f32 %v3843_v62, 0.0  ;;  %v3762_v56 = vadd.f32 %v7907_v11, %v7922_v19  ;;  %v3770_v11 = vadd.f32 %v7939_v17, %v7927_v5 }
 0x2ec   : > { %v3848_v29 = vpop.f32.mrf.mxu1 }
 0x2ed   : > { %v3924_v21 = vmax.f32 %v3845_v60, 0.0  ;;  %v3983_v31 = vpack.c.bf16 %v3923_v14, %v3919_v57  ;;  %v3849_v44 = vadd.f32 %v3848_v29, %v3736_v45  ;;  %v3785_v29 = vpop.f32.mrf.mxu0  ;;  %v3768_v45 = vadd.f32 %v7929_v36, %v7922_v19 }
 0x2ee   : > { %v3850_v61 = vpop.f32.mrf.mxu1 }
 0x2ef   : > { %v3984_v15 = vpack.c.bf16 %v3924_v21, %v3920_v27  ;;  %v3851_v1 = vadd.f32 %v3850_v61, %v3738_v9  ;;  %v3927_v52 = vmax.f32 %v3849_v44, 0.0 }
 0x2f0   : > { %v3852_v48 = vpop.f32.mrf.mxu1 }
 0x2f1   : > { %v3853_v47 = vadd.f32 %v3852_v48, %v3740_v35  ;;  %4405 = vmatprep.mubr.bf16.mxu1 %v3984_v15  ;;  %v3928_v63 = vmax.f32 %v3851_v1, 0.0  ;;  %v3787_v35 = vpop.f32.mrf.mxu0  ;;  %v3766_v48 = vadd.f32 %v7917_v39, %v7927_v5 }
 0x2f2   : > { %v3854_v4 = vpop.f32.mrf.mxu1  ;;  %4406 = vmatmul.mubr.bf16.vlgmr.msra.gmra.mxu1 %v3983_v31 }
 0x2f3   : > { %v3855_v0 = vadd.f32 %v3854_v4, %v3742_v3  ;;  %v3931_v18 = vmax.f32 %v3853_v47, 0.0  ;;  %v3772_v47 = vadd.f32 %v7941_v12, %v7922_v19  ;;  %v3780_v12 = vadd.f32 %v3779_v42, %v7927_v5 }
 0x2f4   : > { %v3858_v7 = vpop.f32.mrf.mxu1 }
 0x2f5   : > { %v3932_v33 = vmax.f32 %v3855_v0, 0.0  ;;  %v3987_v23 = vpack.c.bf16 %v3931_v18, %v3927_v52  ;;  %v3859_v46 = vadd.f32 %v3858_v7, %v3746_v13  ;;  %v3789_v0 = vpop.f32.mrf.mxu0  ;;  %v3776_v13 = vadd.f32 %v7951_v2, %v7927_v5 }
 0x2f6   : > { %v3860_v51 = vpop.f32.mrf.mxu1  ;;  %v3788_v2 = vadd.f32 %v3787_v35, %v7922_v19 }
 0x2f7   : > { %v3988_v37 = vpack.c.bf16 %v3932_v33, %v3928_v63  ;;  %v3861_v49 = vadd.f32 %v3860_v51, %v3748_v6  ;;  %v3935_v30 = vmax.f32 %v3859_v46, 0.0  ;;  %v3791_v51 = vpop.f32.mrf.mxu0 }
 0x2f8   : > { %v3862_v10 = vpop.f32.mrf.mxu1 }
 0x2f9   : > { %v3863_v16 = vadd.f32 %v3862_v10, %v3750_v34  ;;  %4413 = vmatprep.mubr.bf16.mxu1 %v3988_v37  ;;  %v3936_v50 = vmax.f32 %v3861_v49, 0.0  ;;  %v3778_v34 = vadd.f32 %v7953_v8, %v7922_v19  ;;  %v3795_v46 = vpop.f32.mrf.mxu0 }
 0x2fa   : > { %v3864_v54 = vpop.f32.mrf.mxu1  ;;  %4414 = vmatmul.mubr.bf16.gmra.mxu1 %v3987_v23 }
 0x2fb   : > { %v3865_v41 = vadd.f32 %v3864_v54, %v3752_v38  ;;  %v3939_v43 = vmax.f32 %v3863_v16, 0.0  ;;  %v3782_v38 = vadd.f32 %v3781_v24, %v7922_v19 }
 0x2fc   : > { %v3868_v53 = vpop.f32.mrf.mxu1 }
 0x2fd   : > { %v3940_v22 = vmax.f32 %v3865_v41, 0.0  ;;  %v3991_v62 = vpack.c.bf16 %v3939_v43, %v3935_v30  ;;  %v3869_v27 = vadd.f32 %v3868_v53, %v3756_v26 }
 0x2fe   : > { %v3870_v28 = vpop.f32.mrf.mxu1 }
 0x2ff   : > { %v3992_v32 = vpack.c.bf16 %v3940_v22, %v3936_v50  ;;  %v3871_v60 = vadd.f32 %v3870_v28, %v3758_v20  ;;  %v3943_v15 = vmax.f32 %v3869_v27, 0.0  ;;  %v3797_v22 = vpop.f32.mrf.mxu0  ;;  %v3790_v20 = vadd.f32 %v3789_v0, %v7927_v5 }
 0x300   : > { %v3872_v59 = vpop.f32.mrf.mxu1 }
 0x301   : > { %v3873_v14 = vadd.f32 %v3872_v59, %v3760_v40  ;;  %4421 = vmatprep.mubr.bf16.mxu1 %v3992_v32  ;;  %v3944_v55 = vmax.f32 %v3871_v60, 0.0  ;;  %v3786_v40 = vadd.f32 %v3785_v29, %v7927_v5  ;;  %v3799_v60 = vpop.f32.mrf.mxu0  ;;  %v3798_v29 = vadd.f32 %v3797_v22, %v7922_v19 }
 0x302   : > { %v3874_v21 = vpop.f32.mrf.mxu1  ;;  %4422 = vmatmul.mubr.bf16.gmra.mxu1 %v3991_v62  ;;  %v3792_v62 = vadd.f32 %v3791_v51, %v7922_v19 }
 0x303   : > { %v3875_v25 = vadd.f32 %v3874_v21, %v3762_v56  ;;  %v3947_v57 = vmax.f32 %v3873_v14, 0.0 }
 0x304   : > { %v3878_v61 = vpop.f32.mrf.mxu1 }
 0x305   : > { %v3948_v9 = vmax.f32 %v3875_v25, 0.0  ;;  %v3995_v3 = vpack.c.bf16 %v3947_v57, %v3943_v15  ;;  %v3879_v18 = vadd.f32 %v3878_v61, %v3766_v48 }
 0x306   : > { %v3880_v58 = vpop.f32.mrf.mxu1 }
 0x307   : > { %v3996_v31 = vpack.c.bf16 %v3948_v9, %v3944_v55  ;;  %v3881_v44 = vadd.f32 %v3880_v58, %v3768_v45  ;;  %v3951_v6 = vmax.f32 %v3879_v18, 0.0  ;;  %v3801_v9 = vpop.f32.mrf.mxu0  ;;  %v3800_v58 = vadd.f32 %v3799_v60, %v7927_v5 }
 0x308   : > { %v3882_v1 = vpop.f32.mrf.mxu1 }
 0x309   : > { %v3883_v4 = vadd.f32 %v3882_v1, %v3770_v11  ;;  %4429 = vmatprep.mubr.bf16.mxu1 %v3996_v31  ;;  %v3952_v17 = vmax.f32 %v3881_v44, 0.0  ;;  %v3796_v11 = vadd.f32 %v3795_v46, %v7927_v5 }
 0x30a   : > { %v3884_v7 = vpop.f32.mrf.mxu1  ;;  %4430 = vmatmul.mubr.bf16.gmra.mxu1 %v3995_v3  ;;  %v3802_v3 = vadd.f32 %v3801_v9, %v7922_v19 }
 0x30b   : > { %v3885_v36 = vadd.f32 %v3884_v7, %v3772_v47  ;;  %v3955_v63 = vmax.f32 %v3883_v4, 0.0 }
 0x30c   : > { %v3888_v33 = vpop.f32.mrf.mxu1 }
 0x30d   : > { %v3956_v52 = vmax.f32 %v3885_v36, 0.0  ;;  %v3999_v23 = vpack.c.bf16 %v3955_v63, %v3951_v6  ;;  %v3889_v54 = vadd.f32 %v3888_v33, %v3776_v13 }
 0x30e   : > { %v3890_v39 = vpop.f32.mrf.mxu1 }
 0x30f   : > { %v4000_v37 = vpack.c.bf16 %v3956_v52, %v3952_v17  ;;  %v3891_v49 = vadd.f32 %v3890_v39, %v3778_v34  ;;  %v3959_v30 = vmax.f32 %v3889_v54, 0.0 }
 0x310   : > { %v3892_v10 = vpop.f32.mrf.mxu1 }
 0x311   : > { %v3893_v16 = vadd.f32 %v3892_v10, %v3780_v12  ;;  %4437 = vmatprep.mubr.bf16.mxu1 %v4000_v37  ;;  %v3960_v50 = vmax.f32 %v3891_v49, 0.0 }
 0x312   : > { %v3894_v41 = vpop.f32.mrf.mxu1  ;;  %4438 = vmatmul.mubr.bf16.gmra.mxu1 %v3999_v23 }
 0x313   : > { %v3895_v43 = vadd.f32 %v3894_v41, %v3782_v38  ;;  %v3963_v53 = vmax.f32 %v3893_v16, 0.0 }
 0x314   : > { %v3898_v8 = vpop.f32.mrf.mxu1 }
 0x315   : > { %v3964_v42 = vmax.f32 %v3895_v43, 0.0  ;;  %v4003_v32 = vpack.c.bf16 %v3963_v53, %v3959_v30  ;;  %v3899_v14 = vadd.f32 %v3898_v8, %v3786_v40  ;;  %v7999_v43 = vld [vmem:[%s8095_s6] ss:$0 sm:$0xff] }
 0x316   : > { %v3900_v28 = vpop.f32.mrf.mxu1 }
 0x317   : > { %v4004_v24 = vpack.c.bf16 %v3964_v42, %v3960_v50  ;;  %v3901_v59 = vadd.f32 %v3900_v28, %v3788_v2  ;;  %v3967_v35 = vmax.f32 %v3899_v14, 0.0 }
 0x318   : > { %v3902_v26 = vpop.f32.mrf.mxu1 }
 0x319   : > { %v3903_v56 = vadd.f32 %v3902_v26, %v3790_v20  ;;  %4445 = vmatprep.mubr.bf16.mxu1 %v4004_v24  ;;  %v3968_v61 = vmax.f32 %v3901_v59, 0.0 }
 0x31a   : > { %v3904_v27 = vpop.f32.mrf.mxu1  ;;  %4446 = vmatmul.mubr.bf16.gmra.mxu1 %v4003_v32 }
 0x31b   : > { %v3905_v21 = vadd.f32 %v3904_v27, %v3792_v62  ;;  %v3971_v25 = vmax.f32 %v3903_v56, 0.0 }
 0x31c   : > { %v3908_v57 = vpop.f32.mrf.mxu1 }
 0x31d   : > { %v3972_v55 = vmax.f32 %v3905_v21, 0.0  ;;  %v4007_v31 = vpack.c.bf16 %v3971_v25, %v3967_v35  ;;  %v3909_v44 = vadd.f32 %v3908_v57, %v3796_v11 }
 0x31e   : > { %v3910_v15 = vpop.f32.mrf.mxu1 }
 0x31f   : > { %v4008_v45 = vpack.c.bf16 %v3972_v55, %v3968_v61  ;;  %v3911_v1 = vadd.f32 %v3910_v15, %v3798_v29  ;;  %v3975_v63 = vmax.f32 %v3909_v44, 0.0 }
 0x320   : > { %v3912_v48 = vpop.f32.mrf.mxu1 }
 0x321   : > { %v3913_v47 = vadd.f32 %v3912_v48, %v3800_v58  ;;  %4453 = vmatprep.mubr.bf16.mxu1 %v4008_v45  ;;  %v3976_v7 = vmax.f32 %v3911_v1, 0.0 }
 0x322   : > { %v3914_v4 = vpop.f32.mrf.mxu1  ;;  %4454 = vmatmul.mubr.bf16.gmra.mxu1 %v4007_v31 }
 0x323   : > { %v3915_v0 = vadd.f32 %v3914_v4, %v3802_v3  ;;  %v3979_v18 = vmax.f32 %v3913_v47, 0.0 }
 0x325   : > { %v3980_v36 = vmax.f32 %v3915_v0, 0.0  ;;  %v4011_v17 = vpack.c.bf16 %v3979_v18, %v3975_v63 }
 0x327   : > { %v4012_v33 = vpack.c.bf16 %v3980_v36, %v3976_v7 }
 0x329   : > { %4461 = vmatprep.mubr.bf16.mxu1 %v4012_v33 }
 0x32a   : > { %4462 = vmatmul.mubr.bf16.gmra.mxu1 %v4011_v17 }
 0x372   : > { %v4964_v5 = vpop.f32.mrf.mxu0 }
 0x374   : > { %v4965_v52 = vpop.f32.mrf.mxu0 }
 0x375   : > { %v4966_v41 = vadd.f32 %v4965_v52, %v4964_v5 }
 0x376   : > { %v4967_v51 = vpop.f32.mrf.mxu0 }
 0x377   : > { %v4311_v42 = vadd.f32 %v4966_v41, %v7999_v43 }
 0x378   : > { %v4968_v19 = vpop.f32.mrf.mxu0 }
 0x379   : > { %v4969_v22 = vadd.f32 %v4968_v19, %v4967_v51 }
 0x37a   : > { %v4970_v6 = vpop.f32.mrf.mxu0 }
 0x37b   : > { %v4314_v40 = vadd.f32 %v4969_v22, %v7999_v43 }
 0x37c   : > { %v4971_v39 = vpop.f32.mrf.mxu0 }
 0x37d   : > { %v4972_v32 = vadd.f32 %v4971_v39, %v4970_v6 }
 0x37e   : > { %v4973_v34 = vpop.f32.mrf.mxu0 }
 0x37f   : > { %v4319_v14 = vadd.f32 %v4972_v32, %v7999_v43 }
 0x380   : > { %v4974_v12 = vpop.f32.mrf.mxu0 }
 0x381   : > { %v4975_v27 = vadd.f32 %v4974_v12, %v4973_v34 }
 0x382   : > { %v4976_v37 = vpop.f32.mrf.mxu0 }
 0x383   : > { %v4322_v9 = vadd.f32 %v4975_v27, %v7999_v43 }
 0x384   : > { %v4977_v13 = vpop.f32.mrf.mxu0 }
 0x385   : > { %v4978_v35 = vadd.f32 %v4977_v13, %v4976_v37 }
 0x386   : > { %v4979_v23 = vpop.f32.mrf.mxu0 }
 0x387   : > { %v4327_v31 = vadd.f32 %v4978_v35, %v7999_v43 }
 0x388   : > { %v4980_v10 = vpop.f32.mrf.mxu0 }
 0x389   : > { %v4981_v48 = vadd.f32 %v4980_v10, %v4979_v23 }
 0x38a   : > { %v4982_v38 = vpop.f32.mrf.mxu0 }
 0x38b   : > { %v4330_v0 = vadd.f32 %v4981_v48, %v7999_v43 }
 0x38c   : > { %v4983_v49 = vpop.f32.mrf.mxu0 }
 0x38d   : > { %v4984_v18 = vadd.f32 %v4983_v49, %v4982_v38 }
 0x38e   : > { %v4985_v16 = vpop.f32.mrf.mxu0 }
 0x38f   : > { %v4335_v5 = vadd.f32 %v4984_v18, %v7999_v43 }
 0x390   : > { %v4986_v46 = vpop.f32.mrf.mxu0 }
 0x391   : > { %v4987_v52 = vadd.f32 %v4986_v46, %v4985_v16 }
 0x392   : > { %v7993_v54 = vpop.f32.mrf.mxu0 }
 0x393   : > { %v4338_v12 = vadd.f32 %v4987_v52, %v7999_v43 }
 0x394   : > { %v4989_v53 = vpop.f32.mrf.mxu0 }
 0x395   : > { %v4990_v37 = vadd.f32 %v4989_v53, %v7993_v54 }
 0x396   : > { %v4991_v28 = vpop.f32.mrf.mxu0 }
 0x397   : > { %v4343_v16 = vadd.f32 %v4990_v37, %v7999_v43 }
 0x398   : > { %v4992_v62 = vpop.f32.mrf.mxu0 }
 0x399   : > { %v4993_v46 = vadd.f32 %v4992_v62, %v4991_v28 }
 0x39a   : > { %v4994_v25 = vpop.f32.mrf.mxu0 }
 0x39c   : > { %v4995_v29 = vpop.f32.mrf.mxu0 }
 0x39d   : > { %v4996_v54 = vadd.f32 %v4995_v29, %v4994_v25 }
 0x39e   : > { %v4997_v1 = vpop.f32.mrf.mxu0 }
 0x39f   : > { %v4351_v32 = vadd.f32 %v4996_v54, %v7999_v43 }
 0x3a0   : > { %v4998_v36 = vpop.f32.mrf.mxu0 }
 0x3a1   : > { %v4999_v28 = vadd.f32 %v4998_v36, %v4997_v1 }
 0x3a2   : > { %v5000_v19 = vpop.f32.mrf.mxu0 }
 0x3a4   : > { %v5001_v23 = vpop.f32.mrf.mxu0 }
 0x3a5   : > { %v5002_v27 = vadd.f32 %v5001_v23, %v5000_v19 }
 0x3b2   : > { %v5028_v8 = vpop.f32.mrf.mxu1 }
 0x3b4   : > { %v5029_v50 = vpop.f32.mrf.mxu1 }
 0x3b5   : > { %v5030_v30 = vadd.f32 %v5029_v50, %v5028_v8  ;;  %v5003_v8 = vpop.f32.mrf.mxu0 }
 0x3b6   : > { %v5031_v2 = vpop.f32.mrf.mxu1 }
 0x3b7   : > { %v4408_v20 = vadd.f32 %v5030_v30, %v4311_v42  ;;  %v4346_v30 = vadd.f32 %v4993_v46, %v7999_v43 }
 0x3b8   : > { %v5032_v24 = vpop.f32.mrf.mxu1 }
 0x3b9   : > { %4470 = vst [vmem:[%s8005_s16] sm:$0xff] %v4408_v20  ;;  %v5033_v26 = vadd.f32 %v5032_v24, %v5031_v2  ;;  %v5004_v2 = vpop.f32.mrf.mxu0 }
 0x3ba   : > { %v5034_v59 = vpop.f32.mrf.mxu1  ;;  %v5005_v35 = vadd.f32 %v5004_v2, %v5003_v8 }
 0x3bb   : > { %v4411_v56 = vadd.f32 %v5033_v26, %v4314_v40  ;;  %v5006_v62 = vpop.f32.mrf.mxu0 }
 0x3bc   : > { %v5035_v60 = vpop.f32.mrf.mxu1 }
 0x3bd   : > { %4471 = vst [vmem:[%s8005_s16 + $0x8] sm:$0xff] %v4411_v56  ;;  %v5036_v21 = vadd.f32 %v5035_v60, %v5034_v59  ;;  %v5007_v25 = vpop.f32.mrf.mxu0 }
 0x3be   : > { %v5037_v57 = vpop.f32.mrf.mxu1  ;;  %v5008_v48 = vadd.f32 %v5007_v25, %v5006_v62 }
 0x3bf   : > { %v4416_v61 = vadd.f32 %v5036_v21, %v4319_v14  ;;  %v4354_v14 = vadd.f32 %v4999_v28, %v7999_v43  ;;  %v5009_v29 = vpop.f32.mrf.mxu0 }
 0x3c0   : > { %v5038_v55 = vpop.f32.mrf.mxu1 }
 0x3c1   : > { %4472 = vst [vmem:[%s8005_s16 + $0x10] sm:$0xff] %v4416_v61  ;;  %v5039_v15 = vadd.f32 %v5038_v55, %v5037_v57  ;;  %v5010_v1 = vpop.f32.mrf.mxu0 }
 0x3c2   : > { %v5040_v58 = vpop.f32.mrf.mxu1  ;;  %v5011_v18 = vadd.f32 %v5010_v1, %v5009_v29 }
 0x3c3   : > { %v4419_v45 = vadd.f32 %v5039_v15, %v4322_v9  ;;  %v4359_v9 = vadd.f32 %v5002_v27, %v7999_v43 }
 0x3c4   : > { %v5041_v11 = vpop.f32.mrf.mxu1 }
 0x3c5   : > { %4473 = vst [vmem:[%s8005_s16 + $0x18] sm:$0xff] %v4419_v45  ;;  %v5042_v3 = vadd.f32 %v5041_v11, %v5040_v58 }
 0x3c6   : > { %v5043_v47 = vpop.f32.mrf.mxu1 }
 0x3c7   : > { %v4424_v44 = vadd.f32 %v5042_v3, %v4327_v31  ;;  %v4362_v31 = vadd.f32 %v5005_v35, %v7999_v43 }
 0x3c8   : > { %v5044_v4 = vpop.f32.mrf.mxu1 }
 0x3c9   : > { %4474 = vst [vmem:[%s8005_s16 + $0x20] sm:$0xff] %v4424_v44  ;;  %v5045_v7 = vadd.f32 %v5044_v4, %v5043_v47 }
 0x3ca   : > { %v5046_v63 = vpop.f32.mrf.mxu1 }
 0x3cb   : > { %v4427_v33 = vadd.f32 %v5045_v7, %v4330_v0  ;;  %v4367_v0 = vadd.f32 %v5008_v48, %v7999_v43 }
 0x3cc   : > { %v5047_v17 = vpop.f32.mrf.mxu1 }
 0x3cd   : > { %4475 = vst [vmem:[%s8005_s16 + $0x28] sm:$0xff] %v4427_v33  ;;  %v5048_v51 = vadd.f32 %v5047_v17, %v5046_v63  ;;  %v4370_v17 = vadd.f32 %v5011_v18, %v7999_v43 }
 0x3ce   : > { %v5049_v6 = vpop.f32.mrf.mxu1 }
 0x3cf   : > { %v4432_v39 = vadd.f32 %v5048_v51, %v4335_v5 }
 0x3d0   : > { %v5050_v34 = vpop.f32.mrf.mxu1 }
 0x3d1   : > { %4476 = vst [vmem:[%s8005_s16 + $0x30] sm:$0xff] %v4432_v39  ;;  %v5051_v13 = vadd.f32 %v5050_v34, %v5049_v6 }
 0x3d2   : > { %v5052_v10 = vpop.f32.mrf.mxu1 }
 0x3d3   : > { %v4435_v38 = vadd.f32 %v5051_v13, %v4338_v12 }
 0x3d4   : > { %v5053_v49 = vpop.f32.mrf.mxu1 }
 0x3d5   : > { %4477 = vst [vmem:[%s8005_s16 + $0x38] sm:$0xff] %v4435_v38  ;;  %v5054_v41 = vadd.f32 %v5053_v49, %v5052_v10 }
 0x3d6   : > { %v5055_v50 = vpop.f32.mrf.mxu1 }
 0x3d7   : > { %v4440_v42 = vadd.f32 %v5054_v41, %v4343_v16 }
 0x3d8   : > { %v5056_v22 = vpop.f32.mrf.mxu1 }
 0x3d9   : > { %4478 = vst [vmem:[%s8005_s16 + $0x40] sm:$0xff] %v4440_v42  ;;  %v5057_v53 = vadd.f32 %v5056_v22, %v5055_v50 }
 0x3da   : > { %v5058_v20 = vpop.f32.mrf.mxu1 }
 0x3db   : > { %v4443_v24 = vadd.f32 %v5057_v53, %v4346_v30 }
 0x3dc   : > { %v5059_v40 = vpop.f32.mrf.mxu1 }
 0x3dd   : > { %4479 = vst [vmem:[%s8005_s16 + $0x48] sm:$0xff] %v4443_v24  ;;  %v5060_v26 = vadd.f32 %v5059_v40, %v5058_v20 }
 0x3de   : > { %v5061_v59 = vpop.f32.mrf.mxu1 }
 0x3df   : > { %v4448_v56 = vadd.f32 %v5060_v26, %v4351_v32 }
 0x3e0   : > { %v5062_v60 = vpop.f32.mrf.mxu1 }
 0x3e1   : > { %4480 = vst [vmem:[%s8005_s16 + $0x50] sm:$0xff] %v4448_v56  ;;  %v5063_v21 = vadd.f32 %v5062_v60, %v5061_v59 }
 0x3e2   : > { %v5064_v57 = vpop.f32.mrf.mxu1 }
 0x3e3   : > { %v4451_v61 = vadd.f32 %v5063_v21, %v4354_v14 }
 0x3e4   : > { %v5065_v55 = vpop.f32.mrf.mxu1 }
 0x3e5   : > { %4481 = vst [vmem:[%s8005_s16 + $0x58] sm:$0xff] %v4451_v61  ;;  %v5066_v15 = vadd.f32 %v5065_v55, %v5064_v57 }
 0x3e6   : > { %v5067_v58 = vpop.f32.mrf.mxu1 }
 0x3e7   : > { %v4456_v45 = vadd.f32 %v5066_v15, %v4359_v9 }
 0x3e8   : > { %v5068_v11 = vpop.f32.mrf.mxu1 }
 0x3e9   : > { %4482 = vst [vmem:[%s8005_s16 + $0x60] sm:$0xff] %v4456_v45  ;;  %v5069_v3 = vadd.f32 %v5068_v11, %v5067_v58 }
 0x3ea   : > { %v5070_v47 = vpop.f32.mrf.mxu1 }
 0x3eb   : > { %v4459_v44 = vadd.f32 %v5069_v3, %v4362_v31 }
 0x3ec   : > { %v5071_v4 = vpop.f32.mrf.mxu1 }
 0x3ed   : > { %4483 = vst [vmem:[%s8005_s16 + $0x68] sm:$0xff] %v4459_v44  ;;  %v5072_v7 = vadd.f32 %v5071_v4, %v5070_v47 }
 0x3ee   : > { %v5073_v36 = vpop.f32.mrf.mxu1 }
 0x3ef   : > { %v4464_v63 = vadd.f32 %v5072_v7, %v4367_v0 }
 0x3f0   : > { %v5074_v33 = vpop.f32.mrf.mxu1 }
 0x3f1   : > { %4484 = vst [vmem:[%s8005_s16 + $0x70] sm:$0xff] %v4464_v63  ;;  %v5075_v5 = vadd.f32 %v5074_v33, %v5073_v36 }
 0x3f3   : > { %v4467_v52 = vadd.f32 %v5075_v5, %v4370_v17 }
 0x3f5   : > { %4485 = vst [vmem:[%s8005_s16 + $0x78] sm:$0xff] %v4467_v52 }
 0x3f6   : > { %5651 = shalt.err (!%p5648_p3)
}
 0x3f7   : > { %s5652_s13 = scalar_lea.hbm %s8042_s20, 2048  ;;  %s5656_s14 = scalar_lea.hbm %s8096_s7, 4096 }
 0x3f8   : > { %p5653_p4 = scmp.ne.s32.totalorder %s8042_s20, %s5652_s13  ;;  %p5657_p9 = scmp.lt.s32.totalorder %s8042_s20, %s8096_s7 }
 0x3f9   : > { %p5658_p10 = scmp.lt.s32.totalorder %s5656_s14, %s5652_s13 }
 0x3fa   : > { %p5654_p7 = pnand %p5653_p4, %p5782_p5 }
 0x3fb   : > { %p5659_p11 = por %p5658_p10, %p5657_p9 }
 0x3fc   : > { %p5655_p8 = pneg %p5654_p7 }
 0x3fe   : > { %p5660_p12 = pnand %p5659_p11, %p5655_p8 }
 0x400   : > { %5663 = shalt.err (!%p5660_p12)
}
 0x401   : > { %s5702_s15 = smov 128   ;;  %s5703_s19 = smov 8  }
 0x402   : > { %5077 = dma.vmem_to_hbm [thread:$0]  (%p5782_p5), %s8044_s18, 2048, %s8042_s20, %s8049_s28, %s5702_s15, %s5702_s15, %s5703_s19  }
 0x403 PF: > { %p5083_p13 = scmp.ge.s32.totalorder %s5698_s27, 2  ;;  %s4515_s21 = sand.u32 1, %s5686_s24  }
 0x404   : > { %s4516_s29 = scalar_lea.sflag [#allocation3], %s4515_s21 }
 0x405   : > { %p5080_p0 = pnand %p5083_p13, %p5786_p6 }
 0x407   : > { %p5081_p1 = pneg %p5080_p0 }
 0x409   : > { %5681 = dma.done.wait (%p5081_p1), %s4516_s29, 2048  }
 0x40a   : > { %5683 = vsyncadd (%p5081_p1), %s4516_s29, 4294965248  ;;  %p17_p2 = scmp.ge.s32.totalorder %s5769_s30, 4   ;;  %s8154_s24 = smov %s5690_s25 }
 0x40b   : > { %s8155_s25 = smov %s5694_s26  ;;  %s8156_s26 = smov %s5780_s10 }
 0x40c   : > { %s8157_s27 = smov %s5769_s30  ;;  %19 = sbr.rel (!%p17_p2) target bundleno = 3 (0x3), region = 83 }
 0x411   :  { %4521 = vsyncpa [#allocation3], 1 }
 0x412   :  { %4523 = vsyncpa [#allocation3 + $0x1], 1 }

</bundles_post_ra>
